<compile_context>
chip_gen: v7x
topology: tpu7x:2x2x1
jax: 0.10.0
libtpu: 0.0.40
codegen_flags: <defaults>
</compile_context>

<pallas_src>
import functools

import jax
import jax.numpy as jnp
from jax import lax
from jax.experimental import pallas as pl
from jax.experimental.pallas import tpu as pltpu

BB_CA = 1             # BBHeavyAtom.CA
BIGINT = 1e10         # sentinel used by _knn_edges in the reference code
_SENTINEL = 1e12      # finite "invalid atom" squared-norm sentinel (> BIGINT)
_COORD_PAD = 8        # augmented coord channels: [-2x|x, |x|^2|1, 1||x|^2, pad]


def _round_up(x, m):
    return ((x + m - 1) // m) * m


def _pick_tile(nb128, max_tile):
    """Largest tile that divides nb128, is a multiple of 128 and <= max_tile,
    with a megacore-occupancy guard (>= 2 grid steps per axis when possible)."""
    m = nb128 // 128
    cands = [128 * d for d in range(1, m + 1) if m % d == 0 and 128 * d <= max_tile]
    if not cands:
        cands = [128]
    tile = max(cands)
    if nb128 // tile < 2:                       # v7x: keep both TCs busy
        smaller = [t for t in cands if nb128 // t >= 2]
        if smaller:
            tile = max(smaller)
    return tile


# --------------------------------------------------------------------------
# Pallas kernel: fused block-pair min squared distance + candidate masking
# --------------------------------------------------------------------------
def _fused_block_dist_kernel(row_ref, col_ref, rid_ref, cid_ref,
                             intra_ref, inter_ref):
    """One (TM, TN) tile of the masked intra/inter block-distance matrices.

    row_ref : (A, K, TM)    augmented source coords, coord-major (lane-dense)
    col_ref : (K, A*TN)     augmented dest coords, dest atoms batched along N
    rid_ref : (TM, 2)       per-source-block [batch_id, segment_id]
    cid_ref : (2, TN)       per-dest-block   [batch_id, segment_id]
    intra_ref, inter_ref : (TM, TN)  masked min squared distances (BIGINT
                                      where not a candidate / no valid pair)
    """
    n_atoms = row_ref.shape[0]
    tm, tn = intra_ref.shape

    col = col_ref[...]                              # load once per tile
    acc = None
    for a in range(n_atoms):                        # A matmul issues per tile
        # (K, TM)^T @ (K, A*TN) -> (TM, A*TN); DEFAULT precision (HIGHEST's
        # 6-pass bf16 decomposition dropped per the review).
        prod = lax.dot_general(
            row_ref[a], col,
            dimension_numbers=(((0,), (0,)), ((), ())),
            preferred_element_type=jnp.float32)
        for b in range(n_atoms):                    # lane-aligned static slabs
            d = prod[:, b * tn:(b + 1) * tn]
            acc = d if acc is None else jnp.minimum(acc, d)

    # clamp tiny negatives from |a|^2+|b|^2-2ab cancellation; map the invalid
    # -atom sentinel (~1e12) down to BIGINT so it matches the host semantics.
    d2 = jnp.minimum(jnp.maximum(acc, 0.0), BIGINT)

    # candidate masks folded into the kernel (same batch, no self loop,
    # same / different segment)
    rid = rid_ref[...]                              # (TM, 2) int32
    cid = cid_ref[...]                              # (2, TN) int32
    same_batch = rid[:, 0:1] == cid[0:1, :]         # (TM, TN)
    same_seg = rid[:, 1:2] == cid[1:2, :]
    row_g = lax.broadcasted_iota(jnp.int32, (tm, tn), 0) + pl.program_id(0) * tm
    col_g = lax.broadcasted_iota(jnp.int32, (tm, tn), 1) + pl.program_id(1) * tn
    cand = same_batch & (row_g != col_g)

    intra_ref[...] = jnp.where(cand & same_seg, d2, BIGINT)
    inter_ref[...] = jnp.where(cand & (~same_seg), d2, BIGINT)


def _prep_operands(x_blocks, atom_mask, nb_pad, tile):
    """Augmented, coord-major MXU operands.

    row slab a, block m:  [-2*x, |x|^2, 1, 0, 0, 0]   (K=8 sublanes)
    col slab b, block n:  [ x,   1, |x|^2, 0, 0, 0]
    so  row . col = |x_m|^2 + |x_n|^2 - 2 x_m.x_n.
    Invalid atoms: coords zeroed, squared norm = _SENTINEL (finite).
    """
    nb, n_atoms, _ = x_blocks.shape

    # center valid coords (conditioning of the norm decomposition only)
    mask_f = atom_mask.astype(jnp.float32)[..., None]
    center = jnp.sum(x_blocks * mask_f, axis=(0, 1)) / jnp.maximum(jnp.sum(mask_f), 1.0)
    x = jnp.where(atom_mask[..., None], x_blocks - center, 0.0)

    pad = nb_pad - nb
    x = jnp.pad(x, ((0, pad), (0, 0), (0, 0)))
    m = jnp.pad(atom_mask, ((0, pad), (0, 0)), constant_values=False)

    sqn = jnp.sum(x * x, axis=-1)
    sqn = jnp.where(m, sqn, _SENTINEL)[..., None]                 # (Nb_pad, A, 1)
    ones = jnp.ones_like(sqn)
    zpad = jnp.zeros((nb_pad, n_atoms, _COORD_PAD - 5), jnp.float32)

    row_feats = jnp.concatenate([-2.0 * x, sqn, ones, zpad], axis=-1)
    col_feats = jnp.concatenate([x, ones, sqn, zpad], axis=-1)

    # row operand: (A, K, Nb_pad) — coord-major, lane-dense
    row_aug = jnp.transpose(row_feats, (1, 2, 0))
    # col operand: (K, A*Nb_pad) reordered per tile so each output tile reads
    # one contiguous (K, A*tile) slab (dest atoms batched along N)
    n_tiles = nb_pad // tile
    col_cm = jnp.transpose(col_feats, (2, 1, 0))                  # (K, A, Nb_pad)
    col_cm = col_cm.reshape(_COORD_PAD, n_atoms, n_tiles, tile)
    col_cm = jnp.transpose(col_cm, (0, 2, 1, 3)).reshape(_COORD_PAD, n_atoms * nb_pad)
    return row_aug, col_cm


def _prep_ids(batch_id, segment_ids, nb_pad):
    nb = batch_id.shape[0]
    pad = nb_pad - nb
    b = jnp.pad(batch_id.astype(jnp.int32), (0, pad), constant_values=-1)
    s = jnp.pad(segment_ids.astype(jnp.int32), (0, pad), constant_values=-1)
    return jnp.stack([b, s], axis=1), jnp.stack([b, s], axis=0)   # (Nb,2), (2,Nb)


def block_pair_knn_dists(x_blocks, atom_mask, batch_id, segment_ids, *, max_tile=512):
    """Fused kernel wrapper.

    x_blocks: (Nb, A, 3) f32; atom_mask: (Nb, A) bool;
    batch_id / segment_ids: (Nb,) int32.
    Returns (intra_dm, inter_dm), each (Nb, Nb) f32 where non-candidate or
    no-valid-atom-pair entries are BIGINT.
    """
    nb, n_atoms, _ = x_blocks.shape
    nb_pad = _round_up(max(nb, 1), 128)
    tile = _pick_tile(nb_pad, max_tile)

    row_aug, col_cm = _prep_operands(x_blocks, atom_mask, nb_pad, tile)
    rid, cid = _prep_ids(batch_id, segment_ids, nb_pad)

    grid = (nb_pad // tile, nb_pad // tile)
    intra, inter = pl.pallas_call(
        _fused_block_dist_kernel,
        out_shape=(jax.ShapeDtypeStruct((nb_pad, nb_pad), jnp.float32),
                   jax.ShapeDtypeStruct((nb_pad, nb_pad), jnp.float32)),
        grid=grid,
        in_specs=[
            pl.BlockSpec((n_atoms, _COORD_PAD, tile), lambda i, j: (0, 0, i)),
            pl.BlockSpec((_COORD_PAD, n_atoms * tile), lambda i, j: (0, j)),
            pl.BlockSpec((tile, 2), lambda i, j: (i, 0)),
            pl.BlockSpec((2, tile), lambda i, j: (0, j)),
        ],
        out_specs=[pl.BlockSpec((tile, tile), lambda i, j: (i, j)),
                   pl.BlockSpec((tile, tile), lambda i, j: (i, j))],
        compiler_params=pltpu.CompilerParams(
            dimension_semantics=("parallel", "parallel")),
    )(row_aug, col_cm, rid, cid)

    # TODO(synk): for very large Nb a per-row running top-k inside the kernel
    # would avoid materializing the dense Nb^2 matrices at all.
    return intra[:nb, :nb], inter[:nb, :nb]


# --------------------------------------------------------------------------
# Edge-type embedding (plain JAX: a 2-row lookup is a fused select)
# --------------------------------------------------------------------------
def edge_embedding_lookup(edge_type_idx, weight):
    # TODO(synk): assumes the 2-row nn.Embedding(2, edge_size) table.
    w = weight.astype(jnp.float32)
    return jnp.where(edge_type_idx[:, None] == 0, w[0][None, :], w[1][None, :])


# --------------------------------------------------------------------------
# JAX glue: KNN edge construction (KNNBatchEdgeConstructor semantics)
# --------------------------------------------------------------------------
def _knn_edges_from_masked(dm, k):
    """k nearest candidate dst per src; masks already folded in by the kernel.
    Works on squared distances (monotonic for the ordering; sqrt dropped)."""
    nb = dm.shape[0]
    _, dst = lax.top_k(-dm, k)
    src = jnp.broadcast_to(jnp.arange(nb, dtype=jnp.int32)[:, None], (nb, k))
    # TODO(synk): the reference drops neighbors with dist >= BIGINT (nodes with
    # < k valid candidates -> dynamic edge count); static k kept here.
    return jnp.stack([src.reshape(-1), dst.reshape(-1).astype(jnp.int32)], axis=0)


def edge_embedding_forward(params, pos_heavyatom, aa, atom_types, mask_atoms,
                           block_lengths, lengths, fragment_type,
                           *, max_num_atoms, k_neighbors):
    B, L = aa.shape
    A = max_num_atoms
    nb = B * L

    pos = pos_heavyatom[:, :, :A, :]
    mask_atoms = mask_atoms[:, :, :A]

    # residue / atom validity (mask_residue = CA present)
    mask_residue = mask_atoms[:, :, BB_CA]
    atom_valid = mask_residue[:, :, None] & mask_atoms                 # (B,L,A)

    # segment / batch / block ids, as in construct_edges
    segment_id = fragment_type.reshape(-1).astype(jnp.int32)
    segment_ids = jnp.where(segment_id == 2, 1, segment_id)

    # TODO(synk): batch_id via cumsum assumes sum(lengths) == B*L (no padding).
    batch_id = jnp.zeros((nb,), jnp.int32)
    batch_id = batch_id.at[jnp.cumsum(lengths)[:-1]].set(1)
    batch_id = jnp.cumsum(batch_id)

    blk_len = jnp.full((nb,), A, jnp.int32)
    block_id = jnp.zeros((nb * A,), jnp.int32)
    block_id = block_id.at[jnp.cumsum(blk_len)[:-1]].set(1)
    block_id = jnp.cumsum(block_id)

    x_blocks = pos.reshape(nb, A, 3).astype(jnp.float32)
    m_blocks = atom_valid.reshape(nb, A)

    # fused Pallas kernel: masked intra/inter min squared block distances
    intra_dm, inter_dm = block_pair_knn_dists(x_blocks, m_blocks,
                                              batch_id, segment_ids)

    intra_edges = _knn_edges_from_masked(intra_dm, k_neighbors)
    inter_edges = _knn_edges_from_masked(inter_dm, k_neighbors)
    edges = jnp.concatenate([intra_edges, inter_edges], axis=1)

    edge_type = jnp.concatenate(
        [jnp.zeros((intra_edges.shape[1],), jnp.int32),
         jnp.ones((inter_edges.shape[1],), jnp.int32)])
    edge_attr = edge_embedding_lookup(edge_type, params["edge_embedding"])

    return block_id, batch_id, edges, edge_attr


# --------------------------------------------------------------------------
# Demo / correctness check
# --------------------------------------------------------------------------
if __name__ == "__main__":
    B, L, A = 2, 8, 5
    EDGE_SIZE, K = 16, 3

    key = jax.random.PRNGKey(0)
    k1, k2, k3 = jax.random.split(key, 3)

    pos_heavyatom = jax.random.normal(k1, (B, L, A, 3), jnp.float32) * 2.0
    pos_heavyatom = pos_heavyatom + jnp.arange(L, dtype=jnp.float32)[None, :, None, None]
    aa = jax.random.randint(k2, (B, L), 0, 20)
    atom_types = jax.random.randint(k3, (B, L, A), 0, 5)
    mask_atoms = jnp.ones((B, L, A), dtype=bool)
    # mask a few non-CA atoms (CA column stays valid so mask_residue holds)
    mask_atoms = mask_atoms.at[0, 2, 3].set(False).at[1, 5, 4].set(False)
    block_lengths = jnp.ones((B, L), jnp.int32)
    lengths = jnp.array([L, L], jnp.int32)
    fragment_type = jnp.concatenate(
        [jnp.zeros((B, L // 2), jnp.int32), jnp.full((B, L // 2), 2, jnp.int32)],
        axis=1)

    params = {"edge_embedding":
              jax.random.normal(jax.random.PRNGKey(42), (2, EDGE_SIZE), jnp.float32)}

    fwd = functools.partial(edge_embedding_forward,
                            max_num_atoms=A, k_neighbors=K)
    block_id, batch_id, edges, edge_attr = fwd(
        params, pos_heavyatom, aa, atom_types, mask_atoms,
        block_lengths, lengths, fragment_type)
    jax.block_until_ready((block_id, batch_id, edges, edge_attr))

    # --------- reference for the fused kernel (pure JAX, f32) ---------
    nbk = B * L
    xb = pos_heavyatom.reshape(nbk, A, 3).astype(jnp.float32)
    mb = (mask_atoms[:, :, BB_CA][:, :, None] & mask_atoms).reshape(nbk, A)
    diff = xb[:, :, None, None, :] - xb[None, None, :, :, :]
    d2 = jnp.sum(diff * diff, axis=-1)
    valid = mb[:, :, None, None] & mb[None, None, :, :]
    d2ref = jnp.min(jnp.where(valid, d2, jnp.inf), axis=(1, 3))
    d2ref = jnp.where(jnp.isfinite(d2ref), d2ref, BIGINT)

    segment_ids_ref = jnp.where(fragment_type.reshape(-1) == 2, 1,
                                fragment_type.reshape(-1)).astype(jnp.int32)
    batch_id_ref = jnp.zeros((nbk,), jnp.int32)
    batch_id_ref = batch_id_ref.at[jnp.cumsum(lengths)[:-1]].set(1)
    batch_id_ref = jnp.cumsum(batch_id_ref)
    same_batch = batch_id_ref[:, None] == batch_id_ref[None, :]
    not_self = ~jnp.eye(nbk, dtype=bool)
    same_seg = segment_ids_ref[:, None] == segment_ids_ref[None, :]
    ref_intra = jnp.where(same_batch & not_self & same_seg, d2ref, BIGINT)
    ref_inter = jnp.where(same_batch & not_self & ~same_seg, d2ref, BIGINT)

    k_intra, k_inter = block_pair_knn_dists(xb, mb, batch_id_ref, segment_ids_ref)

    # tolerances sized for the worst-case interpretation of DEFAULT matmul
    # precision (single bf16 pass); catches any structural / masking bug.
    assert jnp.allclose(k_intra, ref_intra, rtol=5e-2, atol=3.0), "intra dist mismatch"
    assert jnp.allclose(k_inter, ref_inter, rtol=5e-2, atol=3.0), "inter dist mismatch"

    # tie-robust top-k check: neighbors selected from the kernel matrix must
    # have (reference) distances matching the reference selection.
    def _sel_ref_dists(sel_from, ref_mat):
        _, idx = lax.top_k(-sel_from, K)
        return jnp.sort(jnp.take_along_axis(ref_mat, idx, axis=1), axis=1)

    assert jnp.allclose(_sel_ref_dists(k_intra, ref_intra),
                        _sel_ref_dists(ref_intra, ref_intra),
                        rtol=5e-2, atol=3.0), "intra knn set mismatch"
    assert jnp.allclose(_sel_ref_dists(k_inter, ref_inter),
                        _sel_ref_dists(ref_inter, ref_inter),
                        rtol=5e-2, atol=3.0), "inter knn set mismatch"

    # embedding lookup reference
    e_intra = edges.shape[1] // 2
    et = jnp.concatenate([jnp.zeros((e_intra,), jnp.int32),
                          jnp.ones((e_intra,), jnp.int32)])
    attr_ref = params["edge_embedding"][et]
    assert jnp.allclose(edge_attr, attr_ref, atol=1e-6), "embedding lookup mismatch"

    assert block_id.shape == (B * L * A,)
    assert batch_id.shape == (B * L,)
    assert edges.shape == (2, 2 * B * L * K)
    assert edge_attr.shape == (2 * B * L * K, EDGE_SIZE)

    print("KERNEL_OK")
</pallas_src>

<mosaic_0001>
module attributes {stable_mosaic.version = 11 : i64} {
  func.func @_fused_block_dist_kernel(%arg0: i32, %arg1: i32, %arg2: memref<5x8x128xf32, #tpu.memory_space<vmem>>, %arg3: memref<8x640xf32, #tpu.memory_space<vmem>>, %arg4: memref<128x2xi32, #tpu.memory_space<vmem>>, %arg5: memref<2x128xi32, #tpu.memory_space<vmem>>, %arg6: memref<128x128xf32, #tpu.memory_space<vmem>>, %arg7: memref<128x128xf32, #tpu.memory_space<vmem>>) attributes {dimension_semantics = [#tpu.dimension_semantics<parallel>, #tpu.dimension_semantics<parallel>], iteration_bounds = array<i64: 1, 1>, scalar_prefetch = 0 : i64, scratch_operands = 0 : i64, tpu.core_type = #tpu.core_type<tc>, window_params = [{transform_indices = @transform_0, window_bounds = array<i64: 5, 8, 128>}, {transform_indices = @transform_1, window_bounds = array<i64: 8, 640>}, {transform_indices = @transform_2, window_bounds = array<i64: 128, 2>}, {transform_indices = @transform_3, window_bounds = array<i64: 2, 128>}, {transform_indices = @transform_4, window_bounds = array<i64: 128, 128>}, {transform_indices = @transform_5, window_bounds = array<i64: 128, 128>}]} {
    %c0 = arith.constant 0 : index
    %c0_0 = arith.constant 0 : index
    %0 = vector.load %arg3[%c0, %c0_0] : memref<8x640xf32, #tpu.memory_space<vmem>>, vector<8x640xf32>
    %c0_1 = arith.constant 0 : index
    %c0_2 = arith.constant 0 : index
    %c0_3 = arith.constant 0 : index
    %1 = vector.load %arg2[%c0_1, %c0_2, %c0_3] : memref<5x8x128xf32, #tpu.memory_space<vmem>>, vector<1x8x128xf32>
    %2 = vector.shape_cast %1 : vector<1x8x128xf32> to vector<8x128xf32>
    %cst = arith.constant dense<0.000000e+00> : vector<128x640xf32>
    %3 = tpu.matmul %2, %0, %cst {dimension_numbers = #tpu.dot_dimension_numbers<[0], [0], [1], [1], [0, 1, 1, 1], [], []>} : vector<8x128xf32>, vector<8x640xf32>, vector<128x640xf32> -> vector<128x640xf32>
    %4 = vector.extract_strided_slice %3 {offsets = [0, 0], sizes = [128, 128], strides = [1, 1]} : vector<128x640xf32> to vector<128x128xf32>
    %5 = vector.extract_strided_slice %3 {offsets = [0, 128], sizes = [128, 128], strides = [1, 1]} : vector<128x640xf32> to vector<128x128xf32>
    %6 = arith.minimumf %4, %5 : vector<128x128xf32>
    %7 = vector.extract_strided_slice %3 {offsets = [0, 256], sizes = [128, 128], strides = [1, 1]} : vector<128x640xf32> to vector<128x128xf32>
    %8 = arith.minimumf %6, %7 : vector<128x128xf32>
    %9 = vector.extract_strided_slice %3 {offsets = [0, 384], sizes = [128, 128], strides = [1, 1]} : vector<128x640xf32> to vector<128x128xf32>
    %10 = arith.minimumf %8, %9 : vector<128x128xf32>
    %11 = vector.extract_strided_slice %3 {offsets = [0, 512], sizes = [128, 128], strides = [1, 1]} : vector<128x640xf32> to vector<128x128xf32>
    %12 = arith.minimumf %10, %11 : vector<128x128xf32>
    %c1 = arith.constant 1 : index
    %c0_4 = arith.constant 0 : index
    %c0_5 = arith.constant 0 : index
    %13 = vector.load %arg2[%c1, %c0_4, %c0_5] : memref<5x8x128xf32, #tpu.memory_space<vmem>>, vector<1x8x128xf32>
    %14 = vector.shape_cast %13 : vector<1x8x128xf32> to vector<8x128xf32>
    %cst_6 = arith.constant dense<0.000000e+00> : vector<128x640xf32>
    %15 = tpu.matmul %14, %0, %cst_6 {dimension_numbers = #tpu.dot_dimension_numbers<[0], [0], [1], [1], [0, 1, 1, 1], [], []>} : vector<8x128xf32>, vector<8x640xf32>, vector<128x640xf32> -> vector<128x640xf32>
    %16 = vector.extract_strided_slice %15 {offsets = [0, 0], sizes = [128, 128], strides = [1, 1]} : vector<128x640xf32> to vector<128x128xf32>
    %17 = arith.minimumf %12, %16 : vector<128x128xf32>
    %18 = vector.extract_strided_slice %15 {offsets = [0, 128], sizes = [128, 128], strides = [1, 1]} : vector<128x640xf32> to vector<128x128xf32>
    %19 = arith.minimumf %17, %18 : vector<128x128xf32>
    %20 = vector.extract_strided_slice %15 {offsets = [0, 256], sizes = [128, 128], strides = [1, 1]} : vector<128x640xf32> to vector<128x128xf32>
    %21 = arith.minimumf %19, %20 : vector<128x128xf32>
    %22 = vector.extract_strided_slice %15 {offsets = [0, 384], sizes = [128, 128], strides = [1, 1]} : vector<128x640xf32> to vector<128x128xf32>
    %23 = arith.minimumf %21, %22 : vector<128x128xf32>
    %24 = vector.extract_strided_slice %15 {offsets = [0, 512], sizes = [128, 128], strides = [1, 1]} : vector<128x640xf32> to vector<128x128xf32>
    %25 = arith.minimumf %23, %24 : vector<128x128xf32>
    %c2 = arith.constant 2 : index
    %c0_7 = arith.constant 0 : index
    %c0_8 = arith.constant 0 : index
    %26 = vector.load %arg2[%c2, %c0_7, %c0_8] : memref<5x8x128xf32, #tpu.memory_space<vmem>>, vector<1x8x128xf32>
    %27 = vector.shape_cast %26 : vector<1x8x128xf32> to vector<8x128xf32>
    %cst_9 = arith.constant dense<0.000000e+00> : vector<128x640xf32>
    %28 = tpu.matmul %27, %0, %cst_9 {dimension_numbers = #tpu.dot_dimension_numbers<[0], [0], [1], [1], [0, 1, 1, 1], [], []>} : vector<8x128xf32>, vector<8x640xf32>, vector<128x640xf32> -> vector<128x640xf32>
    %29 = vector.extract_strided_slice %28 {offsets = [0, 0], sizes = [128, 128], strides = [1, 1]} : vector<128x640xf32> to vector<128x128xf32>
    %30 = arith.minimumf %25, %29 : vector<128x128xf32>
    %31 = vector.extract_strided_slice %28 {offsets = [0, 128], sizes = [128, 128], strides = [1, 1]} : vector<128x640xf32> to vector<128x128xf32>
    %32 = arith.minimumf %30, %31 : vector<128x128xf32>
    %33 = vector.extract_strided_slice %28 {offsets = [0, 256], sizes = [128, 128], strides = [1, 1]} : vector<128x640xf32> to vector<128x128xf32>
    %34 = arith.minimumf %32, %33 : vector<128x128xf32>
    %35 = vector.extract_strided_slice %28 {offsets = [0, 384], sizes = [128, 128], strides = [1, 1]} : vector<128x640xf32> to vector<128x128xf32>
    %36 = arith.minimumf %34, %35 : vector<128x128xf32>
    %37 = vector.extract_strided_slice %28 {offsets = [0, 512], sizes = [128, 128], strides = [1, 1]} : vector<128x640xf32> to vector<128x128xf32>
    %38 = arith.minimumf %36, %37 : vector<128x128xf32>
    %c3 = arith.constant 3 : index
    %c0_10 = arith.constant 0 : index
    %c0_11 = arith.constant 0 : index
    %39 = vector.load %arg2[%c3, %c0_10, %c0_11] : memref<5x8x128xf32, #tpu.memory_space<vmem>>, vector<1x8x128xf32>
    %40 = vector.shape_cast %39 : vector<1x8x128xf32> to vector<8x128xf32>
    %cst_12 = arith.constant dense<0.000000e+00> : vector<128x640xf32>
    %41 = tpu.matmul %40, %0, %cst_12 {dimension_numbers = #tpu.dot_dimension_numbers<[0], [0], [1], [1], [0, 1, 1, 1], [], []>} : vector<8x128xf32>, vector<8x640xf32>, vector<128x640xf32> -> vector<128x640xf32>
    %42 = vector.extract_strided_slice %41 {offsets = [0, 0], sizes = [128, 128], strides = [1, 1]} : vector<128x640xf32> to vector<128x128xf32>
    %43 = arith.minimumf %38, %42 : vector<128x128xf32>
    %44 = vector.extract_strided_slice %41 {offsets = [0, 128], sizes = [128, 128], strides = [1, 1]} : vector<128x640xf32> to vector<128x128xf32>
    %45 = arith.minimumf %43, %44 : vector<128x128xf32>
    %46 = vector.extract_strided_slice %41 {offsets = [0, 256], sizes = [128, 128], strides = [1, 1]} : vector<128x640xf32> to vector<128x128xf32>
    %47 = arith.minimumf %45, %46 : vector<128x128xf32>
    %48 = vector.extract_strided_slice %41 {offsets = [0, 384], sizes = [128, 128], strides = [1, 1]} : vector<128x640xf32> to vector<128x128xf32>
    %49 = arith.minimumf %47, %48 : vector<128x128xf32>
    %50 = vector.extract_strided_slice %41 {offsets = [0, 512], sizes = [128, 128], strides = [1, 1]} : vector<128x640xf32> to vector<128x128xf32>
    %51 = arith.minimumf %49, %50 : vector<128x128xf32>
    %c4 = arith.constant 4 : index
    %c0_13 = arith.constant 0 : index
    %c0_14 = arith.constant 0 : index
    %52 = vector.load %arg2[%c4, %c0_13, %c0_14] : memref<5x8x128xf32, #tpu.memory_space<vmem>>, vector<1x8x128xf32>
    %53 = vector.shape_cast %52 : vector<1x8x128xf32> to vector<8x128xf32>
    %cst_15 = arith.constant dense<0.000000e+00> : vector<128x640xf32>
    %54 = tpu.matmul %53, %0, %cst_15 {dimension_numbers = #tpu.dot_dimension_numbers<[0], [0], [1], [1], [0, 1, 1, 1], [], []>} : vector<8x128xf32>, vector<8x640xf32>, vector<128x640xf32> -> vector<128x640xf32>
    %55 = vector.extract_strided_slice %54 {offsets = [0, 0], sizes = [128, 128], strides = [1, 1]} : vector<128x640xf32> to vector<128x128xf32>
    %56 = arith.minimumf %51, %55 : vector<128x128xf32>
    %57 = vector.extract_strided_slice %54 {offsets = [0, 128], sizes = [128, 128], strides = [1, 1]} : vector<128x640xf32> to vector<128x128xf32>
    %58 = arith.minimumf %56, %57 : vector<128x128xf32>
    %59 = vector.extract_strided_slice %54 {offsets = [0, 256], sizes = [128, 128], strides = [1, 1]} : vector<128x640xf32> to vector<128x128xf32>
    %60 = arith.minimumf %58, %59 : vector<128x128xf32>
    %61 = vector.extract_strided_slice %54 {offsets = [0, 384], sizes = [128, 128], strides = [1, 1]} : vector<128x640xf32> to vector<128x128xf32>
    %62 = arith.minimumf %60, %61 : vector<128x128xf32>
    %63 = vector.extract_strided_slice %54 {offsets = [0, 512], sizes = [128, 128], strides = [1, 1]} : vector<128x640xf32> to vector<128x128xf32>
    %64 = arith.minimumf %62, %63 : vector<128x128xf32>
    %cst_16 = arith.constant 0.000000e+00 : f32
    %65 = vector.broadcast %cst_16 : f32 to vector<128x128xf32>
    %66 = arith.maximumf %64, %65 : vector<128x128xf32>
    %cst_17 = arith.constant 1.000000e+10 : f32
    %67 = vector.broadcast %cst_17 : f32 to vector<128x128xf32>
    %68 = arith.minimumf %66, %67 : vector<128x128xf32>
    %c0_18 = arith.constant 0 : index
    %c0_19 = arith.constant 0 : index
    %69 = vector.load %arg4[%c0_18, %c0_19] : memref<128x2xi32, #tpu.memory_space<vmem>>, vector<128x2xi32>
    %c0_20 = arith.constant 0 : index
    %c0_21 = arith.constant 0 : index
    %70 = vector.load %arg5[%c0_20, %c0_21] : memref<2x128xi32, #tpu.memory_space<vmem>>, vector<2x128xi32>
    %71 = vector.extract_strided_slice %69 {offsets = [0, 0], sizes = [128, 1], strides = [1, 1]} : vector<128x2xi32> to vector<128x1xi32>
    %72 = vector.extract_strided_slice %70 {offsets = [0, 0], sizes = [1, 128], strides = [1, 1]} : vector<2x128xi32> to vector<1x128xi32>
    %73 = vector.broadcast %71 : vector<128x1xi32> to vector<128x128xi32>
    %74 = vector.broadcast %72 : vector<1x128xi32> to vector<128x128xi32>
    %75 = arith.cmpi eq, %73, %74 : vector<128x128xi32>
    %76 = vector.extract_strided_slice %69 {offsets = [0, 1], sizes = [128, 1], strides = [1, 1]} : vector<128x2xi32> to vector<128x1xi32>
    %77 = vector.extract_strided_slice %70 {offsets = [1, 0], sizes = [1, 128], strides = [1, 1]} : vector<2x128xi32> to vector<1x128xi32>
    %78 = vector.broadcast %76 : vector<128x1xi32> to vector<128x128xi32>
    %79 = vector.broadcast %77 : vector<1x128xi32> to vector<128x128xi32>
    %80 = arith.cmpi eq, %78, %79 : vector<128x128xi32>
    %81 = tpu.iota {dimensions = array<i32: 0>} : vector<128x128xi32>
    %c128_i32 = arith.constant 128 : i32
    %82 = arith.muli %arg0, %c128_i32 : i32
    %83 = vector.broadcast %82 : i32 to vector<128x128xi32>
    %84 = arith.addi %81, %83 : vector<128x128xi32>
    %85 = tpu.iota {dimensions = array<i32: 1>} : vector<128x128xi32>
    %c128_i32_22 = arith.constant 128 : i32
    %86 = arith.muli %arg1, %c128_i32_22 : i32
    %87 = vector.broadcast %86 : i32 to vector<128x128xi32>
    %88 = arith.addi %85, %87 : vector<128x128xi32>
    %89 = arith.cmpi ne, %84, %88 : vector<128x128xi32>
    %90 = arith.andi %75, %89 : vector<128x128xi1>
    %91 = arith.andi %90, %80 : vector<128x128xi1>
    %cst_23 = arith.constant 1.000000e+10 : f32
    %92 = vector.broadcast %cst_23 : f32 to vector<128x128xf32>
    %93 = arith.select %91, %68, %92 : vector<128x128xi1>, vector<128x128xf32>
    %c0_24 = arith.constant 0 : index
    %c0_25 = arith.constant 0 : index
    %94 = vector.load %arg6[%c0_24, %c0_25] : memref<128x128xf32, #tpu.memory_space<vmem>>, vector<128x128xf32>
    tpu.vector_store %arg6[%c0_24, %c0_25], %93 {strides = array<i32>} : memref<128x128xf32, #tpu.memory_space<vmem>>, vector<128x128xf32>,
    %cst_26 = arith.constant dense<true> : vector<128x128xi1>
    %95 = arith.xori %80, %cst_26 : vector<128x128xi1>
    %96 = arith.andi %90, %95 : vector<128x128xi1>
    %cst_27 = arith.constant 1.000000e+10 : f32
    %97 = vector.broadcast %cst_27 : f32 to vector<128x128xf32>
    %98 = arith.select %96, %68, %97 : vector<128x128xi1>, vector<128x128xf32>
    %c0_28 = arith.constant 0 : index
    %c0_29 = arith.constant 0 : index
    %99 = vector.load %arg7[%c0_28, %c0_29] : memref<128x128xf32, #tpu.memory_space<vmem>>, vector<128x128xf32>
    tpu.vector_store %arg7[%c0_28, %c0_29], %98 {strides = array<i32>} : memref<128x128xf32, #tpu.memory_space<vmem>>, vector<128x128xf32>,
    return
  }
  func.func @transform_0(%arg0: i32, %arg1: i32) -> (i32, i32, i32) {
    %c0_i32 = arith.constant 0 : i32
    %c0_i32_0 = arith.constant 0 : i32
    %c0_i32_1 = arith.constant 0 : i32
    return %c0_i32, %c0_i32_0, %arg0 : i32, i32, i32
  }
  func.func @transform_1(%arg0: i32, %arg1: i32) -> (i32, i32) {
    %c0_i32 = arith.constant 0 : i32
    %c0_i32_0 = arith.constant 0 : i32
    return %c0_i32, %arg1 : i32, i32
  }
  func.func @transform_2(%arg0: i32, %arg1: i32) -> (i32, i32) {
    %c0_i32 = arith.constant 0 : i32
    %c0_i32_0 = arith.constant 0 : i32
    return %arg0, %c0_i32 : i32, i32
  }
  func.func @transform_3(%arg0: i32, %arg1: i32) -> (i32, i32) {
    %c0_i32 = arith.constant 0 : i32
    %c0_i32_0 = arith.constant 0 : i32
    return %c0_i32, %arg1 : i32, i32
  }
  func.func @transform_4(%arg0: i32, %arg1: i32) -> (i32, i32) {
    %c0_i32 = arith.constant 0 : i32
    return %arg0, %arg1 : i32, i32
  }
  func.func @transform_5(%arg0: i32, %arg1: i32) -> (i32, i32) {
    %c0_i32 = arith.constant 0 : i32
    return %arg0, %arg1 : i32, i32
  }
}

</mosaic_0001>

<bundles_post_ra>
// kernel: tpu_custom_call.1
= control target key start
LH: loop header
LB: loop body
LE: loop exit
PB: predicated region body
PF: predicated region fallthrough
CT: control target
= control target key end

     0   :  { %11 = vsyncpa [#allocation3], 0  ;;  %s6727_s0 = inlined_call_operand.vmem [shape: f32[5,8,128], index: 0, kind: input, shape index: {}]   ;;  %s6728_s1 = inlined_call_operand.vmem [shape: f32[8,640], index: 1, kind: input, shape index: {}]   ;;  %s6729_s2 = inlined_call_operand.vmem [shape: s32[128,2], index: 2, kind: input, shape index: {}]   ;;  %s6730_s3 = inlined_call_operand.vmem [shape: s32[2,128], index: 3, kind: input, shape index: {}]   ;;  %s6731_s4 = inlined_call_operand.hbm [shape: f32[128,128], index: 4, kind: output, shape index: {0}]   ;;  %s6732_s5 = inlined_call_operand.hbm [shape: f32[128,128], index: 5, kind: output, shape index: {1}]  }
   0x1   :  { %v26_v0 = vld [vmem:[%s6727_s0] sm:$0xff]  ;;  %v4123_v1 = vld [vmem:[%s6728_s1 + $0x8] sm:$0xff] }
   0x2   :  { %27 = vxpose.xlu0.b32.start.end [1/1] (short) %v26_v0, 128  ;;  %108 = vmatprep.subr.mxu0 %v4123_v1  ;;  %v4129_v2 = vld [vmem:[%s6728_s1] sm:$0xff] }
   0x3   :  { %12 = vsyncpa [#allocation5], 0  ;;  %v6734_v3 = vmov 0.0   ;;  %109 = vmatpush1.msra.mxu0 %v4129_v2  ;;  %4015 = vmatprep.subr.mxu1 %v4123_v1  ;;  %v3653_v4 = vld [vmem:[%s6727_s0 + $0x10] sm:$0xff]  ;;  %v4142_v5 = vld [vmem:[%s6728_s1 + $0x20] sm:$0xff]  ;;  %vm59_vm0 = vcmask 64512  }
   0x4   :  { %172 = vmatprep.mubr.f32.mxu0 %v6734_v3  ;;  %244 = vmatprep.mubr.f32.mxu1 %v6734_v3  ;;  %v4148_v6 = vld [vmem:[%s6728_s1 + $0x18] sm:$0xff]  ;;  %v3604_v7 = vld [vmem:[%s6727_s0 + $0x8] sm:$0xff]  ;;  %v3751_v21 = vld [vmem:[%s6727_s0 + $0x20] sm:$0xff]  ;;  %vm4082_vm9 = vmmov 1   ;;  %s4084_s23 = smov [#allocation4]  }
   0x5   :  { %4016 = vmatpush1.msra.mxu1 %v4129_v2  ;;  %1270 = vxpose.xlu1.b32.start.end [1/1] (short) %v3653_v4, 128  ;;  %v3702_v8 = vld [vmem:[%s6727_s0 + $0x18] sm:$0xff]  ;;  %v4226_v22 = vld [vmem:[%s6728_s1 + $0x10] sm:$0xff]  ;;  %v4594_v0 = vld [vmem:[%s6729_s2] sm:$0xff]  ;;  %s3541_s24 = sshll.u32 %s4084_s23, 4  ;;  %s6696_s24 = int_to_ptr.vmem [resolvable:$true] %s3541_s24 }
   0x6   :  { %3885 = vmatprep.subr.mxu0 %v4142_v5  ;;  %269 = vmatprep.subr.mxu1 %v4148_v6 }
  0x3f   :  { %641 = vxpose.xlu0.b32.start.end [1/1] (short) %v3604_v7, 128 }
  0x42   :  { %1899 = vxpose.xlu1.b32.start.end [1/1] (short) %v3702_v8, 128 }
  0x7c   :  { %2528 = vxpose.xlu0.b32.start.end [1/1] (short) %v3751_v21, 128 }
  0x82   :  { %v4157_v9 = vpop.trf.xlu0 }
  0x83   :  { %3556 = vmatmul.mubr.msk.f32.vlgmr.msra.gmra.mrb[0].mxu0 %vm59_vm0, %v4157_v9 }
  0x84   :  { %178 = vmatprep.mubr.f32.mxu0 %v6734_v3  ;;  %3886 = vmatpush3.msra.mxu0 %v4142_v5 }
  0x85   :  { %882 = vmatprep.subr.mxu0 %v4148_v6  ;;  %v4355_v37 = vpop.trf.xlu1 }
  0x86   :  { %v4164_v10 = vpop.trf.xlu0 }
  0x87   :  { %3557 = vmatmul.mubr.msk.f32.gmra.mrb[2].mxu0 %vm59_vm0, %v4164_v10 }
  0x88   :  { %184 = vmatprep.mubr.f32.mxu0 %v6734_v3 }
  0x89   :  { %v4371_v39 = vpop.trf.xlu1 }
  0x8a   :  { %v4169_v11 = vpop.trf.xlu0 }
  0x8b   :  { %3558 = vmatmul.mubr.msk.f32.gmra.mrb[4].mxu0 %vm59_vm0, %v4169_v11 }
  0x8c   :  { %190 = vmatprep.mubr.f32.mxu0 %v6734_v3 }
  0x8d   :  { %v4381_v41 = vpop.trf.xlu1 }
  0x8e   :  { %v4174_v12 = vpop.trf.xlu0 }
  0x8f   :  { %3559 = vmatmul.mubr.msk.f32.gmra.mrb[6].mxu0 %vm59_vm0, %v4174_v12 }
  0x90   :  { %196 = vmatprep.mubr.f32.mxu0 %v6734_v3 }
  0x91   :  { %v4397_v43 = vpop.trf.xlu1 }
  0x92   :  { %v4179_v13 = vpop.trf.xlu0 }
  0x93   :  { %3560 = vmatmul.mubr.msk.f32.gmra.mrb[8].mxu0 %vm59_vm0, %v4179_v13 }
  0x94   :  { %202 = vmatprep.mubr.f32.mxu0 %v6734_v3 }
  0x95   :  { %v4407_v45 = vpop.trf.xlu1 }
  0x96   :  { %v4184_v14 = vpop.trf.xlu0 }
  0x97   :  { %3561 = vmatmul.mubr.msk.f32.gmra.mrb[10].mxu0 %vm59_vm0, %v4184_v14 }
  0x98   :  { %208 = vmatprep.mubr.f32.mxu0 %v6734_v3 }
  0x99   :  { %v4425_v47 = vpop.trf.xlu1 }
  0x9a   :  { %v4189_v15 = vpop.trf.xlu0 }
  0x9b   :  { %3562 = vmatmul.mubr.msk.f32.gmra.mrb[12].mxu0 %vm59_vm0, %v4189_v15 }
  0x9c   :  { %214 = vmatprep.mubr.f32.mxu0 %v6734_v3 }
  0x9d   :  { %v4435_v49 = vpop.trf.xlu1 }
  0x9e   :  { %v4194_v16 = vpop.trf.xlu0 }
  0x9f   :  { %3563 = vmatmul.mubr.msk.f32.gmra.mrb[14].mxu0 %vm59_vm0, %v4194_v16 }
  0xa0   :  { %220 = vmatprep.mubr.f32.mxu0 %v6734_v3 }
  0xa1   :  { %v4449_v50 = vpop.trf.xlu1 }
  0xa2   :  { %v4199_v17 = vpop.trf.xlu0 }
  0xa3   :  { %3564 = vmatmul.mubr.msk.f32.gmra.mrb[16].mxu0 %vm59_vm0, %v4199_v17 }
  0xa4   :  { %226 = vmatprep.mubr.f32.mxu0 %v6734_v3 }
  0xa5   :  { %v4459_v51 = vpop.trf.xlu1 }
  0xa6   :  { %v4204_v18 = vpop.trf.xlu0 }
  0xa7   :  { %3565 = vmatmul.mubr.msk.f32.gmra.mrb[18].mxu0 %vm59_vm0, %v4204_v18 }
  0xa8   :  { %232 = vmatprep.mubr.f32.mxu0 %v6734_v3 }
  0xa9   :  { %v4473_v52 = vpop.trf.xlu1 }
  0xaa   :  { %v4209_v19 = vpop.trf.xlu0 }
  0xab   :  { %3566 = vmatmul.mubr.msk.f32.gmra.mrb[20].mxu0 %vm59_vm0, %v4209_v19 }
  0xac   :  { %238 = vmatprep.mubr.f32.mxu0 %v6734_v3 }
  0xad   :  { %v4481_v53 = vpop.trf.xlu1 }
  0xae   :  { %v4214_v20 = vpop.trf.xlu0 }
  0xaf   :  { %3567 = vmatmul.mubr.msk.f32.gmra.mrb[22].mxu0 %vm59_vm0, %v4214_v20 }
  0xb0   :  { %3887 = vmatprep.mubr.msk.f32.mxu0 %vm59_vm0, %v4157_v9 }
  0xb1   :  { %v4495_v54 = vpop.trf.xlu1 }
  0xb2   :  { %v4228_v23 = vpop.trf.xlu0 }
  0xb3   :  { %3568 = vmatmul.mubr.msk.f32.vlgmr.msra.gmra.mrb[0].mxu1 %vm59_vm0, %v4228_v23  ;;  %3888 = vmatmul.mubr.msk.f32.vlgmr.msra.gmra.mrb[24].mxu0 %vm59_vm0, %v4164_v10 }
  0xb4   :  { %270 = vmatpush1.msra.mxu1 %v4226_v22  ;;  %3890 = vmatprep.mubr.msk.f32.mxu0 %vm59_vm0, %v4169_v11 }
  0xb5   :  { %250 = vmatprep.mubr.f32.mxu1 %v6734_v3  ;;  %721 = vmatprep.subr.mxu1 %v4123_v1  ;;  %v4503_v55 = vpop.trf.xlu1 }
  0xb6   :  { %v4239_v24 = vpop.trf.xlu0  ;;  %883 = vmatpush1.msra.mxu0 %v4226_v22 }
  0xb7   :  { %3569 = vmatmul.mubr.msk.f32.gmra.mrb[2].mxu1 %vm59_vm0, %v4239_v24  ;;  %3891 = vmatmul.mubr.msk.f32.gmra.mrb[26].mxu0 %vm59_vm0, %v4174_v12 }
  0xb8   :  { %3893 = vmatprep.mubr.msk.f32.mxu0 %vm59_vm0, %v4179_v13  ;;  %256 = vmatprep.mubr.f32.mxu1 %v6734_v3 }
  0xb9   :  { %1350 = vmatprep.subr.mxu0 %v4123_v1  ;;  %v4517_v56 = vpop.trf.xlu1 }
  0xba   :  { %v4250_v25 = vpop.trf.xlu0 }
  0xbb   :  { %3570 = vmatmul.mubr.msk.f32.gmra.mrb[4].mxu1 %vm59_vm0, %v4250_v25  ;;  %3894 = vmatmul.mubr.msk.f32.gmra.mrb[28].mxu0 %vm59_vm0, %v4184_v14 }
  0xbc   :  { %3896 = vmatprep.mubr.msk.f32.mxu0 %vm59_vm0, %v4189_v15  ;;  %262 = vmatprep.mubr.f32.mxu1 %v6734_v3 }
  0xbd   :  { %v4525_v57 = vpop.trf.xlu1 }
  0xbe   :  { %v4259_v26 = vpop.trf.xlu0 }
  0xbf   :  { %3571 = vmatmul.mubr.msk.f32.gmra.mrb[6].mxu1 %vm59_vm0, %v4259_v26  ;;  %3897 = vmatmul.mubr.msk.f32.gmra.mrb[30].mxu0 %vm59_vm0, %v4194_v16 }
  0xc0   :  { %3899 = vmatprep.mubr.msk.f32.mxu0 %vm59_vm0, %v4199_v17  ;;  %333 = vmatprep.mubr.f32.mxu1 %v6734_v3 }
  0xc1   :  { %v4541_v58 = vpop.trf.xlu1 }
  0xc2   :  { %v4268_v27 = vpop.trf.xlu0 }
  0xc3   :  { %3572 = vmatmul.mubr.msk.f32.vlgmr.msra.gmra.mrb[8].mxu1 %vm59_vm0, %v4157_v9  ;;  %3900 = vmatmul.mubr.msk.f32.gmra.mrb[32].mxu0 %vm59_vm0, %v4204_v18 }
  0xc4   :  { %722 = vmatpush1.msra.mxu1 %v4129_v2  ;;  %3902 = vmatprep.mubr.msk.f32.mxu0 %vm59_vm0, %v4209_v19 }
  0xc5   :  { %339 = vmatprep.mubr.f32.mxu1 %v6734_v3  ;;  %3911 = vmatprep.subr.mxu1 %v4142_v5  ;;  %v4552_v59 = vpop.trf.xlu1 }
  0xc6   :  { %v4279_v28 = vpop.trf.xlu0 }
  0xc7   :  { %3573 = vmatmul.mubr.msk.f32.gmra.mrb[10].mxu1 %vm59_vm0, %v4164_v10  ;;  %3903 = vmatmul.mubr.msk.f32.gmra.mrb[34].mxu0 %vm59_vm0, %v4214_v20  ;;  %v4616_v10 = vld [vmem:[%s6729_s2 + $0x10] sm:$0xff] }
  0xc8   :  { %3905 = vmatprep.mubr.msk.f32.mxu0 %vm59_vm0, %v4228_v23  ;;  %345 = vmatprep.mubr.f32.mxu1 %v6734_v3 }
  0xc9   :  { %v4561_v60 = vpop.trf.xlu1 }
  0xca   :  { %v4288_v29 = vpop.trf.xlu0 }
  0xcb   :  { %3574 = vmatmul.mubr.msk.f32.gmra.mrb[12].mxu1 %vm59_vm0, %v4169_v11  ;;  %3906 = vmatmul.mubr.msk.f32.gmra.mrb[36].mxu0 %vm59_vm0, %v4239_v24 }
  0xcc   :  { %3908 = vmatprep.mubr.msk.f32.mxu0 %vm59_vm0, %v4250_v25  ;;  %351 = vmatprep.mubr.f32.mxu1 %v6734_v3 }
  0xcd   :  { %v4579_v61 = vpop.trf.xlu1 }
  0xce   :  { %v4297_v30 = vpop.trf.xlu0 }
  0xcf   :  { %3575 = vmatmul.mubr.msk.f32.gmra.mrb[14].mxu1 %vm59_vm0, %v4174_v12  ;;  %3909 = vmatmul.mubr.msk.f32.gmra.mrb[38].mxu0 %vm59_vm0, %v4259_v26 }
  0xd0   :  { %357 = vmatprep.mubr.f32.mxu1 %v6734_v3  ;;  %946 = vmatprep.mubr.f32.mxu0 %v6734_v3 }
  0xd1   :  { %v4604_v8 = vpop.trf.xlu1 }
  0xd2   :  { %v4305_v31 = vpop.trf.xlu0 }
  0xd3   :  { %3576 = vmatmul.mubr.msk.f32.gmra.mrb[16].mxu1 %vm59_vm0, %v4179_v13  ;;  %3621 = vmatmul.mubr.msk.f32.vlgmr.msra.gmra.mrb[40].mxu0 %vm59_vm0, %v4268_v27 }
  0xd4   :  { %363 = vmatprep.mubr.f32.mxu1 %v6734_v3  ;;  %952 = vmatprep.mubr.f32.mxu0 %v6734_v3 }
  0xd5   :  { %1351 = vmatpush1.msra.mxu0 %v4129_v2 }
  0xd6   :  { %v4314_v32 = vpop.trf.xlu0  ;;  %3937 = vmatprep.subr.mxu0 %v4142_v5 }
  0xd7   :  { %3577 = vmatmul.mubr.msk.f32.gmra.mrb[18].mxu1 %vm59_vm0, %v4184_v14  ;;  %3622 = vmatmul.mubr.msk.f32.gmra.mrb[42].mxu0 %vm59_vm0, %v4279_v28  ;;  %v4636_v14 = vld [vmem:[%s6729_s2 + $0x18] sm:$0xff] }
  0xd8   :  { %369 = vmatprep.mubr.f32.mxu1 %v6734_v3  ;;  %958 = vmatprep.mubr.f32.mxu0 %v6734_v3 }
  0xda   :  { %v4323_v33 = vpop.trf.xlu0 }
  0xdb   :  { %3578 = vmatmul.mubr.msk.f32.gmra.mrb[20].mxu1 %vm59_vm0, %v4189_v15  ;;  %3623 = vmatmul.mubr.msk.f32.gmra.mrb[44].mxu0 %vm59_vm0, %v4288_v29 }
  0xdc   :  { %375 = vmatprep.mubr.f32.mxu1 %v6734_v3  ;;  %964 = vmatprep.mubr.f32.mxu0 %v6734_v3 }
  0xde   :  { %v4331_v34 = vpop.trf.xlu0 }
  0xdf   :  { %3579 = vmatmul.mubr.msk.f32.gmra.mrb[22].mxu1 %vm59_vm0, %v4194_v16  ;;  %3624 = vmatmul.mubr.msk.f32.gmra.mrb[46].mxu0 %vm59_vm0, %v4297_v30  ;;  %v4643_v16 = vpop.trf.xlu1 }
  0xe0   :  { %381 = vmatprep.mubr.f32.mxu1 %v6734_v3  ;;  %970 = vmatprep.mubr.f32.mxu0 %v6734_v3 }
  0xe2   :  { %v4339_v35 = vpop.trf.xlu0 }
  0xe3   :  { %3580 = vmatmul.mubr.msk.f32.gmra.mrb[24].mxu1 %vm59_vm0, %v4199_v17  ;;  %3625 = vmatmul.mubr.msk.f32.gmra.mrb[48].mxu0 %vm59_vm0, %v4305_v31 }
  0xe4   :  { %387 = vmatprep.mubr.f32.mxu1 %v6734_v3  ;;  %976 = vmatprep.mubr.f32.mxu0 %v6734_v3 }
  0xe6   :  { %v4353_v36 = vpop.trf.xlu0 }
  0xe7   :  { %3581 = vmatmul.mubr.msk.f32.gmra.mrb[26].mxu1 %vm59_vm0, %v4204_v18  ;;  %3626 = vmatmul.mubr.msk.f32.gmra.mrb[50].mxu0 %vm59_vm0, %v4314_v32 }
  0xe8   :  { %393 = vmatprep.mubr.f32.mxu1 %v6734_v3  ;;  %982 = vmatprep.mubr.f32.mxu0 %v6734_v3 }
  0xea   :  { %v4363_v38 = vpop.trf.xlu0 }
  0xeb   :  { %3582 = vmatmul.mubr.msk.f32.gmra.mrb[28].mxu1 %vm59_vm0, %v4209_v19  ;;  %3627 = vmatmul.mubr.msk.f32.gmra.mrb[52].mxu0 %vm59_vm0, %v4323_v33  ;;  %v4657_v19 = vld [vmem:[%s6729_s2 + $0x20] sm:$0xff] }
  0xec   :  { %399 = vmatprep.mubr.f32.mxu1 %v6734_v3  ;;  %988 = vmatprep.mubr.f32.mxu0 %v6734_v3 }
  0xee   :  { %v4379_v40 = vpop.trf.xlu0 }
  0xef   :  { %3583 = vmatmul.mubr.msk.f32.gmra.mrb[30].mxu1 %vm59_vm0, %v4214_v20  ;;  %3628 = vmatmul.mubr.msk.f32.gmra.mrb[54].mxu0 %vm59_vm0, %v4331_v34 }
  0xf0   :  { %405 = vmatprep.mubr.f32.mxu1 %v6734_v3  ;;  %994 = vmatprep.mubr.f32.mxu0 %v6734_v3 }
  0xf2   :  { %v4389_v42 = vpop.trf.xlu0 }
  0xf3   :  { %3584 = vmatmul.mubr.msk.f32.gmra.mrb[32].mxu1 %vm59_vm0, %v4228_v23  ;;  %3629 = vmatmul.mubr.msk.f32.gmra.mrb[56].mxu0 %vm59_vm0, %v4339_v35 }
  0xf4   :  { %411 = vmatprep.mubr.f32.mxu1 %v6734_v3  ;;  %1000 = vmatprep.mubr.f32.mxu0 %v6734_v3 }
  0xf6   :  { %v4405_v44 = vpop.trf.xlu0 }
  0xf7   :  { %3585 = vmatmul.mubr.msk.f32.gmra.mrb[34].mxu1 %vm59_vm0, %v4239_v24  ;;  %3630 = vmatmul.mubr.msk.f32.gmra.mrb[58].mxu0 %vm59_vm0, %v4353_v36  ;;  %v4680_v24 = vld [vmem:[%s6729_s2 + $0x28] sm:$0xff] }
  0xf8   :  { %417 = vmatprep.mubr.f32.mxu1 %v6734_v3  ;;  %1006 = vmatprep.mubr.f32.mxu0 %v6734_v3 }
  0xfa   :  { %v4417_v46 = vpop.trf.xlu0 }
  0xfb   :  { %3586 = vmatmul.mubr.msk.f32.gmra.mrb[36].mxu1 %vm59_vm0, %v4250_v25  ;;  %3631 = vmatmul.mubr.msk.f32.gmra.mrb[60].mxu0 %vm59_vm0, %v4363_v38  ;;  %v4848_v25 = vld [vmem:[%s6729_s2 + $0x68] sm:$0xff] }
  0xfc   :  { %423 = vmatprep.mubr.f32.mxu1 %v6734_v3  ;;  %1012 = vmatprep.mubr.f32.mxu0 %v6734_v3 }
  0xfe   :  { %v4431_v48 = vpop.trf.xlu0 }
  0xff   :  { %3587 = vmatmul.mubr.msk.f32.gmra.mrb[38].mxu1 %vm59_vm0, %v4259_v26  ;;  %3632 = vmatmul.mubr.msk.f32.gmra.mrb[62].mxu0 %vm59_vm0, %v4379_v40 }
 0x100   :  { %785 = vmatprep.mubr.f32.mxu1 %v6734_v3  ;;  %1018 = vmatprep.mubr.f32.mxu0 %v6734_v3 }
 0x103   :  { %3605 = vmatmul.mubr.msk.f32.vlgmr.msra.gmra.mrb[40].mxu1 %vm59_vm0, %v4268_v27  ;;  %3633 = vmatmul.mubr.msk.f32.gmra.mrb[64].mxu0 %vm59_vm0, %v4389_v42 }
 0x104   :  { %3912 = vmatpush3.msra.mxu1 %v4142_v5  ;;  %791 = vmatprep.mubr.f32.mxu1 %v6734_v3 }
 0x105   :  { %1024 = vmatprep.mubr.f32.mxu0 %v6734_v3  ;;  %1511 = vmatprep.subr.mxu1 %v4148_v6 }
 0x107   :  { %3606 = vmatmul.mubr.msk.f32.gmra.mrb[42].mxu1 %vm59_vm0, %v4279_v28  ;;  %3634 = vmatmul.mubr.msk.f32.gmra.mrb[66].mxu0 %vm59_vm0, %v4405_v44 }
 0x108   :  { %797 = vmatprep.mubr.f32.mxu1 %v6734_v3  ;;  %1030 = vmatprep.mubr.f32.mxu0 %v6734_v3 }
 0x10b   :  { %3607 = vmatmul.mubr.msk.f32.gmra.mrb[44].mxu1 %vm59_vm0, %v4288_v29  ;;  %3635 = vmatmul.mubr.msk.f32.gmra.mrb[68].mxu0 %vm59_vm0, %v4417_v46 }
 0x10c   :  { %803 = vmatprep.mubr.f32.mxu1 %v6734_v3  ;;  %1036 = vmatprep.mubr.f32.mxu0 %v6734_v3 }
 0x10f   :  { %3608 = vmatmul.mubr.msk.f32.gmra.mrb[46].mxu1 %vm59_vm0, %v4297_v30  ;;  %3636 = vmatmul.mubr.msk.f32.gmra.mrb[70].mxu0 %vm59_vm0, %v4431_v48 }
 0x110   :  { %809 = vmatprep.mubr.f32.mxu1 %v6734_v3  ;;  %1414 = vmatprep.mubr.f32.mxu0 %v6734_v3 }
 0x113   :  { %3609 = vmatmul.mubr.msk.f32.gmra.mrb[48].mxu1 %vm59_vm0, %v4305_v31  ;;  %3654 = vmatmul.mubr.msk.f32.vlgmr.msra.gmra.mrb[72].mxu0 %vm59_vm0, %v4355_v37 }
 0x114   :  { %815 = vmatprep.mubr.f32.mxu1 %v6734_v3  ;;  %1420 = vmatprep.mubr.f32.mxu0 %v6734_v3 }
 0x115   :  { %3938 = vmatpush3.msra.mxu0 %v4142_v5 }
 0x116   :  { %2140 = vmatprep.subr.mxu0 %v4148_v6 }
 0x117   :  { %3610 = vmatmul.mubr.msk.f32.gmra.mrb[50].mxu1 %vm59_vm0, %v4314_v32  ;;  %3655 = vmatmul.mubr.msk.f32.gmra.mrb[74].mxu0 %vm59_vm0, %v4371_v39 }
 0x118   :  { %821 = vmatprep.mubr.f32.mxu1 %v6734_v3  ;;  %1426 = vmatprep.mubr.f32.mxu0 %v6734_v3 }
 0x11b   :  { %3611 = vmatmul.mubr.msk.f32.gmra.mrb[52].mxu1 %vm59_vm0, %v4323_v33  ;;  %3656 = vmatmul.mubr.msk.f32.gmra.mrb[76].mxu0 %vm59_vm0, %v4381_v41 }
 0x11c   :  { %827 = vmatprep.mubr.f32.mxu1 %v6734_v3  ;;  %1432 = vmatprep.mubr.f32.mxu0 %v6734_v3 }
 0x11f   :  { %3612 = vmatmul.mubr.msk.f32.gmra.mrb[54].mxu1 %vm59_vm0, %v4331_v34  ;;  %3657 = vmatmul.mubr.msk.f32.gmra.mrb[78].mxu0 %vm59_vm0, %v4397_v43 }
 0x120   :  { %833 = vmatprep.mubr.f32.mxu1 %v6734_v3  ;;  %1438 = vmatprep.mubr.f32.mxu0 %v6734_v3 }
 0x123   :  { %3613 = vmatmul.mubr.msk.f32.gmra.mrb[56].mxu1 %vm59_vm0, %v4339_v35  ;;  %3658 = vmatmul.mubr.msk.f32.gmra.mrb[80].mxu0 %vm59_vm0, %v4407_v45 }
 0x124   :  { %839 = vmatprep.mubr.f32.mxu1 %v6734_v3  ;;  %1444 = vmatprep.mubr.f32.mxu0 %v6734_v3 }
 0x127   :  { %3614 = vmatmul.mubr.msk.f32.gmra.mrb[58].mxu1 %vm59_vm0, %v4353_v36  ;;  %3659 = vmatmul.mubr.msk.f32.gmra.mrb[82].mxu0 %vm59_vm0, %v4425_v47 }
 0x128   :  { %845 = vmatprep.mubr.f32.mxu1 %v6734_v3  ;;  %1450 = vmatprep.mubr.f32.mxu0 %v6734_v3 }
 0x12b   :  { %3615 = vmatmul.mubr.msk.f32.gmra.mrb[60].mxu1 %vm59_vm0, %v4363_v38  ;;  %3660 = vmatmul.mubr.msk.f32.gmra.mrb[84].mxu0 %vm59_vm0, %v4435_v49 }
 0x12c   :  { %851 = vmatprep.mubr.f32.mxu1 %v6734_v3  ;;  %1456 = vmatprep.mubr.f32.mxu0 %v6734_v3 }
 0x12f   :  { %3616 = vmatmul.mubr.msk.f32.gmra.mrb[62].mxu1 %vm59_vm0, %v4379_v40  ;;  %3661 = vmatmul.mubr.msk.f32.gmra.mrb[86].mxu0 %vm59_vm0, %v4449_v50 }
 0x130   :  { %857 = vmatprep.mubr.f32.mxu1 %v6734_v3  ;;  %1462 = vmatprep.mubr.f32.mxu0 %v6734_v3 }
 0x133   :  { %3617 = vmatmul.mubr.msk.f32.gmra.mrb[64].mxu1 %vm59_vm0, %v4389_v42  ;;  %3662 = vmatmul.mubr.msk.f32.gmra.mrb[88].mxu0 %vm59_vm0, %v4459_v51 }
 0x134   :  { %863 = vmatprep.mubr.f32.mxu1 %v6734_v3  ;;  %1468 = vmatprep.mubr.f32.mxu0 %v6734_v3 }
 0x137   :  { %3618 = vmatmul.mubr.msk.f32.gmra.mrb[66].mxu1 %vm59_vm0, %v4405_v44  ;;  %3663 = vmatmul.mubr.msk.f32.gmra.mrb[90].mxu0 %vm59_vm0, %v4473_v52 }
 0x138   :  { %869 = vmatprep.mubr.f32.mxu1 %v6734_v3  ;;  %1474 = vmatprep.mubr.f32.mxu0 %v6734_v3 }
 0x13b   :  { %3619 = vmatmul.mubr.msk.f32.gmra.mrb[68].mxu1 %vm59_vm0, %v4417_v46  ;;  %3664 = vmatmul.mubr.msk.f32.gmra.mrb[92].mxu0 %vm59_vm0, %v4481_v53 }
 0x13c   :  { %875 = vmatprep.mubr.f32.mxu1 %v6734_v3  ;;  %1480 = vmatprep.mubr.f32.mxu0 %v6734_v3 }
 0x13f   :  { %3620 = vmatmul.mubr.msk.f32.gmra.mrb[70].mxu1 %vm59_vm0, %v4431_v48  ;;  %3665 = vmatmul.mubr.msk.f32.gmra.mrb[94].mxu0 %vm59_vm0, %v4495_v54 }
 0x140   :  { %3913 = vmatprep.mubr.msk.f32.mxu1 %vm59_vm0, %v4268_v27  ;;  %1486 = vmatprep.mubr.f32.mxu0 %v6734_v3 }
 0x143   :  { %3914 = vmatmul.mubr.msk.f32.vlgmr.msra.gmra.mrb[72].mxu1 %vm59_vm0, %v4279_v28  ;;  %3666 = vmatmul.mubr.msk.f32.gmra.mrb[96].mxu0 %vm59_vm0, %v4503_v55  ;;  %v4699_v28 = vld [vmem:[%s6729_s2 + $0x30] sm:$0xff] }
 0x144   :  { %1512 = vmatpush1.msra.mxu1 %v4226_v22  ;;  %3916 = vmatprep.mubr.msk.f32.mxu1 %vm59_vm0, %v4288_v29 }
 0x145   :  { %1492 = vmatprep.mubr.f32.mxu0 %v6734_v3  ;;  %1979 = vmatprep.subr.mxu1 %v4123_v1 }
 0x147   :  { %3917 = vmatmul.mubr.msk.f32.gmra.mrb[74].mxu1 %vm59_vm0, %v4297_v30  ;;  %3667 = vmatmul.mubr.msk.f32.gmra.mrb[98].mxu0 %vm59_vm0, %v4517_v56 }
 0x148   :  { %3919 = vmatprep.mubr.msk.f32.mxu1 %vm59_vm0, %v4305_v31  ;;  %1498 = vmatprep.mubr.f32.mxu0 %v6734_v3 }
 0x14b   :  { %3920 = vmatmul.mubr.msk.f32.gmra.mrb[76].mxu1 %vm59_vm0, %v4314_v32  ;;  %3668 = vmatmul.mubr.msk.f32.gmra.mrb[100].mxu0 %vm59_vm0, %v4525_v57 }
 0x14c   :  { %3922 = vmatprep.mubr.msk.f32.mxu1 %vm59_vm0, %v4323_v33  ;;  %1504 = vmatprep.mubr.f32.mxu0 %v6734_v3  ;;  %v4720_v33 = vld [vmem:[%s6729_s2 + $0x38] sm:$0xff] }
 0x14f   :  { %3923 = vmatmul.mubr.msk.f32.gmra.mrb[78].mxu1 %vm59_vm0, %v4331_v34  ;;  %3669 = vmatmul.mubr.msk.f32.gmra.mrb[102].mxu0 %vm59_vm0, %v4541_v58  ;;  %v4822_v34 = vld [vmem:[%s6729_s2 + $0x60] sm:$0xff] }
 0x150   :  { %3925 = vmatprep.mubr.msk.f32.mxu1 %vm59_vm0, %v4339_v35  ;;  %3939 = vmatprep.mubr.msk.f32.mxu0 %vm59_vm0, %v4355_v37  ;;  %6791 = vst [vmem:[#allocation20_spill] sm:$0xff] %v4822_v34 }
 0x153   :  { %3926 = vmatmul.mubr.msk.f32.gmra.mrb[80].mxu1 %vm59_vm0, %v4353_v36  ;;  %3940 = vmatmul.mubr.msk.f32.vlgmr.msra.gmra.mrb[104].mxu0 %vm59_vm0, %v4371_v39 }
 0x154   :  { %3928 = vmatprep.mubr.msk.f32.mxu1 %vm59_vm0, %v4363_v38  ;;  %3942 = vmatprep.mubr.msk.f32.mxu0 %vm59_vm0, %v4381_v41  ;;  %v4740_v38 = vld [vmem:[%s6729_s2 + $0x40] sm:$0xff] }
 0x155   :  { %2141 = vmatpush1.msra.mxu0 %v4226_v22  ;;  %v4668_v22 = vpop.trf.xlu1 }
 0x156   :  { %v4582_v62 = vpop.f32.mrb[0].mxu0  ;;  %2608 = vmatprep.subr.mxu0 %v4123_v1  ;;  %v4080_v1 = vmov 0   ;;  %6779 = vst [vmem:[#allocation8_spill] sm:$0xff] %v4668_v22 }
 0x157   :  { %v4585_v63 = vpop.f32.mrb[1].mxu0  ;;  %3929 = vmatmul.mubr.msk.f32.gmra.mrb[82].mxu1 %vm59_vm0, %v4379_v40  ;;  %3943 = vmatmul.mubr.msk.f32.gmra.mrb[106].mxu0 %vm59_vm0, %v4397_v43 }
 0x158   :  { %3931 = vmatprep.mubr.msk.f32.mxu1 %vm59_vm0, %v4389_v42  ;;  %3945 = vmatprep.mubr.msk.f32.mxu0 %vm59_vm0, %v4407_v45  ;;  %v4760_v42 = vld [vmem:[%s6729_s2 + $0x48] sm:$0xff] }
 0x159   :  { %4025 = vset.pattern.permute.xlu1 %v4080_v1  ;;  %4026 = vset.pattern.permute.xlu0 %v4080_v1  ;;  %v4706_v30 = vpop.trf.xlu1 }
 0x15a   :  { %v4602_v7 = vpop.f32.mrb[2].mxu0  ;;  %3205 = vperm.xlu1 %4025, %v4594_v0   ;;  %6780 = vst [vmem:[#allocation9_spill] sm:$0xff] %v4706_v30 }
 0x15b   :  { %v4607_v9 = vpop.f32.mrb[3].mxu0  ;;  %3932 = vmatmul.mubr.msk.f32.gmra.mrb[84].mxu1 %vm59_vm0, %v4405_v44  ;;  %3946 = vmatmul.mubr.msk.f32.gmra.mrb[108].mxu0 %vm59_vm0, %v4425_v47  ;;  %v4768_v44 = vpop.trf.xlu0 }
 0x15c   :  { %3934 = vmatprep.mubr.msk.f32.mxu1 %vm59_vm0, %v4417_v46  ;;  %3948 = vmatprep.mubr.msk.f32.mxu0 %vm59_vm0, %v4435_v49 }
 0x15d   :  { %v4728_v36 = vpop.trf.xlu1 }
 0x15e   :  { %v4624_v12 = vpop.f32.mrb[4].mxu0  ;;  %3211 = vperm.xlu1 %4025, %v4616_v10   ;;  %6781 = vst [vmem:[#allocation10_spill] sm:$0xff] %v4728_v36 }
 0x15f   :  { %v4627_v13 = vpop.f32.mrb[5].mxu0  ;;  %3935 = vmatmul.mubr.msk.f32.gmra.mrb[86].mxu1 %vm59_vm0, %v4431_v48  ;;  %3949 = vmatmul.mubr.msk.f32.gmra.mrb[110].mxu0 %vm59_vm0, %v4449_v50  ;;  %v4804_v48 = vld [vmem:[%s6729_s2 + $0x58] sm:$0xff] }
 0x160   :  { %1575 = vmatprep.mubr.f32.mxu1 %v6734_v3  ;;  %3951 = vmatprep.mubr.msk.f32.mxu0 %vm59_vm0, %v4459_v51 }
 0x162   :  { %v4645_v17 = vpop.f32.mrb[6].mxu0  ;;  %3214 = vperm.xlu1 %4025, %v4636_v14  }
 0x163   :  { %v4648_v18 = vpop.f32.mrb[7].mxu0  ;;  %3670 = vmatmul.mubr.msk.f32.vlgmr.msra.gmra.mrb[88].mxu1 %vm59_vm0, %v4355_v37  ;;  %3952 = vmatmul.mubr.msk.f32.gmra.mrb[112].mxu0 %vm59_vm0, %v4473_v52 }
 0x164   :  { %1980 = vmatpush1.msra.mxu1 %v4129_v2  ;;  %1581 = vmatprep.mubr.f32.mxu1 %v6734_v3 }
 0x165   :  { %3954 = vmatprep.mubr.msk.f32.mxu0 %vm59_vm0, %v4481_v53  ;;  %3963 = vmatprep.subr.mxu1 %v4142_v5 }
 0x166   :  { %v4666_v21 = vpop.f32.mrb[8].mxu0  ;;  %3217 = vperm.xlu1 %4025, %v4657_v19  }
 0x167   :  { %v4671_v23 = vpop.f32.mrb[9].mxu0  ;;  %3671 = vmatmul.mubr.msk.f32.gmra.mrb[90].mxu1 %vm59_vm0, %v4371_v39  ;;  %3955 = vmatmul.mubr.msk.f32.gmra.mrb[114].mxu0 %vm59_vm0, %v4495_v54  ;;  %v4799_v39 = vpop.trf.xlu0 }
 0x168   :  { %1587 = vmatprep.mubr.f32.mxu1 %v6734_v3  ;;  %3957 = vmatprep.mubr.msk.f32.mxu0 %vm59_vm0, %v4503_v55  ;;  %6788 = vst [vmem:[#allocation17_spill] sm:$0xff] %v4799_v39  ;;  %v4081_v39 = vmov 1  }
 0x16a   :  { %v4687_v26 = vpop.f32.mrb[10].mxu0  ;;  %3220 = vperm.xlu1 %4025, %v4680_v24  }
 0x16b   :  { %v4690_v27 = vpop.f32.mrb[11].mxu0  ;;  %3672 = vmatmul.mubr.msk.f32.gmra.mrb[92].mxu1 %vm59_vm0, %v4381_v41  ;;  %3958 = vmatmul.mubr.msk.f32.gmra.mrb[116].mxu0 %vm59_vm0, %v4517_v56  ;;  %v4830_v15 = vpop.trf.xlu0 }
 0x16c   :  { %1593 = vmatprep.mubr.f32.mxu1 %v6734_v3  ;;  %3960 = vmatprep.mubr.msk.f32.mxu0 %vm59_vm0, %v4525_v57  ;;  %6792 = vst [vmem:[#allocation21_spill] sm:$0xff] %v4830_v15 }
 0x16e   :  { %v4708_v31 = vpop.f32.mrb[12].mxu0  ;;  %3223 = vperm.xlu1 %4025, %v4699_v28  }
 0x16f   :  { %v4711_v32 = vpop.f32.mrb[13].mxu0  ;;  %3673 = vmatmul.mubr.msk.f32.gmra.mrb[94].mxu1 %vm59_vm0, %v4397_v43  ;;  %3961 = vmatmul.mubr.msk.f32.gmra.mrb[118].mxu0 %vm59_vm0, %v4541_v58  ;;  %v4766_v43 = vpop.trf.xlu1 }
 0x170   :  { %1599 = vmatprep.mubr.f32.mxu1 %v6734_v3  ;;  %2204 = vmatprep.mubr.f32.mxu0 %v6734_v3  ;;  %6783 = vst [vmem:[#allocation12_spill] sm:$0xff] %v4766_v43 }
 0x172   :  { %v4726_v35 = vpop.f32.mrb[14].mxu0  ;;  %3226 = vperm.xlu1 %4025, %v4720_v33  }
 0x173   :  { %v4731_v37 = vpop.f32.mrb[15].mxu0  ;;  %3674 = vmatmul.mubr.msk.f32.gmra.mrb[96].mxu1 %vm59_vm0, %v4407_v45  ;;  %3719 = vmatmul.mubr.msk.f32.vlgmr.msra.gmra.mrb[120].mxu0 %vm59_vm0, %v4552_v59 }
 0x174   :  { %1605 = vmatprep.mubr.f32.mxu1 %v6734_v3  ;;  %2210 = vmatprep.mubr.f32.mxu0 %v6734_v3 }
 0x175   :  { %2609 = vmatpush1.msra.mxu0 %v4129_v2  ;;  %v4790_v2 = vpop.trf.xlu1 }
 0x176   :  { %v4747_v40 = vpop.f32.mrb[16].mxu0  ;;  %3989 = vmatprep.subr.mxu0 %v4142_v5  ;;  %3229 = vperm.xlu1 %4025, %v4740_v38  }
 0x177   :  { %v4751_v41 = vpop.f32.mrb[17].mxu0  ;;  %3675 = vmatmul.mubr.msk.f32.gmra.mrb[98].mxu1 %vm59_vm0, %v4425_v47  ;;  %3720 = vmatmul.mubr.msk.f32.gmra.mrb[122].mxu0 %vm59_vm0, %v4561_v60  ;;  %v4782_v47 = vld [vmem:[%s6729_s2 + $0x50] sm:$0xff] }
 0x178   :  { %6782 = vst [vmem:[#allocation11_spill] sm:$0xff] %v4751_v41  ;;  %1611 = vmatprep.mubr.f32.mxu1 %v6734_v3  ;;  %2216 = vmatprep.mubr.f32.mxu0 %v6734_v3 }
 0x179   :  { %v4828_v20 = vpop.trf.xlu1 }
 0x17a   :  { %v4770_v45 = vpop.f32.mrb[18].mxu0  ;;  %3232 = vperm.xlu1 %4025, %v4760_v42  }
 0x17b   :  { %6784 = vst [vmem:[#allocation13_spill] sm:$0xff] %v4770_v45  ;;  %v4773_v46 = vpop.f32.mrb[19].mxu0  ;;  %3676 = vmatmul.mubr.msk.f32.gmra.mrb[100].mxu1 %vm59_vm0, %v4435_v49  ;;  %3721 = vmatmul.mubr.msk.f32.gmra.mrb[124].mxu0 %vm59_vm0, %v4579_v61 }
 0x17c   :  { %6785 = vst [vmem:[#allocation14_spill] sm:$0xff] %v4773_v46  ;;  %1617 = vmatprep.mubr.f32.mxu1 %v6734_v3  ;;  %2222 = vmatprep.mubr.f32.mxu0 %v6734_v3  ;;  %v4878_v46 = vpop.trf.xlu0 }
 0x17d   :  { %6799 = vst [vmem:[#allocation27_spill] sm:$0xff] %v4878_v46 }
 0x17e   :  { %v4788_v1 = vpop.f32.mrb[20].mxu0  ;;  %3235 = vperm.xlu1 %4025, %v4782_v47  }
 0x17f   :  { %6786 = vst [vmem:[#allocation15_spill] sm:$0xff] %v4788_v1  ;;  %v4793_v49 = vpop.f32.mrb[21].mxu0  ;;  %3677 = vmatmul.mubr.msk.f32.gmra.mrb[102].mxu1 %vm59_vm0, %v4449_v50  ;;  %3722 = vmatmul.mubr.msk.f32.gmra.mrb[126].mxu0 %vm59_vm0, %v4604_v8 }
 0x180   :  { %6787 = vst [vmem:[#allocation16_spill] sm:$0xff] %v4793_v49  ;;  %1623 = vmatprep.mubr.f32.mxu1 %v6734_v3  ;;  %2228 = vmatprep.mubr.f32.mxu0 %v6734_v3 }
 0x182   :  { %v4810_v29 = vpop.f32.mrb[22].mxu0  ;;  %3238 = vperm.xlu1 %4025, %v4804_v48  }
 0x183   :  { %6789 = vst [vmem:[#allocation18_spill] sm:$0xff] %v4810_v29  ;;  %v4813_v50 = vpop.f32.mrb[23].mxu0  ;;  %3678 = vmatmul.mubr.msk.f32.gmra.mrb[104].mxu1 %vm59_vm0, %v4459_v51  ;;  %3723 = vmatmul.mubr.msk.f32.gmra.mrb[128].mxu0 %vm59_vm0, %v4643_v16 }
 0x184   :  { %6790 = vst [vmem:[#allocation19_spill] sm:$0xff] %v4813_v50  ;;  %1629 = vmatprep.mubr.f32.mxu1 %v6734_v3  ;;  %2234 = vmatprep.mubr.f32.mxu0 %v6734_v3  ;;  %v6795_v50 = vmov 0.0   ;;  %v4870_v3 = vld [vmem:[%s6729_s2 + $0x70] sm:$0xff] }
 0x185   :  { %6798 = vst [vmem:[#allocation26_spill] sm:$0xff] %v4870_v3 }
 0x186   :  { %v4832_v51 = vpop.f32.mrb[0].mxu1  ;;  %v4834_v11 = vpop.f32.mrb[24].mxu0  ;;  %3241 = vperm.xlu1 %4025, %v4822_v34  }
 0x187   :  { %6793 = vst [vmem:[#allocation22_spill] sm:$0xff] %v4832_v51  ;;  %v4837_v4 = vpop.f32.mrb[1].mxu1  ;;  %v4839_v49 = vpop.f32.mrb[25].mxu0  ;;  %3679 = vmatmul.mubr.msk.f32.gmra.mrb[106].mxu1 %vm59_vm0, %v4473_v52  ;;  %3724 = vmatmul.mubr.msk.f32.gmra.mrb[130].mxu0 %vm59_vm0, %v4668_v22 }
 0x188   :  { %6794 = vst [vmem:[#allocation23_spill] sm:$0xff] %v4837_v4  ;;  %1635 = vmatprep.mubr.f32.mxu1 %v6795_v50  ;;  %2240 = vmatprep.mubr.f32.mxu0 %v6795_v50  ;;  %v4876_v51 = vpop.trf.xlu1  ;;  %v4896_v4 = vld [vmem:[%s6729_s2 + $0x78] sm:$0xff] }
 0x18a   :  { %v4854_v29 = vpop.f32.mrb[2].mxu1  ;;  %v4856_v1 = vpop.f32.mrb[26].mxu0  ;;  %3244 = vperm.xlu1 %4025, %v4848_v25  }
 0x18b   :  { %6796 = vst [vmem:[#allocation24_spill] sm:$0xff] %v4854_v29  ;;  %v4859_v52 = vpop.f32.mrb[3].mxu1  ;;  %v4861_v15 = vpop.f32.mrb[27].mxu0  ;;  %3680 = vmatmul.mubr.msk.f32.gmra.mrb[108].mxu1 %vm59_vm0, %v4481_v53  ;;  %3725 = vmatmul.mubr.msk.f32.gmra.mrb[132].mxu0 %vm59_vm0, %v4706_v30 }
 0x18c   :  { %6797 = vst [vmem:[#allocation25_spill] sm:$0xff] %v4859_v52  ;;  %1641 = vmatprep.mubr.f32.mxu1 %v6795_v50  ;;  %2246 = vmatprep.mubr.f32.mxu0 %v6795_v50  ;;  %v3188_v52 = vld [vmem:[%s6729_s2 + $0x8] sm:$0xff] }
 0x18d   :  { %3208 = vperm.xlu0 %4026, %v3188_v52  }
 0x18e   :  { %v4880_v53 = vpop.f32.mrb[4].mxu1  ;;  %v4882_v45 = vpop.f32.mrb[28].mxu0  ;;  %3247 = vperm.xlu1 %4025, %v4870_v3  }
 0x18f   :  { %6800 = vst [vmem:[#allocation28_spill] sm:$0xff] %v4880_v53  ;;  %v4885_v30 = vpop.f32.mrb[5].mxu1  ;;  %v4887_v34 = vpop.f32.mrb[29].mxu0  ;;  %3681 = vmatmul.mubr.msk.f32.gmra.mrb[110].mxu1 %vm59_vm0, %v4495_v54  ;;  %3726 = vmatmul.mubr.msk.f32.gmra.mrb[134].mxu0 %vm59_vm0, %v4728_v36 }
 0x190   :  { %6801 = vst [vmem:[#allocation29_spill] sm:$0xff] %v4885_v30  ;;  %1647 = vmatprep.mubr.f32.mxu1 %v6795_v50  ;;  %2252 = vmatprep.mubr.f32.mxu0 %v6795_v50  ;;  %v4919_v30 = vpop.trf.xlu1  ;;  %v4921_v53 = vpop.trf.xlu0 }
 0x191   :  { %6805 = vst [vmem:[#allocation33_spill] sm:$0xff] %v4921_v53  ;;  %4028 = vset.pattern.permute.xlu0 %v4081_v39 }
 0x192   :  { %v4902_v29 = vpop.f32.mrb[6].mxu1  ;;  %v4904_v46 = vpop.f32.mrb[30].mxu0  ;;  %3250 = vperm.xlu1 %4025, %v4896_v4   ;;  %3285 = vperm.xlu0 %4028, %v4657_v19  }
 0x193   :  { %6802 = vst [vmem:[#allocation30_spill] sm:$0xff] %v4902_v29  ;;  %6803 = vst [vmem:[#allocation31_spill] sm:$0xff] %v4904_v46  ;;  %v4907_v54 = vpop.f32.mrb[7].mxu1  ;;  %v4909_v36 = vpop.f32.mrb[31].mxu0  ;;  %3682 = vmatmul.mubr.msk.f32.gmra.mrb[112].mxu1 %vm59_vm0, %v4503_v55  ;;  %3727 = vmatmul.mubr.msk.f32.gmra.mrb[136].mxu0 %vm59_vm0, %v4766_v43  ;;  %v6806_v55 = vmin.f32 %v4582_v62, %v4585_v63 }
 0x194   :  { %6804 = vst [vmem:[#allocation32_spill] sm:$0xff] %v4907_v54  ;;  %1653 = vmatprep.mubr.f32.mxu1 %v6795_v50  ;;  %2258 = vmatprep.mubr.f32.mxu0 %v6795_v50 }
 0x196   :  { %v335_v3 = vpop.f32.mrb[8].mxu1  ;;  %v4923_v46 = vpop.f32.mrb[32].mxu0  ;;  %4027 = vset.pattern.permute.xlu1 %v4081_v39  ;;  %3294 = vperm.xlu0 %4028, %v4720_v33  }
 0x197   :  { %v591_v43 = vmin.f32 %v6806_v55, %v335_v3  ;;  %v337_v22 = vpop.f32.mrb[9].mxu1  ;;  %v4928_v41 = vpop.f32.mrb[33].mxu0  ;;  %3683 = vmatmul.mubr.msk.f32.gmra.mrb[114].mxu1 %vm59_vm0, %v4517_v56  ;;  %3728 = vmatmul.mubr.msk.f32.gmra.mrb[138].mxu0 %vm59_vm0, %v4790_v2  ;;  %v6807_v56 = vmin.f32 %v4602_v7, %v4607_v9 }
 0x198   :  { %1659 = vmatprep.mubr.f32.mxu1 %v6795_v50  ;;  %2264 = vmatprep.mubr.f32.mxu0 %v6795_v50  ;;  %v4958_v7 = vpop.trf.xlu0 }
 0x199   :  { %v607_v54 = vmin.f32 %v591_v43, %v337_v22  ;;  %3273 = vperm.xlu1 %4027, %v4594_v0   ;;  %v4956_v43 = vpop.trf.xlu1 }
 0x19a   :  { %v341_v3 = vpop.f32.mrb[10].mxu1  ;;  %v4940_v62 = vpop.f32.mrb[34].mxu0  ;;  %3300 = vperm.xlu0 %4028, %v4760_v42  }
 0x19b   :  { %v592_v63 = vmin.f32 %v6807_v56, %v341_v3  ;;  %v343_v55 = vpop.f32.mrb[11].mxu1  ;;  %v4945_v29 = vpop.f32.mrb[35].mxu0  ;;  %3684 = vmatmul.mubr.msk.f32.gmra.mrb[116].mxu1 %vm59_vm0, %v4525_v57  ;;  %3729 = vmatmul.mubr.msk.f32.gmra.mrb[140].mxu0 %vm59_vm0, %v4828_v20  ;;  %v4952_v22 = vmin.f32 %v607_v54, %v4839_v49  ;;  %v6808_v57 = vmin.f32 %v4624_v12, %v4627_v13 }
 0x19c   :  { %1665 = vmatprep.mubr.f32.mxu1 %v6795_v50  ;;  %2270 = vmatprep.mubr.f32.mxu0 %v6795_v50 }
 0x19d   :  { %v608_v0 = vmin.f32 %v592_v63, %v343_v55  ;;  %3276 = vperm.xlu1 %4027, %v3188_v52  }
 0x19e   :  { %v347_v9 = vpop.f32.mrb[12].mxu1  ;;  %v4960_v3 = vpop.f32.mrb[36].mxu0  ;;  %3306 = vperm.xlu0 %4028, %v4804_v48  }
 0x19f   :  { %v593_v49 = vmin.f32 %v6808_v57, %v347_v9  ;;  %v349_v54 = vpop.f32.mrb[13].mxu1  ;;  %v4966_v56 = vpop.f32.mrb[37].mxu0  ;;  %3685 = vmatmul.mubr.msk.f32.gmra.mrb[118].mxu1 %vm59_vm0, %v4541_v58  ;;  %3730 = vmatmul.mubr.msk.f32.gmra.mrb[142].mxu0 %vm59_vm0, %v4876_v51  ;;  %v4973_v39 = vmin.f32 %v608_v0, %v4834_v11  ;;  %v6809_v58 = vmin.f32 %v4645_v17, %v4648_v18 }
 0x1a0   :  { %2043 = vmatprep.mubr.f32.mxu1 %v6795_v50  ;;  %2276 = vmatprep.mubr.f32.mxu0 %v6795_v50  ;;  %v4996_v17 = vpop.trf.xlu1  ;;  %v4998_v18 = vpop.trf.xlu0 }
 0x1a1   :  { %v609_v19 = vmin.f32 %v593_v49, %v349_v54  ;;  %3279 = vperm.xlu1 %4027, %v4616_v10  }
 0x1a2   :  { %v353_v12 = vpop.f32.mrb[14].mxu1  ;;  %v4978_v13 = vpop.f32.mrb[38].mxu0  ;;  %3312 = vperm.xlu0 %4028, %v4848_v25  }
 0x1a3   :  { %v594_v52 = vmin.f32 %v6809_v58, %v353_v12  ;;  %v355_v63 = vpop.f32.mrb[15].mxu1  ;;  %v4984_v55 = vpop.f32.mrb[39].mxu0  ;;  %3703 = vmatmul.mubr.msk.f32.vlgmr.msra.gmra.mrb[120].mxu1 %vm59_vm0, %v4552_v59  ;;  %3731 = vmatmul.mubr.msk.f32.gmra.mrb[144].mxu0 %vm59_vm0, %v4919_v30  ;;  %v4991_v10 = vmin.f32 %v609_v19, %v4861_v15 }
 0x1a4   :  { %3964 = vmatpush3.msra.mxu1 %v4142_v5  ;;  %2049 = vmatprep.mubr.f32.mxu1 %v6795_v50  ;;  %v6810_v5 = vmin.f32 %v4666_v21, %v4671_v23  ;;  %v6811_v23 = vmin.f32 %v4687_v26, %v4690_v27  ;;  %v5035_v12 = vpop.trf.xlu1  ;;  %v5039_v26 = vpop.trf.xlu0 }
 0x1a5   :  { %v610_v11 = vmin.f32 %v594_v52, %v355_v63  ;;  %2282 = vmatprep.mubr.f32.mxu0 %v6795_v50  ;;  %2769 = vmatprep.subr.mxu1 %v4148_v6 }
 0x1a6   :  { %v359_v33 = vpop.f32.mrb[16].mxu1  ;;  %v5001_v0 = vpop.f32.mrb[40].mxu0  ;;  %3282 = vperm.xlu1 %4027, %v4636_v14   ;;  %3318 = vperm.xlu0 %4028, %v4896_v4  }
 0x1a7   :  { %v595_v15 = vmin.f32 %v6810_v5, %v359_v33  ;;  %v361_v9 = vpop.f32.mrb[17].mxu1  ;;  %3704 = vmatmul.mubr.msk.f32.gmra.mrb[122].mxu1 %vm59_vm0, %v4561_v60  ;;  %3732 = vmatmul.mubr.msk.f32.gmra.mrb[146].mxu0 %vm59_vm0, %v4956_v43  ;;  %v5012_v57 = vpop.f32.mrb[41].mxu0  ;;  %v5015_v6 = vmin.f32 %v610_v11, %v4856_v1 }
 0x1a8   :  { %2055 = vmatprep.mubr.f32.mxu1 %v6795_v50  ;;  %2288 = vmatprep.mubr.f32.mxu0 %v6795_v50 }
 0x1a9   :  { %v611_v14 = vmin.f32 %v595_v15, %v361_v9 }
 0x1aa   :  { %v365_v42 = vpop.f32.mrb[18].mxu1  ;;  %v5019_v21 = vpop.f32.mrb[42].mxu0  ;;  %3288 = vperm.xlu1 %4027, %v4680_v24  }
 0x1ab   :  { %v596_v49 = vmin.f32 %v6811_v23, %v365_v42  ;;  %v367_v54 = vpop.f32.mrb[19].mxu1  ;;  %3705 = vmatmul.mubr.msk.f32.gmra.mrb[124].mxu1 %vm59_vm0, %v4579_v61  ;;  %3733 = vmatmul.mubr.msk.f32.gmra.mrb[148].mxu0 %vm59_vm0, %v4996_v17  ;;  %v5030_v1 = vpop.f32.mrb[43].mxu0  ;;  %v5033_v19 = vmin.f32 %v611_v14, %v4887_v34  ;;  %v6812_v34 = vmin.f32 %v4708_v31, %v4711_v32 }
 0x1ac   :  { %2061 = vmatprep.mubr.f32.mxu1 %v6795_v50  ;;  %2294 = vmatprep.mubr.f32.mxu0 %v6795_v50  ;;  %v6813_v32 = vmin.f32 %v4726_v35, %v4731_v37  ;;  %v4029_v35 = vld [vmem:[%s6728_s1 + $0x20] sm:$0xff] }
 0x1ad   :  { %v612_v24 = vmin.f32 %v596_v49, %v367_v54  ;;  %v6816_v49 = vld [vmem:[#allocation8_spill] sm:$0xff]  ;;  %v6817_v54 = vld [vmem:[#allocation17_spill] sm:$0xff] }
 0x1ae   :  { %v371_v27 = vpop.f32.mrb[20].mxu1  ;;  %v5041_v48 = vpop.f32.mrb[44].mxu0  ;;  %3291 = vperm.xlu1 %4027, %v4699_v28  }
 0x1af   :  { %v597_v58 = vmin.f32 %v6812_v34, %v371_v27  ;;  %v373_v52 = vpop.f32.mrb[21].mxu1  ;;  %3706 = vmatmul.mubr.msk.f32.gmra.mrb[126].mxu1 %vm59_vm0, %v4604_v8  ;;  %3734 = vmatmul.mubr.msk.f32.gmra.mrb[150].mxu0 %vm59_vm0, %v5035_v12  ;;  %v5052_v63 = vpop.f32.mrb[45].mxu0  ;;  %v5055_v11 = vmin.f32 %v612_v24, %v4882_v45  ;;  %v6818_v27 = vld [vmem:[#allocation31_spill] sm:$0xff] }
 0x1b0   :  { %2067 = vmatprep.mubr.f32.mxu1 %v6795_v50  ;;  %2672 = vmatprep.mubr.f32.mxu0 %v6795_v50 }
 0x1b1   :  { %v613_v25 = vmin.f32 %v597_v58, %v373_v52  ;;  %v6820_v52 = vld [vmem:[#allocation20_spill] sm:$0xff] }
 0x1b2   :  { %v377_v28 = vpop.f32.mrb[22].mxu1  ;;  %v5059_v31 = vpop.f32.mrb[46].mxu0  ;;  %3297 = vperm.xlu1 %4027, %v4740_v38  }
 0x1b3   :  { %v598_v33 = vmin.f32 %v6813_v32, %v377_v28  ;;  %v379_v5 = vpop.f32.mrb[23].mxu1  ;;  %3707 = vmatmul.mubr.msk.f32.gmra.mrb[128].mxu1 %vm59_vm0, %v4643_v16  ;;  %3752 = vmatmul.mubr.msk.f32.vlgmr.msra.gmra.mrb[152].mxu0 %vm59_vm0, %v4768_v44  ;;  %v5070_v45 = vpop.f32.mrb[47].mxu0  ;;  %v5073_v15 = vmin.f32 %v613_v25, %v4909_v36  ;;  %v6814_v36 = vld [vmem:[#allocation11_spill] sm:$0xff]  ;;  %v6821_v25 = vld [vmem:[#allocation13_spill] sm:$0xff]  ;;  %v6822_v28 = vld [vmem:[#allocation14_spill] sm:$0xff] }
 0x1b4   :  { %2073 = vmatprep.mubr.f32.mxu1 %v6795_v50  ;;  %2678 = vmatprep.mubr.f32.mxu0 %v6795_v50  ;;  %v5077_v38 = vpop.trf.xlu0  ;;  %v6815_v14 = vmin.f32 %v4747_v40, %v6814_v36  ;;  %v6823_v32 = vmin.f32 %v6821_v25, %v6822_v28  ;;  %v6830_v25 = vld [vmem:[#allocation16_spill] sm:$0xff] }
 0x1b5   :  { %v614_v4 = vmin.f32 %v598_v33, %v379_v5  ;;  %3990 = vmatpush3.msra.mxu0 %v4029_v35  ;;  %v6824_v35 = vld [vmem:[#allocation9_spill] sm:$0xff] }
 0x1b6   :  { %v383_v37 = vpop.f32.mrb[24].mxu1  ;;  %v5082_v9 = vpop.f32.mrb[48].mxu0  ;;  %3303 = vperm.xlu1 %4027, %v4782_v47  }
 0x1b7   :  { %v599_v42 = vmin.f32 %v6815_v14, %v383_v37  ;;  %v385_v23 = vpop.f32.mrb[25].mxu1  ;;  %3708 = vmatmul.mubr.msk.f32.gmra.mrb[130].mxu1 %vm59_vm0, %v6816_v49  ;;  %3753 = vmatmul.mubr.msk.f32.gmra.mrb[154].mxu0 %vm59_vm0, %v6817_v54  ;;  %v5092_v24 = vpop.f32.mrb[49].mxu0  ;;  %v5095_v34 = vmin.f32 %v614_v4, %v6818_v27  ;;  %v6825_v4 = vld [vmem:[#allocation21_spill] sm:$0xff]  ;;  %v6832_v54 = vld [vmem:[#allocation10_spill] sm:$0xff] }
 0x1b8   :  { %2079 = vmatprep.mubr.f32.mxu1 %v6795_v50  ;;  %2684 = vmatprep.mubr.f32.mxu0 %v6795_v50 }
 0x1b9   :  { %6819 = vst [vmem:[#allocation11_spill] sm:$0xff] %v5095_v34  ;;  %v615_v47 = vmin.f32 %v599_v42, %v385_v23  ;;  %v5116_v42 = vpop.trf.xlu0 }
 0x1ba   :  { %v389_v58 = vpop.f32.mrb[26].mxu1  ;;  %v5099_v40 = vpop.f32.mrb[50].mxu0  ;;  %3309 = vperm.xlu1 %4027, %v6820_v52   ;;  %v6829_v52 = vld [vmem:[#allocation15_spill] sm:$0xff] }
 0x1bb   :  { %v600_v33 = vmin.f32 %v6823_v32, %v389_v58  ;;  %v391_v5 = vpop.f32.mrb[27].mxu1  ;;  %3709 = vmatmul.mubr.msk.f32.gmra.mrb[132].mxu1 %vm59_vm0, %v6824_v35  ;;  %3754 = vmatmul.mubr.msk.f32.gmra.mrb[156].mxu0 %vm59_vm0, %v6825_v4  ;;  %v5109_v37 = vpop.f32.mrb[51].mxu0  ;;  %v5112_v36 = vmin.f32 %v615_v47, %v4928_v41  ;;  %v6828_v58 = vld [vmem:[#allocation26_spill] sm:$0xff]  ;;  %v6831_v28 = vmin.f32 %v6829_v52, %v6830_v25  ;;  %v6833_v41 = vld [vmem:[#allocation27_spill] sm:$0xff] }
 0x1bc   :  { %2085 = vmatprep.mubr.f32.mxu1 %v6795_v50  ;;  %2690 = vmatprep.mubr.f32.mxu0 %v6795_v50  ;;  %v6836_v25 = vld [vmem:[#allocation19_spill] sm:$0xff] }
 0x1bd   :  { %6826 = vst [vmem:[#allocation8_spill] sm:$0xff] %v5112_v36  ;;  %v616_v14 = vmin.f32 %v600_v33, %v391_v5 }
 0x1be   :  { %v395_v23 = vpop.f32.mrb[28].mxu1  ;;  %v5118_v27 = vpop.f32.mrb[52].mxu0  ;;  %3315 = vperm.xlu1 %4027, %v6828_v58  }
 0x1bf   :  { %6827 = vst [vmem:[#allocation31_spill] sm:$0xff] %v5118_v27  ;;  %v601_v32 = vmin.f32 %v6831_v28, %v395_v23  ;;  %v397_v4 = vpop.f32.mrb[29].mxu1  ;;  %3710 = vmatmul.mubr.msk.f32.gmra.mrb[134].mxu1 %vm59_vm0, %v6832_v54  ;;  %3755 = vmatmul.mubr.msk.f32.gmra.mrb[158].mxu0 %vm59_vm0, %v6833_v41  ;;  %v5128_v47 = vpop.f32.mrb[53].mxu0  ;;  %v5131_v33 = vmin.f32 %v616_v14, %v4923_v46  ;;  %v6835_v23 = vld [vmem:[#allocation18_spill] sm:$0xff]  ;;  %v6838_v27 = vld [vmem:[#allocation12_spill] sm:$0xff] }
 0x1c0   :  { %2091 = vmatprep.mubr.f32.mxu1 %v6795_v50  ;;  %2696 = vmatprep.mubr.f32.mxu0 %v6795_v50  ;;  %v6837_v28 = vmin.f32 %v6835_v23, %v6836_v25  ;;  %v6841_v25 = vld [vmem:[#allocation22_spill] sm:$0xff] }
 0x1c1   :  { %6834 = vst [vmem:[#allocation20_spill] sm:$0xff] %v5131_v33  ;;  %v617_v5 = vmin.f32 %v601_v32, %v397_v4  ;;  %v5151_v32 = vpop.trf.xlu0 }
 0x1c2   :  { %v401_v58 = vpop.f32.mrb[30].mxu1  ;;  %v5135_v52 = vpop.f32.mrb[54].mxu0 }
 0x1c3   :  { %v602_v36 = vmin.f32 %v6837_v28, %v401_v58  ;;  %v403_v34 = vpop.f32.mrb[31].mxu1  ;;  %3711 = vmatmul.mubr.msk.f32.gmra.mrb[136].mxu1 %vm59_vm0, %v6838_v27  ;;  %3756 = vmatmul.mubr.msk.f32.gmra.mrb[160].mxu0 %vm59_vm0, %v4921_v53  ;;  %v5144_v46 = vpop.f32.mrb[55].mxu0  ;;  %v5147_v14 = vmin.f32 %v617_v5, %v4945_v29  ;;  %v6842_v28 = vld [vmem:[#allocation23_spill] sm:$0xff] }
 0x1c4   :  { %2097 = vmatprep.mubr.f32.mxu1 %v6795_v50  ;;  %2702 = vmatprep.mubr.f32.mxu0 %v6795_v50  ;;  %v6843_v33 = vmin.f32 %v6841_v25, %v6842_v28 }
 0x1c5   :  { %6839 = vst [vmem:[#allocation13_spill] sm:$0xff] %v5147_v14  ;;  %v618_v4 = vmin.f32 %v602_v36, %v403_v34 }
 0x1c6   :  { %v407_v58 = vpop.f32.mrb[32].mxu1  ;;  %v5153_v23 = vpop.f32.mrb[56].mxu0 }
 0x1c7   :  { %6840 = vst [vmem:[#allocation14_spill] sm:$0xff] %v5153_v23  ;;  %v603_v41 = vmin.f32 %v6843_v33, %v407_v58  ;;  %v409_v53 = vpop.f32.mrb[33].mxu1  ;;  %3712 = vmatmul.mubr.msk.f32.gmra.mrb[138].mxu1 %vm59_vm0, %v4790_v2  ;;  %3757 = vmatmul.mubr.msk.f32.gmra.mrb[162].mxu0 %vm59_vm0, %v4958_v7  ;;  %v5162_v29 = vpop.f32.mrb[57].mxu0  ;;  %v5165_v34 = vmin.f32 %v618_v4, %v4940_v62  ;;  %v6847_v33 = vld [vmem:[#allocation24_spill] sm:$0xff]  ;;  %v6848_v58 = vld [vmem:[#allocation25_spill] sm:$0xff] }
 0x1c8   :  { %6844 = vst [vmem:[#allocation9_spill] sm:$0xff] %v5162_v29  ;;  %2103 = vmatprep.mubr.f32.mxu1 %v6795_v50  ;;  %2708 = vmatprep.mubr.f32.mxu0 %v6795_v50  ;;  %v6849_v28 = vmin.f32 %v6847_v33, %v6848_v58  ;;  %v6852_v58 = vld [vmem:[#allocation28_spill] sm:$0xff] }
 0x1c9   :  { %6845 = vst [vmem:[#allocation26_spill] sm:$0xff] %v5165_v34  ;;  %v619_v36 = vmin.f32 %v603_v41, %v409_v53  ;;  %v5185_v41 = vpop.trf.xlu0 }
 0x1ca   :  { %v413_v5 = vpop.f32.mrb[34].mxu1  ;;  %v5169_v25 = vpop.f32.mrb[58].mxu0 }
 0x1cb   :  { %6846 = vst [vmem:[#allocation15_spill] sm:$0xff] %v5169_v25  ;;  %v604_v14 = vmin.f32 %v6849_v28, %v413_v5  ;;  %v415_v23 = vpop.f32.mrb[35].mxu1  ;;  %3713 = vmatmul.mubr.msk.f32.gmra.mrb[140].mxu1 %vm59_vm0, %v4828_v20  ;;  %3758 = vmatmul.mubr.msk.f32.gmra.mrb[164].mxu0 %vm59_vm0, %v4998_v18  ;;  %v5178_v62 = vpop.f32.mrb[59].mxu0  ;;  %v5181_v4 = vmin.f32 %v619_v36, %v4966_v56  ;;  %v6853_v28 = vld [vmem:[#allocation29_spill] sm:$0xff] }
 0x1cc   :  { %2109 = vmatprep.mubr.f32.mxu1 %v6795_v50  ;;  %2714 = vmatprep.mubr.f32.mxu0 %v6795_v50  ;;  %v6854_v34 = vmin.f32 %v6852_v58, %v6853_v28 }
 0x1cd   :  { %6850 = vst [vmem:[#allocation16_spill] sm:$0xff] %v5181_v4  ;;  %v620_v53 = vmin.f32 %v604_v14, %v415_v23 }
 0x1ce   :  { %v419_v5 = vpop.f32.mrb[36].mxu1  ;;  %v5187_v33 = vpop.f32.mrb[60].mxu0 }
 0x1cf   :  { %6851 = vst [vmem:[#allocation10_spill] sm:$0xff] %v5187_v33  ;;  %v605_v25 = vmin.f32 %v6854_v34, %v419_v5  ;;  %v421_v29 = vpop.f32.mrb[37].mxu1  ;;  %3714 = vmatmul.mubr.msk.f32.gmra.mrb[142].mxu1 %vm59_vm0, %v4876_v51  ;;  %3759 = vmatmul.mubr.msk.f32.gmra.mrb[166].mxu0 %vm59_vm0, %v5039_v26  ;;  %v5196_v56 = vpop.f32.mrb[61].mxu0  ;;  %v5199_v14 = vmin.f32 %v620_v53, %v4960_v3  ;;  %v6856_v34 = vld [vmem:[#allocation30_spill] sm:$0xff]  ;;  %v6857_v5 = vld [vmem:[#allocation32_spill] sm:$0xff] }
 0x1d0   :  { %2115 = vmatprep.mubr.f32.mxu1 %v6795_v50  ;;  %2720 = vmatprep.mubr.f32.mxu0 %v6795_v50  ;;  %v6858_v28 = vmin.f32 %v6856_v34, %v6857_v5 }
 0x1d1   :  { %6855 = vst [vmem:[#allocation18_spill] sm:$0xff] %v5199_v14  ;;  %v621_v23 = vmin.f32 %v605_v25, %v421_v29  ;;  %v5219_v25 = vpop.trf.xlu0 }
 0x1d2   :  { %v425_v36 = vpop.f32.mrb[38].mxu1  ;;  %v5203_v58 = vpop.f32.mrb[62].mxu0 }
 0x1d3   :  { %v606_v4 = vmin.f32 %v6858_v28, %v425_v36  ;;  %v427_v33 = vpop.f32.mrb[39].mxu1  ;;  %3715 = vmatmul.mubr.msk.f32.gmra.mrb[144].mxu1 %vm59_vm0, %v4919_v30  ;;  %3760 = vmatmul.mubr.msk.f32.gmra.mrb[168].mxu0 %vm59_vm0, %v5077_v38  ;;  %v5212_v3 = vpop.f32.mrb[63].mxu0  ;;  %v5215_v53 = vmin.f32 %v621_v23, %v4984_v55 }
 0x1d4   :  { %2121 = vmatprep.mubr.f32.mxu1 %v6795_v50  ;;  %2726 = vmatprep.mubr.f32.mxu0 %v6795_v50 }
 0x1d5   :  { %6859 = vst [vmem:[#allocation19_spill] sm:$0xff] %v5215_v53  ;;  %v622_v29 = vmin.f32 %v606_v4, %v427_v33 }
 0x1d6   :  { %v787_v36 = vpop.f32.mrb[40].mxu1  ;;  %v5221_v34 = vpop.f32.mrb[64].mxu0 }
 0x1d7   :  { %v1188_v5 = vmin.f32 %v4952_v22, %v787_v36  ;;  %v789_v28 = vpop.f32.mrb[41].mxu1  ;;  %3716 = vmatmul.mubr.msk.f32.gmra.mrb[146].mxu1 %vm59_vm0, %v4956_v43  ;;  %3761 = vmatmul.mubr.msk.f32.gmra.mrb[170].mxu0 %vm59_vm0, %v5116_v42  ;;  %v5228_v55 = vpop.f32.mrb[65].mxu0  ;;  %v5231_v23 = vmin.f32 %v622_v29, %v4978_v13 }
 0x1d8   :  { %2127 = vmatprep.mubr.f32.mxu1 %v6795_v50  ;;  %2732 = vmatprep.mubr.f32.mxu0 %v6795_v50 }
 0x1d9   :  { %6860 = vst [vmem:[#allocation12_spill] sm:$0xff] %v5231_v23  ;;  %v1204_v4 = vmin.f32 %v1188_v5, %v789_v28  ;;  %v5247_v5 = vpop.trf.xlu0 }
 0x1da   :  { %v793_v33 = vpop.f32.mrb[42].mxu1  ;;  %v5235_v53 = vpop.f32.mrb[66].mxu0 }
 0x1db   :  { %v1220_v22 = vmin.f32 %v1204_v4, %v5001_v0  ;;  %v1189_v36 = vmin.f32 %v4973_v39, %v793_v33  ;;  %v795_v14 = vpop.f32.mrb[43].mxu1  ;;  %3717 = vmatmul.mubr.msk.f32.gmra.mrb[148].mxu1 %vm59_vm0, %v4996_v17  ;;  %3762 = vmatmul.mubr.msk.f32.gmra.mrb[172].mxu0 %vm59_vm0, %v5151_v32  ;;  %v5243_v13 = vpop.f32.mrb[67].mxu0 }
 0x1dc   :  { %2133 = vmatprep.mubr.f32.mxu1 %v6795_v50  ;;  %2738 = vmatprep.mubr.f32.mxu0 %v6795_v50 }
 0x1dd   :  { %v1205_v29 = vmin.f32 %v1189_v36, %v795_v14  ;;  %v5250_v0 = vmin.f32 %v1220_v22, %v5012_v57 }
 0x1de   :  { %v799_v39 = vpop.f32.mrb[44].mxu1  ;;  %v5252_v28 = vpop.f32.mrb[68].mxu0 }
 0x1df   :  { %v1221_v4 = vmin.f32 %v1205_v29, %v5019_v21  ;;  %v1190_v33 = vmin.f32 %v4991_v10, %v799_v39  ;;  %v801_v23 = vpop.f32.mrb[45].mxu1  ;;  %3718 = vmatmul.mubr.msk.f32.gmra.mrb[150].mxu1 %vm59_vm0, %v5035_v12  ;;  %3763 = vmatmul.mubr.msk.f32.gmra.mrb[174].mxu0 %vm59_vm0, %v5185_v41  ;;  %v5260_v14 = vpop.f32.mrb[69].mxu0 }
 0x1e0   :  { %3965 = vmatprep.mubr.msk.f32.mxu1 %vm59_vm0, %v4552_v59  ;;  %2744 = vmatprep.mubr.f32.mxu0 %v6795_v50 }
 0x1e1   :  { %v1206_v57 = vmin.f32 %v1190_v33, %v801_v23  ;;  %v5266_v22 = vmin.f32 %v1221_v4, %v5030_v1  ;;  %v4030_v1 = vld [vmem:[%s6728_s1 + $0x10] sm:$0xff] }
 0x1e2   :  { %v805_v21 = vpop.f32.mrb[46].mxu1  ;;  %v5268_v10 = vpop.f32.mrb[70].mxu0 }
 0x1e3   :  { %v1222_v36 = vmin.f32 %v1206_v57, %v5041_v48  ;;  %v1191_v29 = vmin.f32 %v5015_v6, %v805_v21  ;;  %v807_v39 = vpop.f32.mrb[47].mxu1  ;;  %3966 = vmatmul.mubr.msk.f32.vlgmr.msra.gmra.mrb[152].mxu1 %vm59_vm0, %v4561_v60  ;;  %3764 = vmatmul.mubr.msk.f32.gmra.mrb[176].mxu0 %vm59_vm0, %v5219_v25  ;;  %v5276_v59 = vpop.f32.mrb[71].mxu0 }
 0x1e4   :  { %2770 = vmatpush1.msra.mxu1 %v4030_v1  ;;  %3968 = vmatprep.mubr.msk.f32.mxu1 %vm59_vm0, %v4579_v61  ;;  %v5284_v6 = vpop.trf.xlu0 }
 0x1e5   :  { %v1207_v48 = vmin.f32 %v1191_v29, %v807_v39  ;;  %2750 = vmatprep.mubr.f32.mxu0 %v6795_v50  ;;  %v5287_v60 = vmin.f32 %v1222_v36, %v5052_v63 }
 0x1e6   :  { %v811_v23 = vpop.f32.mrb[48].mxu1  ;;  %v5289_v4 = vpop.f32.mrb[72].mxu0 }
 0x1e7   :  { %v1223_v33 = vmin.f32 %v1207_v48, %v5059_v31  ;;  %v1192_v57 = vmin.f32 %v5033_v19, %v811_v23  ;;  %v813_v21 = vpop.f32.mrb[49].mxu1  ;;  %3969 = vmatmul.mubr.msk.f32.gmra.mrb[154].mxu1 %vm59_vm0, %v4604_v8  ;;  %3765 = vmatmul.mubr.msk.f32.gmra.mrb[178].mxu0 %vm59_vm0, %v5247_v5  ;;  %v5297_v61 = vpop.f32.mrb[73].mxu0 }
 0x1e8   :  { %3971 = vmatprep.mubr.msk.f32.mxu1 %vm59_vm0, %v4643_v16  ;;  %2756 = vmatprep.mubr.f32.mxu0 %v6795_v50 }
 0x1e9   :  { %v1208_v63 = vmin.f32 %v1192_v57, %v813_v21  ;;  %v5303_v36 = vmin.f32 %v1223_v33, %v5070_v45  ;;  %v5317_v45 = vpop.trf.xlu0  ;;  %v6862_v21 = vld [vmem:[#allocation31_spill] sm:$0xff] }
 0x1ea   :  { %v817_v31 = vpop.f32.mrb[50].mxu1  ;;  %v5305_v19 = vpop.f32.mrb[74].mxu0  ;;  %6861 = vst [vmem:[#allocation22_spill] sm:$0xff] %v5317_v45 }
 0x1eb   :  { %v1224_v29 = vmin.f32 %v1208_v63, %v5082_v9  ;;  %v1193_v8 = vmin.f32 %v5055_v11, %v817_v31  ;;  %v819_v39 = vpop.f32.mrb[51].mxu1  ;;  %3972 = vmatmul.mubr.msk.f32.gmra.mrb[156].mxu1 %vm59_vm0, %v6816_v49  ;;  %3766 = vmatmul.mubr.msk.f32.gmra.mrb[180].mxu0 %vm59_vm0, %v5284_v6  ;;  %v5313_v16 = vpop.f32.mrb[75].mxu0  ;;  %v6863_v63 = vld [vmem:[#allocation11_spill] sm:$0xff] }
 0x1ec   :  { %3974 = vmatprep.mubr.msk.f32.mxu1 %vm59_vm0, %v6824_v35  ;;  %2762 = vmatprep.mubr.f32.mxu0 %v6795_v50 }
 0x1ed   :  { %v1209_v1 = vmin.f32 %v1193_v8, %v819_v39  ;;  %v5321_v9 = vmin.f32 %v1224_v29, %v5092_v24  ;;  %v6864_v8 = vld [vmem:[#allocation17_spill] sm:$0xff] }
 0x1ee   :  { %v823_v11 = vpop.f32.mrb[52].mxu1  ;;  %v5323_v48 = vpop.f32.mrb[76].mxu0 }
 0x1ef   :  { %v1225_v49 = vmin.f32 %v1209_v1, %v5099_v40  ;;  %v1194_v23 = vmin.f32 %v5073_v15, %v823_v11  ;;  %v825_v33 = vpop.f32.mrb[53].mxu1  ;;  %3975 = vmatmul.mubr.msk.f32.gmra.mrb[158].mxu1 %vm59_vm0, %v6832_v54  ;;  %3767 = vmatmul.mubr.msk.f32.gmra.mrb[182].mxu0 %vm59_vm0, %v5317_v45  ;;  %v5331_v35 = vpop.f32.mrb[77].mxu0 }
 0x1f0   :  { %3977 = vmatprep.mubr.msk.f32.mxu1 %vm59_vm0, %v6838_v27  ;;  %3991 = vmatprep.mubr.msk.f32.mxu0 %vm59_vm0, %v4768_v44 }
 0x1f1   :  { %v1210_v24 = vmin.f32 %v1194_v23, %v825_v33  ;;  %v5338_v40 = vmin.f32 %v1225_v49, %v5109_v37  ;;  %v6865_v37 = vld [vmem:[#allocation21_spill] sm:$0xff]  ;;  %v6866_v23 = vld [vmem:[#allocation8_spill] sm:$0xff] }
 0x1f2   :  { %v829_v15 = vpop.f32.mrb[54].mxu1  ;;  %v5340_v57 = vpop.f32.mrb[78].mxu0 }
 0x1f3   :  { %v1226_v54 = vmin.f32 %v1210_v24, %v6862_v21  ;;  %v1195_v31 = vmin.f32 %v6863_v63, %v829_v15  ;;  %v831_v29 = vpop.f32.mrb[55].mxu1  ;;  %3978 = vmatmul.mubr.msk.f32.gmra.mrb[160].mxu1 %vm59_vm0, %v4790_v2  ;;  %3992 = vmatmul.mubr.msk.f32.vlgmr.msra.gmra.mrb[184].mxu0 %vm59_vm0, %v6864_v8  ;;  %v5348_v27 = vpop.f32.mrb[79].mxu0  ;;  %v6867_v15 = vld [vmem:[#allocation27_spill] sm:$0xff] }
 0x1f4   :  { %3980 = vmatprep.mubr.msk.f32.mxu1 %vm59_vm0, %v4828_v20  ;;  %3994 = vmatprep.mubr.msk.f32.mxu0 %vm59_vm0, %v6865_v37 }
 0x1f5   :  { %v1211_v39 = vmin.f32 %v1195_v31, %v831_v29  ;;  %v5355_v1 = vmin.f32 %v1226_v54, %v5128_v47  ;;  %v6868_v47 = vld [vmem:[#allocation33_spill] sm:$0xff]  ;;  %v6869_v31 = vld [vmem:[#allocation14_spill] sm:$0xff]  ;;  %v6870_v29 = vld [vmem:[#allocation20_spill] sm:$0xff] }
 0x1f6   :  { %v835_v11 = vpop.f32.mrb[56].mxu1  ;;  %v5357_v49 = vpop.f32.mrb[80].mxu0 }
 0x1f7   :  { %v1227_v2 = vmin.f32 %v1211_v39, %v5135_v52  ;;  %v1196_v33 = vmin.f32 %v6866_v23, %v835_v11  ;;  %v837_v24 = vpop.f32.mrb[57].mxu1  ;;  %3981 = vmatmul.mubr.msk.f32.gmra.mrb[162].mxu1 %vm59_vm0, %v4876_v51  ;;  %3995 = vmatmul.mubr.msk.f32.gmra.mrb[186].mxu0 %vm59_vm0, %v6867_v15  ;;  %v5365_v20 = vpop.f32.mrb[81].mxu0 }
 0x1f8   :  { %3983 = vmatprep.mubr.msk.f32.mxu1 %vm59_vm0, %v4919_v30  ;;  %3997 = vmatprep.mubr.msk.f32.mxu0 %vm59_vm0, %v6868_v47 }
 0x1f9   :  { %v1212_v21 = vmin.f32 %v1196_v33, %v837_v24  ;;  %v5372_v52 = vmin.f32 %v1227_v2, %v5144_v46  ;;  %v6871_v2 = vld [vmem:[#allocation9_spill] sm:$0xff] }
 0x1fa   :  { %v841_v54 = vpop.f32.mrb[58].mxu1  ;;  %v5374_v63 = vpop.f32.mrb[82].mxu0 }
 0x1fb   :  { %v1228_v51 = vmin.f32 %v1212_v21, %v6869_v31  ;;  %v1197_v39 = vmin.f32 %v6870_v29, %v841_v54  ;;  %v843_v11 = vpop.f32.mrb[59].mxu1  ;;  %3984 = vmatmul.mubr.msk.f32.gmra.mrb[164].mxu1 %vm59_vm0, %v4956_v43  ;;  %3998 = vmatmul.mubr.msk.f32.gmra.mrb[188].mxu0 %vm59_vm0, %v4958_v7  ;;  %v5382_v30 = vpop.f32.mrb[83].mxu0  ;;  %v6872_v21 = vld [vmem:[#allocation15_spill] sm:$0xff]  ;;  %v6873_v54 = vld [vmem:[#allocation13_spill] sm:$0xff] }
 0x1fc   :  { %3986 = vmatprep.mubr.msk.f32.mxu1 %vm59_vm0, %v4996_v17  ;;  %4000 = vmatprep.mubr.msk.f32.mxu0 %vm59_vm0, %v4998_v18 }
 0x1fd   :  { %v1213_v46 = vmin.f32 %v1197_v39, %v843_v11  ;;  %v5389_v23 = vmin.f32 %v1228_v51, %v6871_v2  ;;  %v6875_v2 = vld [vmem:[#allocation10_spill] sm:$0xff] }
 0x1fe   :  { %v847_v33 = vpop.f32.mrb[60].mxu1  ;;  %v5391_v24 = vpop.f32.mrb[84].mxu0 }
 0x1ff   :  { %v1229_v43 = vmin.f32 %v1213_v46, %v6872_v21  ;;  %v1198_v31 = vmin.f32 %v6873_v54, %v847_v33  ;;  %v849_v29 = vpop.f32.mrb[61].mxu1  ;;  %3987 = vmatmul.mubr.msk.f32.gmra.mrb[166].mxu1 %vm59_vm0, %v5035_v12  ;;  %4001 = vmatmul.mubr.msk.f32.gmra.mrb[190].mxu0 %vm59_vm0, %v5039_v26  ;;  %v5399_v17 = vpop.f32.mrb[85].mxu0  ;;  %v6876_v12 = vld [vmem:[#allocation26_spill] sm:$0xff] }
 0x200   :  { %6874 = vst [vmem:[#allocation23_spill] sm:$0xff] %v5399_v17  ;;  %2833 = vmatprep.mubr.f32.mxu1 %v6795_v50  ;;  %4003 = vmatprep.mubr.msk.f32.mxu0 %vm59_vm0, %v5077_v38 }
 0x201   :  { %v1214_v51 = vmin.f32 %v1198_v31, %v849_v29  ;;  %v5405_v39 = vmin.f32 %v1229_v43, %v5178_v62 }
 0x202   :  { %v853_v11 = vpop.f32.mrb[62].mxu1  ;;  %v5407_v46 = vpop.f32.mrb[86].mxu0 }
 0x203   :  { %v1230_v33 = vmin.f32 %v1214_v51, %v6875_v2  ;;  %v1199_v21 = vmin.f32 %v6876_v12, %v853_v11  ;;  %v855_v54 = vpop.f32.mrb[63].mxu1  ;;  %3768 = vmatmul.mubr.msk.f32.vlgmr.msra.gmra.mrb[168].mxu1 %vm59_vm0, %v4768_v44  ;;  %4004 = vmatmul.mubr.msk.f32.gmra.mrb[192].mxu0 %vm59_vm0, %v5116_v42  ;;  %v5415_v17 = vpop.f32.mrb[87].mxu0  ;;  %v6877_v44 = vld [vmem:[#allocation16_spill] sm:$0xff] }
 0x204   :  { %2839 = vmatprep.mubr.f32.mxu1 %v6795_v50  ;;  %4006 = vmatprep.mubr.msk.f32.mxu0 %vm59_vm0, %v5151_v32 }
 0x205   :  { %v1215_v62 = vmin.f32 %v1199_v21, %v855_v54  ;;  %v5421_v43 = vmin.f32 %v1230_v33, %v5196_v56 }
 0x206   :  { %v859_v31 = vpop.f32.mrb[64].mxu1  ;;  %v5423_v29 = vpop.f32.mrb[88].mxu0 }
 0x207   :  { %v1231_v51 = vmin.f32 %v1215_v62, %v5203_v58  ;;  %v1200_v11 = vmin.f32 %v6877_v44, %v859_v31  ;;  %v861_v2 = vpop.f32.mrb[65].mxu1  ;;  %3769 = vmatmul.mubr.msk.f32.gmra.mrb[170].mxu1 %vm59_vm0, %v6864_v8  ;;  %4007 = vmatmul.mubr.msk.f32.gmra.mrb[194].mxu0 %vm59_vm0, %v5185_v41  ;;  %v5431_v12 = vpop.f32.mrb[89].mxu0  ;;  %v6878_v8 = vld [vmem:[#allocation18_spill] sm:$0xff] }
 0x208   :  { %2845 = vmatprep.mubr.f32.mxu1 %v6795_v50  ;;  %4009 = vmatprep.mubr.msk.f32.mxu0 %vm59_vm0, %v5219_v25 }
 0x209   :  { %v1216_v56 = vmin.f32 %v1200_v11, %v861_v2  ;;  %v5437_v33 = vmin.f32 %v1231_v51, %v5212_v3 }
 0x20a   :  { %v865_v58 = vpop.f32.mrb[66].mxu1  ;;  %v5439_v21 = vpop.f32.mrb[90].mxu0 }
 0x20b   :  { %v1232_v54 = vmin.f32 %v1216_v56, %v5221_v34  ;;  %v1201_v62 = vmin.f32 %v6878_v8, %v865_v58  ;;  %v867_v31 = vpop.f32.mrb[67].mxu1  ;;  %3770 = vmatmul.mubr.msk.f32.gmra.mrb[172].mxu1 %vm59_vm0, %v6865_v37  ;;  %v5445_v44 = vpop.f32.mrb[91].mxu0  ;;  %4010 = vmatmul.mubr.msk.f32.gmra.mrb[196].mxu0 %vm59_vm0, %v5247_v5  ;;  %v6879_v37 = vld [vmem:[#allocation19_spill] sm:$0xff] }
 0x20c   :  { %2851 = vmatprep.mubr.f32.mxu1 %v6795_v50  ;;  %4012 = vmatprep.mubr.msk.f32.mxu0 %vm59_vm0, %v5284_v6 }
 0x20d   :  { %v1217_v3 = vmin.f32 %v1201_v62, %v867_v31  ;;  %v5453_v51 = vmin.f32 %v1232_v54, %v5228_v55 }
 0x20e   :  { %v871_v34 = vpop.f32.mrb[68].mxu1  ;;  %v5455_v11 = vpop.f32.mrb[92].mxu0 }
 0x20f   :  { %v1233_v2 = vmin.f32 %v1217_v3, %v5235_v53  ;;  %v1202_v56 = vmin.f32 %v6879_v37, %v871_v34  ;;  %v873_v58 = vpop.f32.mrb[69].mxu1  ;;  %3771 = vmatmul.mubr.msk.f32.gmra.mrb[174].mxu1 %vm59_vm0, %v6867_v15  ;;  %v5461_v8 = vpop.f32.mrb[93].mxu0  ;;  %4013 = vmatmul.mubr.msk.f32.gmra.mrb[198].mxu0 %vm59_vm0, %v5317_v45  ;;  %v6880_v3 = vld [vmem:[#allocation12_spill] sm:$0xff] }
 0x210   :  { %2857 = vmatprep.mubr.f32.mxu1 %v6795_v50 }
 0x211   :  { %v1218_v55 = vmin.f32 %v1202_v56, %v873_v58  ;;  %v5467_v54 = vmin.f32 %v1233_v2, %v5243_v13 }
 0x212   :  { %v877_v62 = vpop.f32.mrb[70].mxu1  ;;  %v5469_v31 = vpop.f32.mrb[94].mxu0 }
 0x213   :  { %v1234_v53 = vmin.f32 %v1218_v55, %v5252_v28  ;;  %v1203_v34 = vmin.f32 %v6880_v3, %v877_v62  ;;  %v879_v37 = vpop.f32.mrb[71].mxu1  ;;  %3772 = vmatmul.mubr.msk.f32.gmra.mrb[176].mxu1 %vm59_vm0, %v6868_v47  ;;  %v5475_v15 = vpop.f32.mrb[95].mxu0 }
 0x214   :  { %2863 = vmatprep.mubr.f32.mxu1 %v6795_v50 }
 0x215   :  { %v1219_v45 = vmin.f32 %v1203_v34, %v879_v37  ;;  %v5479_v56 = vmin.f32 %v1234_v53, %v5260_v14 }
 0x216   :  { %v3915_v13 = vpop.f32.mrb[72].mxu1  ;;  %v5481_v2 = vpop.f32.mrb[96].mxu0 }
 0x217   :  { %v1235_v58 = vmin.f32 %v1219_v45, %v5268_v10  ;;  %v1253_v28 = vmin.f32 %v5266_v22, %v3915_v13  ;;  %v1109_v55 = vpop.f32.mrb[73].mxu1  ;;  %3773 = vmatmul.mubr.msk.f32.gmra.mrb[178].mxu1 %vm59_vm0, %v4958_v7  ;;  %v5487_v47 = vpop.f32.mrb[97].mxu0 }
 0x218   :  { %v1252_v62 = vmin.f32 %v5250_v0, %v1109_v55  ;;  %2869 = vmatprep.mubr.f32.mxu1 %v6795_v50 }
 0x219   :  { %v5492_v14 = vmin.f32 %v1253_v28, %v5305_v19  ;;  %v5495_v53 = vmin.f32 %v1235_v58, %v5276_v59 }
 0x21a   :  { %v5498_v10 = vmin.f32 %v1252_v62, %v5289_v4  ;;  %v3918_v22 = vpop.f32.mrb[74].mxu1  ;;  %v5500_v45 = vpop.f32.mrb[98].mxu0 }
 0x21b   :  { %v1255_v7 = vmin.f32 %v5303_v36, %v3918_v22  ;;  %v1119_v3 = vpop.f32.mrb[75].mxu1  ;;  %3774 = vmatmul.mubr.msk.f32.gmra.mrb[180].mxu1 %vm59_vm0, %v4998_v18  ;;  %v5505_v0 = vpop.f32.mrb[99].mxu0  ;;  %v1834_v19 = vmin.f32 %v5492_v14, %v5313_v16  ;;  %v6882_v14 = vld [vmem:[#allocation22_spill] sm:$0xff] }
 0x21c   :  { %v1254_v59 = vmin.f32 %v5287_v60, %v1119_v3  ;;  %2875 = vmatprep.mubr.f32.mxu1 %v6795_v50  ;;  %v1833_v4 = vmin.f32 %v5498_v10, %v5297_v61 }
 0x21d   :  { %v5514_v34 = vmin.f32 %v1255_v7, %v5340_v57 }
 0x21e   :  { %v5517_v36 = vmin.f32 %v1254_v59, %v5323_v48  ;;  %v3921_v37 = vpop.f32.mrb[76].mxu1  ;;  %v5519_v18 = vpop.f32.mrb[100].mxu0 }
 0x21f   :  { %v1257_v13 = vmin.f32 %v5338_v40, %v3921_v37  ;;  %v1129_v58 = vpop.f32.mrb[77].mxu1  ;;  %3775 = vmatmul.mubr.msk.f32.gmra.mrb[182].mxu1 %vm59_vm0, %v5039_v26  ;;  %v5524_v60 = vpop.f32.mrb[101].mxu0  ;;  %v1836_v28 = vmin.f32 %v5514_v34, %v5348_v27 }
 0x220   :  { %v1256_v57 = vmin.f32 %v5321_v9, %v1129_v58  ;;  %2881 = vmatprep.mubr.f32.mxu1 %v6795_v50  ;;  %v1835_v48 = vmin.f32 %v5517_v36, %v5331_v35 }
 0x221   :  { %v5533_v55 = vmin.f32 %v1257_v13, %v5374_v63 }
 0x222   :  { %v5536_v40 = vmin.f32 %v1256_v57, %v5357_v49  ;;  %v3924_v62 = vpop.f32.mrb[78].mxu1  ;;  %v1506_v26 = vpop.f32.mrb[102].mxu0 }
 0x223   :  { %v1259_v22 = vmin.f32 %v5372_v52, %v3924_v62  ;;  %v1139_v7 = vpop.f32.mrb[79].mxu1  ;;  %3776 = vmatmul.mubr.msk.f32.gmra.mrb[184].mxu1 %vm59_vm0, %v5077_v38  ;;  %v5541_v9 = vpop.f32.mrb[103].mxu0  ;;  %v1838_v3 = vmin.f32 %v5533_v55, %v5382_v30 }
 0x224   :  { %v1258_v59 = vmin.f32 %v5355_v1, %v1139_v7  ;;  %2887 = vmatprep.mubr.f32.mxu1 %v6795_v50  ;;  %v1837_v49 = vmin.f32 %v5536_v40, %v5365_v20 }
 0x225   :  { %v5550_v63 = vmin.f32 %v1259_v22, %v5407_v46  ;;  %v6881_v46 = vld [vmem:[#allocation23_spill] sm:$0xff] }
 0x226   :  { %v5553_v52 = vmin.f32 %v1258_v59, %v5391_v24  ;;  %v3927_v37 = vpop.f32.mrb[80].mxu1  ;;  %v5555_v38 = vpop.f32.mrb[104].mxu0 }
 0x227   :  { %v1261_v13 = vmin.f32 %v5405_v39, %v3927_v37  ;;  %v1149_v58 = vpop.f32.mrb[81].mxu1  ;;  %v1738_v57 = vpop.f32.mrb[105].mxu0  ;;  %3777 = vmatmul.mubr.msk.f32.gmra.mrb[186].mxu1 %vm59_vm0, %v5116_v42 }
 0x228   :  { %v1260_v62 = vmin.f32 %v5389_v23, %v1149_v58  ;;  %2893 = vmatprep.mubr.f32.mxu1 %v6795_v50  ;;  %v1839_v24 = vmin.f32 %v5553_v52, %v6881_v46 }
 0x229   :  { %v5567_v22 = vmin.f32 %v1261_v13, %v5439_v21 }
 0x22a   :  { %v5570_v39 = vmin.f32 %v1260_v62, %v5423_v29  ;;  %v3930_v7 = vpop.f32.mrb[82].mxu1  ;;  %v5572_v59 = vpop.f32.mrb[106].mxu0 }
 0x22b   :  { %v1263_v42 = vmin.f32 %v5437_v33, %v3930_v7  ;;  %v1159_v37 = vpop.f32.mrb[83].mxu1  ;;  %v5575_v1 = vpop.f32.mrb[107].mxu0  ;;  %3778 = vmatmul.mubr.msk.f32.gmra.mrb[188].mxu1 %vm59_vm0, %v5151_v32 }
 0x22c   :  { %v1262_v21 = vmin.f32 %v5421_v43, %v1159_v37  ;;  %2899 = vmatprep.mubr.f32.mxu1 %v6795_v50  ;;  %v1841_v29 = vmin.f32 %v5570_v39, %v5431_v12 }
 0x22d   :  { %v5586_v13 = vmin.f32 %v1263_v42, %v5469_v31 }
 0x22e   :  { %v5589_v33 = vmin.f32 %v1262_v21, %v5455_v11  ;;  %v3933_v58 = vpop.f32.mrb[84].mxu1  ;;  %v5591_v62 = vpop.f32.mrb[108].mxu0 }
 0x22f   :  { %v1265_v32 = vmin.f32 %v5467_v54, %v3933_v58  ;;  %v1169_v7 = vpop.f32.mrb[85].mxu1  ;;  %v5594_v23 = vpop.f32.mrb[109].mxu0  ;;  %3779 = vmatmul.mubr.msk.f32.gmra.mrb[190].mxu1 %vm59_vm0, %v5185_v41  ;;  %v1844_v43 = vmin.f32 %v5586_v13, %v5475_v15 }
 0x230   :  { %v1264_v31 = vmin.f32 %v5453_v51, %v1169_v7  ;;  %2905 = vmatprep.mubr.f32.mxu1 %v6795_v50  ;;  %v1843_v11 = vmin.f32 %v5589_v33, %v5461_v8 }
 0x231   :  { %v5605_v42 = vmin.f32 %v1265_v32, %v5500_v45 }
 0x232   :  { %v5608_v54 = vmin.f32 %v1264_v31, %v5481_v2  ;;  %v3936_v37 = vpop.f32.mrb[86].mxu1  ;;  %v5610_v21 = vpop.f32.mrb[110].mxu0 }
 0x233   :  { %v1267_v41 = vmin.f32 %v5495_v53, %v3936_v37  ;;  %v1179_v58 = vpop.f32.mrb[87].mxu1  ;;  %3780 = vmatmul.mubr.msk.f32.gmra.mrb[192].mxu1 %vm59_vm0, %v5219_v25  ;;  %v5615_v51 = vpop.f32.mrb[111].mxu0 }
 0x234   :  { %v1266_v45 = vmin.f32 %v5479_v56, %v1179_v58  ;;  %2911 = vmatprep.mubr.f32.mxu1 %v6795_v50  ;;  %v1845_v2 = vmin.f32 %v5608_v54, %v5487_v47 }
 0x235   :  { %v5623_v32 = vmin.f32 %v1267_v41, %v1506_v26 }
 0x236   :  { %v5626_v53 = vmin.f32 %v1266_v45, %v5519_v18  ;;  %v1577_v31 = vpop.f32.mrb[88].mxu1  ;;  %v5628_v37 = vpop.f32.mrb[112].mxu0 }
 0x237   :  { %v1849_v25 = vmin.f32 %v1833_v4, %v1577_v31  ;;  %v1579_v7 = vpop.f32.mrb[89].mxu1  ;;  %3781 = vmatmul.mubr.msk.f32.gmra.mrb[194].mxu1 %vm59_vm0, %v5247_v5  ;;  %v5635_v56 = vpop.f32.mrb[113].mxu0 }
 0x238   :  { %2917 = vmatprep.mubr.f32.mxu1 %v6795_v50  ;;  %v1847_v18 = vmin.f32 %v5626_v53, %v5524_v60 }
 0x239   :  { %v1865_v41 = vmin.f32 %v1849_v25, %v1579_v7 }
 0x23a   :  { %v1583_v58 = vpop.f32.mrb[90].mxu1  ;;  %v5642_v45 = vpop.f32.mrb[114].mxu0 }
 0x23b   :  { %v1850_v61 = vmin.f32 %v1834_v19, %v1583_v58  ;;  %v1585_v10 = vpop.f32.mrb[91].mxu1  ;;  %3782 = vmatmul.mubr.msk.f32.gmra.mrb[196].mxu1 %vm59_vm0, %v5284_v6  ;;  %v5649_v5 = vpop.f32.mrb[115].mxu0  ;;  %v5651_v4 = vmin.f32 %v1865_v41, %v1738_v57 }
 0x23c   :  { %2923 = vmatprep.mubr.f32.mxu1 %v6795_v50 }
 0x23d   :  { %v1866_v31 = vmin.f32 %v1850_v61, %v1585_v10 }
 0x23e   :  { %v1589_v26 = vpop.f32.mrb[92].mxu1  ;;  %v5654_v7 = vpop.f32.mrb[116].mxu0 }
 0x23f   :  { %v1851_v25 = vmin.f32 %v1835_v48, %v1589_v26  ;;  %v1591_v16 = vpop.f32.mrb[93].mxu1  ;;  %3783 = vmatmul.mubr.msk.f32.gmra.mrb[198].mxu1 %vm59_vm0, %v6882_v14  ;;  %v5661_v19 = vpop.f32.mrb[117].mxu0  ;;  %v5664_v6 = vmin.f32 %v1866_v31, %v5555_v38 }
 0x241   :  { %v1867_v57 = vmin.f32 %v1851_v25, %v1591_v16 }
 0x242   :  { %v1595_v41 = vpop.f32.mrb[94].mxu1  ;;  %v5666_v50 = vpop.f32.mrb[118].mxu0 }
 0x243   :  { %v1852_v58 = vmin.f32 %v1836_v28, %v1595_v41  ;;  %v1597_v61 = vpop.f32.mrb[95].mxu1  ;;  %v5671_v35 = vpop.f32.mrb[119].mxu0  ;;  %v5674_v36 = vmin.f32 %v1867_v57, %v5575_v1 }
 0x245   :  { %v1868_v48 = vmin.f32 %v1852_v58, %v1597_v61 }
 0x246   :  { %v1601_v26 = vpop.f32.mrb[96].mxu1  ;;  %v5676_v10 = vpop.f32.mrb[120].mxu0 }
 0x247   :  { %v1853_v38 = vmin.f32 %v1837_v49, %v1601_v26  ;;  %v1603_v31 = vpop.f32.mrb[97].mxu1  ;;  %v5681_v25 = vpop.f32.mrb[121].mxu0  ;;  %v5684_v27 = vmin.f32 %v1868_v48, %v5572_v59 }
 0x249   :  { %v1869_v34 = vmin.f32 %v1853_v38, %v1603_v31 }
 0x24a   :  { %v1607_v28 = vpop.f32.mrb[98].mxu1  ;;  %v5686_v16 = vpop.f32.mrb[122].mxu0 }
 0x24b   :  { %v1854_v1 = vmin.f32 %v1838_v3, %v1607_v28  ;;  %v1609_v14 = vpop.f32.mrb[99].mxu1  ;;  %v5691_v57 = vpop.f32.mrb[123].mxu0  ;;  %v5694_v20 = vmin.f32 %v1869_v34, %v5594_v23  ;;  %v6883_v23 = vmin.f32 %v5550_v63, %v5415_v17 }
 0x24d   :  { %v1870_v40 = vmin.f32 %v1854_v1, %v1609_v14 }
 0x24e   :  { %v1613_v49 = vpop.f32.mrb[100].mxu1  ;;  %v5696_v41 = vpop.f32.mrb[124].mxu0 }
 0x24f   :  { %v1855_v59 = vmin.f32 %v1839_v24, %v1613_v49  ;;  %v1615_v58 = vpop.f32.mrb[101].mxu1  ;;  %v5701_v61 = vpop.f32.mrb[125].mxu0  ;;  %v5704_v30 = vmin.f32 %v1870_v40, %v5591_v62  ;;  %v6884_v49 = vmin.f32 %v5567_v22, %v5445_v44 }
 0x250   :  { %v5716_v24 = vpop.permute.xlu1 %3205 }
 0x251   :  { %v1871_v55 = vmin.f32 %v1855_v59, %v1615_v58 }
 0x252   :  { %v1619_v3 = vpop.f32.mrb[102].mxu1  ;;  %v5706_v48 = vpop.f32.mrb[126].mxu0 }
 0x253   :  { %v1856_v26 = vmin.f32 %v6883_v23, %v1619_v3  ;;  %v1621_v38 = vpop.f32.mrb[103].mxu1  ;;  %v5711_v31 = vpop.f32.mrb[127].mxu0  ;;  %v5714_v52 = vmin.f32 %v1871_v55, %v5615_v51 }
 0x255   :  { %v1872_v46 = vmin.f32 %v1856_v26, %v1621_v38 }
 0x256   :  { %v1625_v34 = vpop.f32.mrb[104].mxu1  ;;  %v5718_v62 = vpop.f32.mrb[128].mxu0 }
 0x257   :  { %v1857_v28 = vmin.f32 %v1841_v29, %v1625_v34  ;;  %v1627_v1 = vpop.f32.mrb[105].mxu1  ;;  %v5723_v14 = vpop.f32.mrb[129].mxu0  ;;  %v5726_v17 = vmin.f32 %v1872_v46, %v5610_v21 }
 0x258   :  { %v5738_v29 = vpop.permute.xlu1 %3211 }
 0x259   :  { %v1873_v63 = vmin.f32 %v1857_v28, %v1627_v1 }
 0x25a   :  { %v1631_v40 = vpop.f32.mrb[106].mxu1  ;;  %v5728_v51 = vpop.f32.mrb[130].mxu0 }
 0x25b   :  { %v1858_v59 = vmin.f32 %v6884_v49, %v1631_v40  ;;  %v1633_v58 = vpop.f32.mrb[107].mxu1  ;;  %v5733_v55 = vpop.f32.mrb[131].mxu0  ;;  %v5736_v12 = vmin.f32 %v1873_v63, %v5635_v56 }
 0x25c   :  { %v5760_v33 = vpop.permute.xlu1 %3214 }
 0x25d   :  { %v1874_v39 = vmin.f32 %v1858_v59, %v1633_v58  ;;  %v6885_v58 = vmin.f32 %v5605_v42, %v5505_v0 }
 0x25e   :  { %v1637_v3 = vpop.f32.mrb[108].mxu1  ;;  %v5740_v21 = vpop.f32.mrb[132].mxu0 }
 0x25f   :  { %v1859_v23 = vmin.f32 %v1843_v11, %v1637_v3  ;;  %v1639_v26 = vpop.f32.mrb[109].mxu1  ;;  %v5745_v38 = vpop.f32.mrb[133].mxu0  ;;  %v5748_v44 = vmin.f32 %v1874_v39, %v5628_v37 }
 0x260   :  { %v5782_v54 = vpop.permute.xlu1 %3217 }
 0x261   :  { %v1875_v22 = vmin.f32 %v1859_v23, %v1639_v26 }
 0x262   :  { %v1643_v46 = vpop.f32.mrb[110].mxu1  ;;  %v5750_v56 = vpop.f32.mrb[134].mxu0 }
 0x263   :  { %v1860_v34 = vmin.f32 %v1844_v43, %v1643_v46  ;;  %v1645_v28 = vpop.f32.mrb[111].mxu1  ;;  %v5755_v1 = vpop.f32.mrb[135].mxu0  ;;  %v5758_v8 = vmin.f32 %v1875_v22, %v5649_v5 }
 0x264   :  { %v5804_v53 = vpop.permute.xlu1 %3220 }
 0x265   :  { %v1876_v11 = vmin.f32 %v1860_v34, %v1645_v28 }
 0x266   :  { %v1649_v63 = vpop.f32.mrb[112].mxu1  ;;  %v5762_v37 = vpop.f32.mrb[136].mxu0 }
 0x267   :  { %v1861_v40 = vmin.f32 %v1845_v2, %v1649_v63  ;;  %v1651_v49 = vpop.f32.mrb[113].mxu1  ;;  %v5767_v59 = vpop.f32.mrb[137].mxu0  ;;  %v5770_v15 = vmin.f32 %v1876_v11, %v5642_v45  ;;  %v6886_v11 = vmin.f32 %v5623_v32, %v5541_v9 }
 0x269   :  { %v1877_v13 = vmin.f32 %v1861_v40, %v1651_v49 }
 0x26a   :  { %v1655_v43 = vpop.f32.mrb[114].mxu1  ;;  %v5772_v5 = vpop.f32.mrb[138].mxu0 }
 0x26b   :  { %v1862_v39 = vmin.f32 %v6885_v58, %v1655_v43  ;;  %v1657_v3 = vpop.f32.mrb[115].mxu1  ;;  %v5777_v23 = vpop.f32.mrb[139].mxu0  ;;  %v5780_v47 = vmin.f32 %v1877_v13, %v5661_v19 }
 0x26d   :  { %v1878_v2 = vmin.f32 %v1862_v39, %v1657_v3 }
 0x26e   :  { %v1661_v26 = vpop.f32.mrb[116].mxu1  ;;  %v5784_v45 = vpop.f32.mrb[140].mxu0 }
 0x26f   :  { %v1863_v22 = vmin.f32 %v1847_v18, %v1661_v26  ;;  %v1663_v46 = vpop.f32.mrb[117].mxu1  ;;  %v5789_v34 = vpop.f32.mrb[141].mxu0  ;;  %v5792_v0 = vmin.f32 %v1878_v2, %v5654_v7 }
 0x271   :  { %v1879_v42 = vmin.f32 %v1863_v22, %v1663_v46 }
 0x272   :  { %v1667_v28 = vpop.f32.mrb[118].mxu1  ;;  %v5794_v19 = vpop.f32.mrb[142].mxu0 }
 0x273   :  { %v1864_v63 = vmin.f32 %v6886_v11, %v1667_v28  ;;  %v1669_v40 = vpop.f32.mrb[119].mxu1  ;;  %v5799_v49 = vpop.f32.mrb[143].mxu0  ;;  %v5802_v60 = vmin.f32 %v1879_v42, %v5671_v35 }
 0x274   :  { %v5820_v42 = vpop.permute.xlu1 %3223 }
 0x275   :  { %v1880_v18 = vmin.f32 %v1864_v63, %v1669_v40 }
 0x276   :  { %v2045_v13 = vpop.f32.mrb[120].mxu1  ;;  %v5806_v7 = vpop.f32.mrb[144].mxu0 }
 0x277   :  { %v2446_v43 = vmin.f32 %v5651_v4, %v2045_v13  ;;  %v2047_v58 = vpop.f32.mrb[121].mxu1  ;;  %v5809_v39 = vpop.f32.mrb[145].mxu0  ;;  %v5812_v9 = vmin.f32 %v1880_v18, %v5666_v50 }
 0x279   :  { %v2462_v32 = vmin.f32 %v2446_v43, %v2047_v58 }
 0x27a   :  { %v2051_v3 = vpop.f32.mrb[122].mxu1  ;;  %v5814_v2 = vpop.f32.mrb[146].mxu0 }
 0x27b   :  { %v2478_v35 = vmin.f32 %v2462_v32, %v5676_v10  ;;  %v2447_v26 = vmin.f32 %v5664_v6, %v2051_v3  ;;  %v2053_v22 = vpop.f32.mrb[123].mxu1  ;;  %v5818_v46 = vpop.f32.mrb[147].mxu0 }
 0x27d   :  { %v2463_v4 = vmin.f32 %v2447_v26, %v2053_v22  ;;  %v5823_v28 = vmin.f32 %v2478_v35, %v5681_v25 }
 0x27e   :  { %v2057_v11 = vpop.f32.mrb[124].mxu1  ;;  %v5825_v50 = vpop.f32.mrb[148].mxu0 }
 0x27f   :  { %v2479_v63 = vmin.f32 %v2463_v4, %v5686_v16  ;;  %v2448_v40 = vmin.f32 %v5674_v36, %v2057_v11  ;;  %v2059_v18 = vpop.f32.mrb[125].mxu1  ;;  %v5829_v10 = vpop.f32.mrb[149].mxu0 }
 0x280   :  { %v5840_v16 = vpop.permute.xlu1 %3226 }
 0x281   :  { %v2464_v6 = vmin.f32 %v2448_v40, %v2059_v18  ;;  %v5832_v13 = vmin.f32 %v2479_v63, %v5691_v57 }
 0x282   :  { %v2063_v43 = vpop.f32.mrb[126].mxu1  ;;  %v5834_v58 = vpop.f32.mrb[150].mxu0 }
 0x283   :  { %v2480_v25 = vmin.f32 %v2464_v6, %v5696_v41  ;;  %v2449_v32 = vmin.f32 %v5684_v27, %v2063_v43  ;;  %v2065_v3 = vpop.f32.mrb[127].mxu1  ;;  %v5838_v35 = vpop.f32.mrb[151].mxu0 }
 0x285   :  { %v2465_v36 = vmin.f32 %v2449_v32, %v2065_v3  ;;  %v5843_v26 = vmin.f32 %v2480_v25, %v5701_v61 }
 0x286   :  { %v2069_v22 = vpop.f32.mrb[128].mxu1  ;;  %v5845_v4 = vpop.f32.mrb[152].mxu0 }
 0x287   :  { %v2481_v57 = vmin.f32 %v2465_v36, %v5706_v48  ;;  %v2450_v11 = vmin.f32 %v5694_v20, %v2069_v22  ;;  %v2071_v63 = vpop.f32.mrb[129].mxu1  ;;  %v5849_v41 = vpop.f32.mrb[153].mxu0 }
 0x288   :  { %v5860_v48 = vpop.permute.xlu1 %3229 }
 0x289   :  { %v2466_v27 = vmin.f32 %v2450_v11, %v2071_v63  ;;  %v5852_v40 = vmin.f32 %v2481_v57, %v5711_v31 }
 0x28a   :  { %v2075_v18 = vpop.f32.mrb[130].mxu1  ;;  %v5854_v6 = vpop.f32.mrb[154].mxu0 }
 0x28b   :  { %v2482_v61 = vmin.f32 %v2466_v27, %v5718_v62  ;;  %v2451_v43 = vmin.f32 %v5704_v30, %v2075_v18  ;;  %v2077_v25 = vpop.f32.mrb[131].mxu1  ;;  %v5858_v32 = vpop.f32.mrb[155].mxu0 }
 0x28d   :  { %v2467_v20 = vmin.f32 %v2451_v43, %v2077_v25  ;;  %v5863_v3 = vmin.f32 %v2482_v61, %v5723_v14 }
 0x28e   :  { %v2081_v36 = vpop.f32.mrb[132].mxu1  ;;  %v5865_v22 = vpop.f32.mrb[156].mxu0 }
 0x28f   :  { %v2483_v31 = vmin.f32 %v2467_v20, %v5728_v51  ;;  %v2452_v57 = vmin.f32 %v5714_v52, %v2081_v36  ;;  %v2083_v11 = vpop.f32.mrb[133].mxu1  ;;  %v5869_v62 = vpop.f32.mrb[157].mxu0 }
 0x290   :  { %v5880_v51 = vpop.permute.xlu1 %3232 }
 0x291   :  { %v2468_v30 = vmin.f32 %v2452_v57, %v2083_v11  ;;  %v5872_v63 = vmin.f32 %v2483_v31, %v5733_v55  ;;  %6887 = vst [vmem:[#allocation24_spill] sm:$0xff] %v5880_v51 }
 0x292   :  { %v2087_v27 = vpop.f32.mrb[134].mxu1  ;;  %v5874_v18 = vpop.f32.mrb[158].mxu0 }
 0x293   :  { %v2484_v14 = vmin.f32 %v2468_v30, %v5740_v21  ;;  %v2453_v61 = vmin.f32 %v5726_v17, %v2087_v27  ;;  %v2089_v43 = vpop.f32.mrb[135].mxu1  ;;  %v5878_v25 = vpop.f32.mrb[159].mxu0 }
 0x295   :  { %v2469_v52 = vmin.f32 %v2453_v61, %v2089_v43  ;;  %v5883_v20 = vmin.f32 %v2484_v14, %v5745_v38 }
 0x296   :  { %v2093_v36 = vpop.f32.mrb[136].mxu1  ;;  %v5885_v57 = vpop.f32.mrb[160].mxu0 }
 0x297   :  { %v2485_v55 = vmin.f32 %v2469_v52, %v5750_v56  ;;  %v2454_v31 = vmin.f32 %v5736_v12, %v2093_v36  ;;  %v2095_v11 = vpop.f32.mrb[137].mxu1  ;;  %v5889_v21 = vpop.f32.mrb[161].mxu0 }
 0x298   :  { %v5900_v56 = vpop.permute.xlu1 %3235 }
 0x299   :  { %v2470_v17 = vmin.f32 %v2454_v31, %v2095_v11  ;;  %v5892_v30 = vmin.f32 %v2485_v55, %v5755_v1  ;;  %6888 = vst [vmem:[#allocation25_spill] sm:$0xff] %v5900_v56 }
 0x29a   :  { %v2099_v27 = vpop.f32.mrb[138].mxu1  ;;  %v5894_v51 = vpop.f32.mrb[162].mxu0 }
 0x29b   :  { %v2486_v38 = vmin.f32 %v2470_v17, %v5762_v37  ;;  %v2455_v14 = vmin.f32 %v5748_v44, %v2099_v27  ;;  %v2101_v61 = vpop.f32.mrb[139].mxu1  ;;  %v5898_v43 = vpop.f32.mrb[163].mxu0 }
 0x29d   :  { %v2471_v12 = vmin.f32 %v2455_v14, %v2101_v61  ;;  %v5903_v52 = vmin.f32 %v2486_v38, %v5767_v59 }
 0x29e   :  { %v2105_v36 = vpop.f32.mrb[140].mxu1  ;;  %v5905_v31 = vpop.f32.mrb[164].mxu0 }
 0x29f   :  { %v2487_v1 = vmin.f32 %v2471_v12, %v5772_v5  ;;  %v2456_v55 = vmin.f32 %v5758_v8, %v2105_v36  ;;  %v2107_v11 = vpop.f32.mrb[141].mxu1  ;;  %v5909_v37 = vpop.f32.mrb[165].mxu0 }
 0x2a0   :  { %v5920_v5 = vpop.permute.xlu1 %3238 }
 0x2a1   :  { %v2472_v44 = vmin.f32 %v2456_v55, %v2107_v11  ;;  %v5912_v17 = vmin.f32 %v2487_v1, %v5777_v23  ;;  %6889 = vst [vmem:[#allocation28_spill] sm:$0xff] %v5920_v5 }
 0x2a2   :  { %v2111_v27 = vpop.f32.mrb[142].mxu1  ;;  %v5914_v56 = vpop.f32.mrb[166].mxu0 }
 0x2a3   :  { %v2488_v59 = vmin.f32 %v2472_v44, %v5784_v45  ;;  %v2457_v38 = vmin.f32 %v5770_v15, %v2111_v27  ;;  %v2113_v14 = vpop.f32.mrb[143].mxu1  ;;  %v5918_v61 = vpop.f32.mrb[167].mxu0 }
 0x2a5   :  { %v2473_v8 = vmin.f32 %v2457_v38, %v2113_v14  ;;  %v5923_v12 = vmin.f32 %v2488_v59, %v5789_v34 }
 0x2a6   :  { %v2117_v36 = vpop.f32.mrb[144].mxu1  ;;  %v5925_v55 = vpop.f32.mrb[168].mxu0 }
 0x2a7   :  { %v2489_v23 = vmin.f32 %v2473_v8, %v5794_v19  ;;  %v2458_v1 = vmin.f32 %v5780_v47, %v2117_v36  ;;  %v2119_v11 = vpop.f32.mrb[145].mxu1  ;;  %v5929_v45 = vpop.f32.mrb[169].mxu0 }
 0x2a8   :  { %v5940_v19 = vpop.permute.xlu1 %3241 }
 0x2a9   :  { %v2474_v15 = vmin.f32 %v2458_v1, %v2119_v11  ;;  %v5932_v44 = vmin.f32 %v2489_v23, %v5799_v49  ;;  %6891 = vst [vmem:[#allocation30_spill] sm:$0xff] %v5940_v19 }
 0x2aa   :  { %v2123_v27 = vpop.f32.mrb[146].mxu1  ;;  %v5934_v5 = vpop.f32.mrb[170].mxu0 }
 0x2ab   :  { %v2490_v34 = vmin.f32 %v2474_v15, %v5806_v7  ;;  %v2459_v59 = vmin.f32 %v5792_v0, %v2123_v27  ;;  %v2125_v38 = vpop.f32.mrb[147].mxu1  ;;  %v5938_v14 = vpop.f32.mrb[171].mxu0 }
 0x2ac   :  { %6890 = vst [vmem:[#allocation29_spill] sm:$0xff] %v5938_v14 }
 0x2ad   :  { %v2475_v47 = vmin.f32 %v2459_v59, %v2125_v38  ;;  %v5943_v8 = vmin.f32 %v2490_v34, %v5809_v39 }
 0x2ae   :  { %v2129_v36 = vpop.f32.mrb[148].mxu1  ;;  %v5945_v1 = vpop.f32.mrb[172].mxu0 }
 0x2af   :  { %v2491_v49 = vmin.f32 %v2475_v47, %v5814_v2  ;;  %v2460_v23 = vmin.f32 %v5802_v60, %v2129_v36  ;;  %v2131_v11 = vpop.f32.mrb[149].mxu1  ;;  %v5949_v7 = vpop.f32.mrb[173].mxu0 }
 0x2b0   :  { %v5960_v2 = vpop.permute.xlu1 %3244 }
 0x2b1   :  { %v2476_v0 = vmin.f32 %v2460_v23, %v2131_v11  ;;  %v5952_v15 = vmin.f32 %v2491_v49, %v5818_v46  ;;  %6892 = vst [vmem:[#allocation32_spill] sm:$0xff] %v5960_v2 }
 0x2b2   :  { %v2135_v27 = vpop.f32.mrb[150].mxu1  ;;  %v5954_v19 = vpop.f32.mrb[174].mxu0 }
 0x2b3   :  { %v2492_v39 = vmin.f32 %v2476_v0, %v5825_v50  ;;  %v2461_v34 = vmin.f32 %v5812_v9, %v2135_v27  ;;  %v2137_v59 = vpop.f32.mrb[151].mxu1  ;;  %v5958_v38 = vpop.f32.mrb[175].mxu0 }
 0x2b5   :  { %v2477_v60 = vmin.f32 %v2461_v34, %v2137_v59  ;;  %v5963_v47 = vmin.f32 %v2492_v39, %v5829_v10 }
 0x2b6   :  { %v3967_v36 = vpop.f32.mrb[152].mxu1  ;;  %v5965_v23 = vpop.f32.mrb[176].mxu0 }
 0x2b7   :  { %v2493_v46 = vmin.f32 %v2477_v60, %v5834_v58  ;;  %v2511_v49 = vmin.f32 %v5832_v13, %v3967_v36  ;;  %v2367_v11 = vpop.f32.mrb[153].mxu1  ;;  %v5969_v50 = vpop.f32.mrb[177].mxu0 }
 0x2b8   :  { %v2510_v9 = vmin.f32 %v5823_v28, %v2367_v11  ;;  %v5991_v60 = vpop.permute.xlu1 %3247 }
 0x2b9   :  { %v5973_v0 = vmin.f32 %v2511_v49, %v5854_v6  ;;  %v5976_v27 = vmin.f32 %v2493_v46, %v5838_v35  ;;  %6893 = vst [vmem:[#allocation31_spill] sm:$0xff] %v5991_v60 }
 0x2ba   :  { %v5979_v10 = vmin.f32 %v2510_v9, %v5845_v4  ;;  %v3970_v39 = vpop.f32.mrb[154].mxu1  ;;  %v5981_v34 = vpop.f32.mrb[178].mxu0 }
 0x2bb   :  { %v2513_v58 = vmin.f32 %v5852_v40, %v3970_v39  ;;  %v2377_v13 = vpop.f32.mrb[155].mxu1  ;;  %v5984_v59 = vpop.f32.mrb[179].mxu0 }
 0x2bc   :  { %v2512_v6 = vmin.f32 %v5843_v26, %v2377_v13 }
 0x2bd   :  { %v5994_v4 = vmin.f32 %v2513_v58, %v5874_v18 }
 0x2be   :  { %v5997_v36 = vmin.f32 %v2512_v6, %v5865_v22  ;;  %v3973_v40 = vpop.f32.mrb[156].mxu1  ;;  %v5999_v46 = vpop.f32.mrb[180].mxu0 }
 0x2bf   :  { %v2515_v49 = vmin.f32 %v5872_v63, %v3973_v40  ;;  %v2387_v11 = vpop.f32.mrb[157].mxu1  ;;  %v6002_v9 = vpop.f32.mrb[181].mxu0 }
 0x2c0   :  { %6894 = vst [vmem:[#allocation11_spill] sm:$0xff] %v6002_v9  ;;  %v2514_v39 = vmin.f32 %v5863_v3, %v2387_v11 }
 0x2c1   :  { %v6010_v58 = vmin.f32 %v2515_v49, %v5894_v51  ;;  %v6023_v51 = vpop.permute.xlu1 %3250  ;;  %v3252_v49 = vlaneseq }
 0x2c2   :  { %v6013_v22 = vmin.f32 %v2514_v39, %v5885_v57  ;;  %v3976_v13 = vpop.f32.mrb[158].mxu1  ;;  %v2764_v6 = vpop.f32.mrb[182].mxu0  ;;  %6896 = vst [vmem:[#allocation21_spill] sm:$0xff] %v6023_v51 }
 0x2c3   :  { %v2517_v63 = vmin.f32 %v5892_v30, %v3976_v13  ;;  %v2397_v40 = vpop.f32.mrb[159].mxu1  ;;  %v6016_v28 = vpop.f32.mrb[183].mxu0  ;;  %v6085_v14 = vand.u32 127, %v3252_v49 }
 0x2c4   :  { %6895 = vst [vmem:[#allocation17_spill] sm:$0xff] %v6016_v28  ;;  %v2516_v3 = vmin.f32 %v5883_v20, %v2397_v40 }
 0x2c5   :  { %v6026_v57 = vmin.f32 %v2517_v63, %v5914_v56 }
 0x2c6   :  { %v6029_v39 = vmin.f32 %v2516_v3, %v5905_v31  ;;  %v3979_v30 = vpop.f32.mrb[160].mxu1  ;;  %v6031_v13 = vpop.f32.mrb[184].mxu0  ;;  %v6044_v31 = vshrl.u32 %v3252_v49, 7 }
 0x2c7   :  { %v2519_v18 = vmin.f32 %v5912_v17, %v3979_v30  ;;  %v2407_v26 = vpop.f32.mrb[161].mxu1  ;;  %v6034_v35 = vpop.f32.mrb[185].mxu0 }
 0x2c8   :  { %v2518_v40 = vmin.f32 %v5903_v52, %v2407_v26  ;;  %v3203_v52 = vld [vmem:[%s6730_s3] sm:$0x3]  ;;  %vm3380_vm1 = vcmp.ne.s32.totalorder %v6044_v31, %v6085_v14  ;;  %v3343_v28 = vadd.s32 16, %v6044_v31  ;;  %s4083_s3 = smov [#allocation2]  }
 0x2c9   :  { %v6042_v63 = vmin.f32 %v2519_v18, %v5934_v5  ;;  %v3274_v18 = vpop.permute.xlu1 %3273  ;;  %s3529_s22 = sshll.u32 %s4083_s3, 4  ;;  %s3530_s22 = int_to_ptr.vmem [resolvable:$true] %s3529_s22 }
 0x2ca   :  { %v6047_v3 = vmin.f32 %v2518_v40, %v5925_v55  ;;  %v3982_v17 = vpop.f32.mrb[162].mxu1  ;;  %v6049_v30 = vpop.f32.mrb[186].mxu0  ;;  %v3254_v40 = vsub.s32 0, %v6044_v31  ;;  %vm3382_vm13 = vcmp.ne.s32.totalorder %v3343_v28, %v6085_v14  ;;  %s4031_s25 = scalar_lea.vmem %s3530_s22, 2048  ;;  %p4036_p1 = scmp.lt.s32.totalorder %s3530_s22, %s3530_s22 }
 0x2cb   :  { %6897 = vst [vmem:[#allocation8_spill] sm:$0xff] %v6042_v63  ;;  %v2521_v11 = vmin.f32 %v5932_v44, %v3982_v17  ;;  %v2417_v51 = vpop.f32.mrb[163].mxu1  ;;  %v6052_v20 = vpop.f32.mrb[187].mxu0  ;;  %p4032_p0 = scmp.ne.s32.totalorder %s3530_s22, %s4031_s25  ;;  %p4037_p2 = scmp.lt.s32.totalorder %s4031_s25, %s4031_s25 }
 0x2cc   :  { %v2520_v26 = vmin.f32 %v5923_v12, %v2417_v51  ;;  %v6083_v2 = vrot.slane %v3203_v52, %v3254_v40 }
 0x2cd   :  { %v6060_v55 = vmin.f32 %v2521_v11, %v5954_v19  ;;  %p4038_p3 = por %p4037_p2, %p4036_p1 }
 0x2ce   :  { %v6064_v56 = vmin.f32 %v2520_v26, %v5945_v1  ;;  %v3985_v44 = vpop.f32.mrb[164].mxu1  ;;  %v6066_v17 = vpop.f32.mrb[188].mxu0  ;;  %v3322_v26 = vsub.s32 1, %v6044_v31  ;;  %vm3256_vm2 = vcmp.eq.s32.totalorder %v5716_v24, %v6083_v2  ;;  %vm3258_vm14 = vcmp.eq.s32.totalorder %v5738_v29, %v6083_v2 }
 0x2cf   :  { %v2523_v12 = vmin.f32 %v5952_v15, %v3985_v44  ;;  %v2427_v51 = vpop.f32.mrb[165].mxu1  ;;  %v6072_v5 = vpop.f32.mrb[189].mxu0  ;;  %vm6123_vm3 = vmand %vm3256_vm2, %vm3380_vm1  ;;  %vm3259_vm1 = vcmp.eq.s32.totalorder %v5760_v33, %v6083_v2  ;;  %p4039_p4 = pnand %p4038_p3, %p4032_p0 }
 0x2d0   :  { %v2522_v11 = vmin.f32 %v5943_v8, %v2427_v51  ;;  %v6100_v40 = vrot.slane %v3203_v52, %v3322_v26  ;;  %v6899_v52 = vmin.f32 %v5979_v10, %v5849_v41 }
 0x2d1   :  { %v6081_v60 = vmin.f32 %v2523_v12, %v5981_v34 }
 0x2d2   :  { %v6088_v15 = vmin.f32 %v2522_v11, %v5965_v23  ;;  %v3988_v44 = vpop.f32.mrb[166].mxu1  ;;  %v6090_v63 = vpop.f32.mrb[190].mxu0  ;;  %vm3324_vm4 = vcmp.eq.s32.totalorder %v3274_v18, %v6100_v40 }
 0x2d3   :  { %v2525_v8 = vmin.f32 %v5976_v27, %v3988_v44  ;;  %v2437_v51 = vpop.f32.mrb[167].mxu1  ;;  %v6093_v19 = vpop.f32.mrb[191].mxu0  ;;  %vm6143_vm7 = vmand %vm6123_vm3, %vm3324_vm4 }
 0x2d4   :  { %v2524_v34 = vmin.f32 %v5963_v47, %v2437_v51  ;;  %v3277_v23 = vpop.permute.xlu1 %3276  ;;  %v3342_v47 = vadd.s32 8, %v6044_v31  ;;  %vm6151_vm10 = vmxor %vm3324_vm4, %vm4082_vm9 }
 0x2d5   :  { %v6102_v12 = vmin.f32 %v2525_v8, %v2764_v6  ;;  %vm3325_vm8 = vcmp.eq.s32.totalorder %v3277_v23, %v6100_v40  ;;  %vm3476_vm15 = vmand %vm6123_vm3, %vm6151_vm10  ;;  %vm3260_vm10 = vcmp.eq.s32.totalorder %v5782_v54, %v6083_v2 }
 0x2d6   :  { %v6109_v27 = vmin.f32 %v2524_v34, %v5999_v46  ;;  %v2835_v11 = vpop.f32.mrb[168].mxu1  ;;  %v6111_v44 = vpop.f32.mrb[192].mxu0  ;;  %vm3381_vm5 = vcmp.ne.s32.totalorder %v3342_v47, %v6085_v14  ;;  %vm6165_vm12 = vmxor %vm3325_vm8, %vm4082_vm9  ;;  %v3345_v46 = vadd.s32 32, %v6044_v31 }
 0x2d7   :  { %6898 = vst [vmem:[#allocation27_spill] sm:$0xff] %v6102_v12  ;;  %v3107_v26 = vmin.f32 %v6899_v52, %v2835_v11  ;;  %v2837_v6 = vpop.f32.mrb[169].mxu1  ;;  %v6117_v8 = vpop.f32.mrb[193].mxu0  ;;  %v6902_v11 = vmin.f32 %v5973_v0, %v5858_v32 }
 0x2d8   :  { %v3209_v34 = vpop.permute.xlu0 %3208  ;;  %v3280_v0 = vpop.permute.xlu1 %3279 }
 0x2d9   :  { %v3123_v1 = vmin.f32 %v3107_v26, %v2837_v6  ;;  %vm3257_vm6 = vcmp.eq.s32.totalorder %v3209_v34, %v6083_v2  ;;  %v3344_v34 = vadd.s32 24, %v6044_v31  ;;  %vm3326_vm2 = vcmp.eq.s32.totalorder %v3280_v0, %v6100_v40 }
 0x2da   :  { %v2841_v49 = vpop.f32.mrb[170].mxu1  ;;  %v6128_v41 = vpop.f32.mrb[194].mxu0  ;;  %vm6155_vm11 = vmand %vm3257_vm6, %vm3381_vm5 }
 0x2db   :  { %v3139_v10 = vmin.f32 %v3123_v1, %v6034_v35  ;;  %v3108_v52 = vmin.f32 %v6902_v11, %v2841_v49  ;;  %v2843_v51 = vpop.f32.mrb[171].mxu1  ;;  %v6136_v24 = vpop.f32.mrb[195].mxu0  ;;  %vm6186_vm0 = vmand %vm6155_vm11, %vm3325_vm8  ;;  %vm3383_vm4 = vcmp.ne.s32.totalorder %v3344_v34, %v6085_v14  ;;  %vm3384_vm8 = vcmp.ne.s32.totalorder %v3345_v46, %v6085_v14 }
 0x2dc   :  { %vm3477_vm3 = vmand %vm6155_vm11, %vm6165_vm12 }
 0x2dd   :  { %v3155_v35 = vmax.f32 %v3139_v10, 0.0  ;;  %v3124_v1 = vmin.f32 %v3108_v52, %v2843_v51  ;;  %v6911_v51 = vmin.f32 %v5997_v36, %v5869_v62  ;;  %vm6214_vm5 = vmand %vm3258_vm14, %vm3382_vm13  ;;  %v3346_v62 = vadd.s32 40, %v6044_v31 }
 0x2de   :  { %v2847_v47 = vpop.f32.mrb[172].mxu1  ;;  %v6159_v6 = vpop.f32.mrb[196].mxu0  ;;  %vm6221_vm6 = vmxor %vm3326_vm2, %vm4082_vm9 }
 0x2df   :  { %v3171_v11 = vmin.f32 %v3155_v35, 1e+10  ;;  %v3140_v10 = vmin.f32 %v3124_v1, %v6031_v13  ;;  %v3109_v52 = vmin.f32 %v6911_v51, %v2847_v47  ;;  %v2849_v12 = vpop.f32.mrb[173].mxu1  ;;  %v6173_v9 = vpop.f32.mrb[197].mxu0  ;;  %v6914_v47 = vmin.f32 %v5994_v4, %v5878_v25  ;;  %vm6243_vm12 = vmand %vm6214_vm5, %vm3326_vm2 }
 0x2e0   :  { %v3283_v25 = vpop.permute.xlu1 %3282  ;;  %vm3478_vm13 = vmand %vm6214_vm5, %vm6221_vm6  ;;  %vm3385_vm2 = vcmp.ne.s32.totalorder %v3346_v62, %v6085_v14  ;;  %v3348_v62 = vadd.s32 56, %v6044_v31 }
 0x2e1   :  { %v3428_v36 = vsel %vm6143_vm7, %v3171_v11, 1e+10  ;;  %v3492_v13 = vsel %vm3476_vm15, %v3171_v11, 1e+10  ;;  %v3156_v35 = vmax.f32 %v3140_v10, 0.0  ;;  %v3125_v1 = vmin.f32 %v3109_v52, %v2849_v12  ;;  %vm6230_vm7 = vmand %vm3259_vm1, %vm3383_vm4 }
 0x2e2   :  { %3444 = vst [vmem:[#allocation2] sm:$0xff] %v3428_v36  ;;  %3508 = vst [vmem:[#allocation4] sm:$0xff] %v3492_v13  ;;  %v2853_v23 = vpop.f32.mrb[174].mxu1  ;;  %v6200_v26 = vpop.f32.mrb[198].mxu0  ;;  %vm3327_vm11 = vcmp.eq.s32.totalorder %v3283_v25, %v6100_v40 }
 0x2e3   :  { %v3172_v12 = vmin.f32 %v3156_v35, 1e+10  ;;  %v3141_v32 = vmin.f32 %v3125_v1, %v6052_v20  ;;  %v3110_v11 = vmin.f32 %v6914_v47, %v2853_v23  ;;  %v2855_v10 = vpop.f32.mrb[175].mxu1  ;;  %v6207_v51 = vpop.f32.mrb[199].mxu0  ;;  %v6923_v35 = vmin.f32 %v6013_v22, %v5889_v21  ;;  %vm6258_vm14 = vmxor %vm3327_vm11, %vm4082_vm9 }
 0x2e4   :  { %vm6269_vm15 = vmand %vm3260_vm10, %vm3384_vm8  ;;  %v3289_v46 = vpop.permute.xlu1 %3288  ;;  %vm3262_vm8 = vcmp.eq.s32.totalorder %v5820_v42, %v6083_v2 }
 0x2e5   :  { %v3429_v4 = vsel %vm6186_vm0, %v3172_v12, 1e+10  ;;  %v3493_v34 = vsel %vm3477_vm3, %v3172_v12, 1e+10  ;;  %v3157_v28 = vmax.f32 %v3141_v32, 0.0  ;;  %v3126_v18 = vmin.f32 %v3110_v11, %v2855_v10  ;;  %v3286_v12 = vpop.permute.xlu0 %3285  ;;  %vm6282_vm3 = vmand %vm6230_vm7, %vm3327_vm11 }
 0x2e6   :  { %3445 = vst [vmem:[#allocation2 + $0x8] sm:$0xff] %v3429_v4  ;;  %3509 = vst [vmem:[#allocation4 + $0x8] sm:$0xff] %v3493_v34  ;;  %v2859_v52 = vpop.f32.mrb[176].mxu1  ;;  %vm3261_vm0 = vcmp.eq.s32.totalorder %v5804_v53, %v6083_v2  ;;  %v3347_v11 = vadd.s32 48, %v6044_v31  ;;  %vm3328_vm1 = vcmp.eq.s32.totalorder %v3286_v12, %v6100_v40  ;;  %v6930_v4 = vmin.f32 %v6010_v58, %v5898_v43 }
 0x2e7   :  { %v3173_v36 = vmin.f32 %v3157_v28, 1e+10  ;;  %v3142_v13 = vmin.f32 %v3126_v18, %v6049_v30  ;;  %v3111_v1 = vmin.f32 %v6923_v35, %v2859_v52  ;;  %v2861_v23 = vpop.f32.mrb[177].mxu1  ;;  %vm3479_vm4 = vmand %vm6230_vm7, %vm6258_vm14  ;;  %vm3329_vm10 = vcmp.eq.s32.totalorder %v3289_v46, %v6100_v40 }
 0x2e8   :  { %vm6297_vm5 = vmxor %vm3328_vm1, %vm4082_vm9  ;;  %vm3386_vm7 = vcmp.ne.s32.totalorder %v3347_v11, %v6085_v14  ;;  %v3292_v0 = vpop.permute.xlu1 %3291  ;;  %v6944_v11 = vmin.f32 %v6026_v57, %v5918_v61  ;;  %v6977_v58 = vmin.f32 %v6060_v55, %v5958_v38 }
 0x2e9   :  { %v3430_v30 = vsel %vm6243_vm12, %v3173_v36, 1e+10  ;;  %v3494_v32 = vsel %vm3478_vm13, %v3173_v36, 1e+10  ;;  %v3158_v21 = vmax.f32 %v3142_v13, 0.0  ;;  %v3127_v22 = vmin.f32 %v3111_v1, %v2861_v23  ;;  %vm6306_vm6 = vmand %vm3261_vm0, %vm3385_vm2  ;;  %v6959_v23 = vld [vmem:[#allocation8_spill] sm:$0xff] }
 0x2ea   :  { %3446 = vst [vmem:[#allocation2 + $0x10] sm:$0xff] %v3430_v30  ;;  %3510 = vst [vmem:[#allocation4 + $0x10] sm:$0xff] %v3494_v32  ;;  %v2865_v10 = vpop.f32.mrb[178].mxu1  ;;  %v6937_v13 = vmin.f32 %v6029_v39, %v5909_v37  ;;  %v3349_v32 = vadd.s32 64, %v6044_v31  ;;  %vm3330_vm0 = vcmp.eq.s32.totalorder %v3292_v0, %v6100_v40  ;;  %v6960_v0 = vld [vmem:[#allocation29_spill] sm:$0xff] }
 0x2eb   :  { %v3174_v49 = vmin.f32 %v3158_v21, 1e+10  ;;  %v3143_v20 = vmin.f32 %v3127_v22, %v6072_v5  ;;  %v3112_v34 = vmin.f32 %v6930_v4, %v2865_v10  ;;  %v2867_v28 = vpop.f32.mrb[179].mxu1  ;;  %vm6319_vm11 = vmand %vm6269_vm15, %vm3328_vm1  ;;  %vm3387_vm1 = vcmp.ne.s32.totalorder %v3348_v62, %v6085_v14 }
 0x2ec   :  { %vm3480_vm12 = vmand %vm6269_vm15, %vm6297_vm5  ;;  %vm3263_vm15 = vcmp.eq.s32.totalorder %v5840_v16, %v6083_v2  ;;  %v6974_v16 = vld [vmem:[#allocation28_spill] sm:$0xff] }
 0x2ed   :  { %v3431_v5 = vsel %vm6282_vm3, %v3174_v49, 1e+10  ;;  %v3495_v18 = vsel %vm3479_vm4, %v3174_v49, 1e+10  ;;  %v3159_v52 = vmax.f32 %v3143_v20, 0.0  ;;  %v3128_v43 = vmin.f32 %v3112_v34, %v2867_v28  ;;  %vm6334_vm13 = vmxor %vm3329_vm10, %vm4082_vm9  ;;  %v3295_v49 = vpop.permute.xlu0 %3294 }
 0x2ee   :  { %3447 = vst [vmem:[#allocation2 + $0x18] sm:$0xff] %v3431_v5  ;;  %3511 = vst [vmem:[#allocation4 + $0x18] sm:$0xff] %v3495_v18  ;;  %v2871_v29 = vpop.f32.mrb[180].mxu1  ;;  %v3350_v28 = vadd.s32 72, %v6044_v31  ;;  %v6951_v18 = vmin.f32 %v6047_v3, %v5929_v45 }
 0x2ef   :  { %v3175_v33 = vmin.f32 %v3159_v52, 1e+10  ;;  %v3144_v36 = vmin.f32 %v3128_v43, %v6066_v17  ;;  %v3113_v35 = vmin.f32 %v6937_v13, %v2871_v29  ;;  %v2873_v1 = vpop.f32.mrb[181].mxu1  ;;  %vm6345_vm14 = vmand %vm3262_vm8, %vm3386_vm7  ;;  %vm3264_vm7 = vcmp.eq.s32.totalorder %v5860_v48, %v6083_v2  ;;  %v3298_v29 = vpop.permute.xlu1 %3297 }
 0x2f0   :  { %vm6358_vm2 = vmand %vm6306_vm6, %vm3329_vm10  ;;  %vm3331_vm8 = vcmp.eq.s32.totalorder %v3295_v49, %v6100_v40 }
 0x2f1   :  { %v3432_v17 = vsel %vm6319_vm11, %v3175_v33, 1e+10  ;;  %v3496_v12 = vsel %vm3480_vm12, %v3175_v33, 1e+10  ;;  %v3160_v37 = vmax.f32 %v3144_v36, 0.0  ;;  %v3129_v39 = vmin.f32 %v3113_v35, %v2873_v1  ;;  %vm3481_vm3 = vmand %vm6306_vm6, %vm6334_vm13  ;;  %v6956_v33 = vld [vmem:[#allocation24_spill] sm:$0xff]  ;;  %v3301_v30 = vpop.permute.xlu0 %3300 }
 0x2f2   :  { %3448 = vst [vmem:[#allocation2 + $0x20] sm:$0xff] %v3432_v17  ;;  %3512 = vst [vmem:[#allocation4 + $0x20] sm:$0xff] %v3496_v12  ;;  %v2877_v21 = vpop.f32.mrb[182].mxu1  ;;  %vm3388_vm6 = vcmp.ne.s32.totalorder %v3349_v32, %v6085_v14  ;;  %v3351_v36 = vadd.s32 80, %v6044_v31  ;;  %v6961_v17 = vmin.f32 %v6959_v23, %v6960_v0  ;;  %v6985_v23 = vmin.f32 %v6088_v15, %v5969_v50 }
 0x2f3   :  { %v3176_v22 = vmin.f32 %v3160_v37, 1e+10  ;;  %v3145_v47 = vmin.f32 %v3129_v39, %v6093_v19  ;;  %v3114_v10 = vmin.f32 %v6944_v11, %v2877_v21  ;;  %v2879_v54 = vpop.f32.mrb[183].mxu1  ;;  %vm6373_vm4 = vmxor %vm3330_vm0, %vm4082_vm9  ;;  %v3304_v4 = vpop.permute.xlu1 %3303 }
 0x2f4   :  { %vm6382_vm5 = vmand %vm3263_vm15, %vm3387_vm1  ;;  %vm3332_vm15 = vcmp.eq.s32.totalorder %v3298_v29, %v6100_v40 }
 0x2f5   :  { %v3433_v19 = vsel %vm6358_vm2, %v3176_v22, 1e+10  ;;  %v3497_v20 = vsel %vm3481_vm3, %v3176_v22, 1e+10  ;;  %v3161_v61 = vmax.f32 %v3145_v47, 0.0  ;;  %v3130_v57 = vmin.f32 %v3114_v10, %v2879_v54  ;;  %vm6395_vm10 = vmand %vm6345_vm14, %vm3330_vm0  ;;  %v6966_v47 = vld [vmem:[#allocation25_spill] sm:$0xff] }
 0x2f6   :  { %3449 = vst [vmem:[#allocation2 + $0x28] sm:$0xff] %v3433_v19  ;;  %3513 = vst [vmem:[#allocation4 + $0x28] sm:$0xff] %v3497_v20  ;;  %v2883_v34 = vpop.f32.mrb[184].mxu1  ;;  %vm3389_vm0 = vcmp.ne.s32.totalorder %v3350_v28, %v6085_v14  ;;  %v3352_v10 = vadd.s32 88, %v6044_v31  ;;  %v6969_v19 = vmin.f32 %v6064_v56, %v5949_v7 }
 0x2f7   :  { %v3177_v25 = vmin.f32 %v3161_v61, 1e+10  ;;  %v3146_v5 = vmin.f32 %v3130_v57, %v6090_v63  ;;  %v3115_v52 = vmin.f32 %v6951_v18, %v2883_v34  ;;  %v2885_v43 = vpop.f32.mrb[185].mxu1  ;;  %vm3482_vm11 = vmand %vm6345_vm14, %vm6373_vm4  ;;  %vm3265_vm14 = vcmp.eq.s32.totalorder %v6956_v33, %v6083_v2  ;;  %v6982_v33 = vld [vmem:[#allocation30_spill] sm:$0xff] }
 0x2f8   :  { %vm6410_vm12 = vmxor %vm3331_vm8, %vm4082_vm9 }
 0x2f9   :  { %v3434_v63 = vsel %vm6395_vm10, %v3177_v25, 1e+10  ;;  %v3498_v62 = vsel %vm3482_vm11, %v3177_v25, 1e+10  ;;  %v3162_v45 = vmax.f32 %v3146_v5, 0.0  ;;  %v3131_v3 = vmin.f32 %v3115_v52, %v2885_v43  ;;  %vm6421_vm13 = vmand %vm3264_vm7, %vm3388_vm6 }
 0x2fa   :  { %3450 = vst [vmem:[#allocation2 + $0x30] sm:$0xff] %v3434_v63  ;;  %3514 = vst [vmem:[#allocation4 + $0x30] sm:$0xff] %v3498_v62  ;;  %v2889_v13 = vpop.f32.mrb[186].mxu1  ;;  %vm3266_vm6 = vcmp.eq.s32.totalorder %v6966_v47, %v6083_v2  ;;  %vm3333_vm7 = vcmp.eq.s32.totalorder %v3301_v30, %v6100_v40  ;;  %v3353_v25 = vadd.s32 96, %v6044_v31 }
 0x2fb   :  { %vm6434_vm1 = vmand %vm6382_vm5, %vm3331_vm8  ;;  %v3178_v35 = vmin.f32 %v3162_v45, 1e+10  ;;  %v3147_v1 = vmin.f32 %v3131_v3, %v6117_v8  ;;  %v3116_v12 = vmin.f32 %v6961_v17, %v2889_v13  ;;  %v2891_v37 = vpop.f32.mrb[187].mxu1  ;;  %v3307_v45 = vpop.permute.xlu0 %3306  ;;  %v3354_v13 = vadd.s32 104, %v6044_v31 }
 0x2fc   :  { %vm3483_vm2 = vmand %vm6382_vm5, %vm6410_vm12  ;;  %vm3390_vm5 = vcmp.ne.s32.totalorder %v3351_v36, %v6085_v14 }
 0x2fd   :  { %vm6449_vm3 = vmxor %vm3332_vm15, %vm4082_vm9  ;;  %v3435_v8 = vsel %vm6434_vm1, %v3178_v35, 1e+10  ;;  %v3499_v32 = vsel %vm3483_vm2, %v3178_v35, 1e+10  ;;  %v3163_v21 = vmax.f32 %v3147_v1, 0.0  ;;  %v3132_v42 = vmin.f32 %v3116_v12, %v2891_v37  ;;  %v3310_v37 = vpop.permute.xlu1 %3309 }
 0x2fe   :  { %vm6458_vm4 = vmand %vm3265_vm14, %vm3389_vm0  ;;  %3451 = vst [vmem:[#allocation2 + $0x38] sm:$0xff] %v3435_v8  ;;  %v2895_v11 = vpop.f32.mrb[188].mxu1  ;;  %vm3334_vm14 = vcmp.eq.s32.totalorder %v3304_v4, %v6100_v40  ;;  %v6990_v8 = vld [vmem:[#allocation32_spill] sm:$0xff]  ;;  %v3356_v4 = vadd.s32 120, %v6044_v31 }
 0x2ff   :  { %3515 = vst [vmem:[#allocation4 + $0x38] sm:$0xff] %v3499_v32  ;;  %vm6471_vm8 = vmand %vm6421_vm13, %vm3332_vm15  ;;  %v3179_v46 = vmin.f32 %v3163_v21, 1e+10  ;;  %v3148_v49 = vmin.f32 %v3132_v42, %v6111_v44  ;;  %v3117_v20 = vmin.f32 %v6969_v19, %v2895_v11  ;;  %v2897_v61 = vpop.f32.mrb[189].mxu1  ;;  %vm3391_vm15 = vcmp.ne.s32.totalorder %v3352_v10, %v6085_v14 }
 0x300   :  { %vm3484_vm10 = vmand %vm6421_vm13, %vm6449_vm3  ;;  %vm3267_vm13 = vcmp.eq.s32.totalorder %v6974_v16, %v6083_v2  ;;  %v3355_v32 = vadd.s32 112, %v6044_v31  ;;  %v6993_v11 = vmin.f32 %v6081_v60, %v5984_v59 }
 0x301   :  { %vm6486_vm11 = vmxor %vm3333_vm7, %vm4082_vm9  ;;  %v3436_v44 = vsel %vm6471_vm8, %v3179_v46, 1e+10  ;;  %v3500_v34 = vsel %vm3484_vm10, %v3179_v46, 1e+10  ;;  %v3164_v7 = vmax.f32 %v3148_v49, 0.0  ;;  %v3133_v56 = vmin.f32 %v3117_v20, %v2897_v61  ;;  %v3313_v49 = vpop.permute.xlu0 %3312  ;;  %v6998_v61 = vld [vmem:[#allocation31_spill] sm:$0xff] }
 0x302   :  { %vm6497_vm12 = vmand %vm3266_vm6, %vm3390_vm5  ;;  %3452 = vst [vmem:[#allocation2 + $0x40] sm:$0xff] %v3436_v44  ;;  %v2901_v5 = vpop.f32.mrb[190].mxu1  ;;  %vm3268_vm5 = vcmp.eq.s32.totalorder %v6982_v33, %v6083_v2  ;;  %vm3335_vm6 = vcmp.eq.s32.totalorder %v3307_v45, %v6100_v40  ;;  %v3316_v44 = vpop.permute.xlu1 %3315  ;;  %v7006_v45 = vld [vmem:[#allocation27_spill] sm:$0xff] }
 0x303   :  { %3516 = vst [vmem:[#allocation4 + $0x40] sm:$0xff] %v3500_v34  ;;  %vm6510_vm0 = vmand %vm6458_vm4, %vm3333_vm7  ;;  %v3180_v52 = vmin.f32 %v3164_v7, 1e+10  ;;  %v3149_v43 = vmin.f32 %v3133_v56, %v6136_v24  ;;  %v3118_v29 = vmin.f32 %v6977_v58, %v2901_v5  ;;  %v2903_v63 = vpop.f32.mrb[191].mxu1  ;;  %v6999_v56 = vld [vmem:[#allocation11_spill] sm:$0xff] }
 0x304   :  { %vm3485_vm1 = vmand %vm6458_vm4, %vm6486_vm11  ;;  %vm3392_vm4 = vcmp.ne.s32.totalorder %v3353_v25, %v6085_v14  ;;  %v7000_v28 = vmin.f32 %v6109_v27, %v6999_v56 }
 0x305   :  { %vm6525_vm2 = vmxor %vm3334_vm14, %vm4082_vm9  ;;  %v3437_v24 = vsel %vm6510_vm0, %v3180_v52, 1e+10  ;;  %v3501_v3 = vsel %vm3485_vm1, %v3180_v52, 1e+10  ;;  %v3165_v38 = vmax.f32 %v3149_v43, 0.0  ;;  %v3134_v55 = vmin.f32 %v3118_v29, %v2903_v63  ;;  %v7005_v43 = vld [vmem:[#allocation21_spill] sm:$0xff]  ;;  %v3319_v29 = vpop.permute.xlu0 %3318 }
 0x306   :  { %vm6534_vm3 = vmand %vm3267_vm13, %vm3391_vm15  ;;  %3453 = vst [vmem:[#allocation2 + $0x48] sm:$0xff] %v3437_v24  ;;  %v2907_v36 = vpop.f32.mrb[192].mxu1  ;;  %vm3336_vm13 = vcmp.eq.s32.totalorder %v3310_v37, %v6100_v40  ;;  %v7007_v24 = vld [vmem:[#allocation17_spill] sm:$0xff] }
 0x307   :  { %3517 = vst [vmem:[#allocation4 + $0x48] sm:$0xff] %v3501_v3  ;;  %vm6547_vm7 = vmand %vm6497_vm12, %vm3334_vm14  ;;  %v3181_v35 = vmin.f32 %v3165_v38, 1e+10  ;;  %v3150_v1 = vmin.f32 %v3134_v55, %v6128_v41  ;;  %v3119_v0 = vmin.f32 %v6985_v23, %v2907_v36  ;;  %v2909_v17 = vpop.f32.mrb[193].mxu1  ;;  %vm3393_vm14 = vcmp.ne.s32.totalorder %v3354_v13, %v6085_v14 }
 0x308   :  { %vm3486_vm8 = vmand %vm6497_vm12, %vm6525_vm2  ;;  %vm3269_vm12 = vcmp.eq.s32.totalorder %v6990_v8, %v6083_v2  ;;  %v7008_v3 = vmin.f32 %v7006_v45, %v7007_v24 }
 0x309   :  { %vm6562_vm10 = vmxor %vm3335_vm6, %vm4082_vm9  ;;  %v3438_v41 = vsel %vm6547_vm7, %v3181_v35, 1e+10  ;;  %v3502_v39 = vsel %vm3486_vm8, %v3181_v35, 1e+10  ;;  %v3166_v50 = vmax.f32 %v3150_v1, 0.0  ;;  %v3135_v15 = vmin.f32 %v3119_v0, %v2909_v17 }
 0x30a   :  { %vm6573_vm11 = vmand %vm3268_vm5, %vm3392_vm4  ;;  %3454 = vst [vmem:[#allocation2 + $0x50] sm:$0xff] %v3438_v41  ;;  %v2913_v21 = vpop.f32.mrb[194].mxu1  ;;  %vm3270_vm4 = vcmp.eq.s32.totalorder %v6998_v61, %v6083_v2  ;;  %vm3337_vm5 = vcmp.eq.s32.totalorder %v3313_v49, %v6100_v40 }
 0x30b   :  { %3518 = vst [vmem:[#allocation4 + $0x50] sm:$0xff] %v3502_v39  ;;  %vm6586_vm15 = vmand %vm6534_vm3, %vm3335_vm6  ;;  %v3182_v22 = vmin.f32 %v3166_v50, 1e+10  ;;  %v3151_v47 = vmin.f32 %v3135_v15, %v6173_v9  ;;  %v3120_v10 = vmin.f32 %v6993_v11, %v2913_v21  ;;  %v2915_v54 = vpop.f32.mrb[195].mxu1 }
 0x30c   :  { %vm3487_vm0 = vmand %vm6534_vm3, %vm6562_vm10  ;;  %vm3394_vm3 = vcmp.ne.s32.totalorder %v3355_v32, %v6085_v14 }
 0x30d   :  { %vm6601_vm1 = vmxor %vm3336_vm13, %vm4082_vm9  ;;  %v3439_v9 = vsel %vm6586_vm15, %v3182_v22, 1e+10  ;;  %v3503_v19 = vsel %vm3487_vm0, %v3182_v22, 1e+10  ;;  %v3167_v59 = vmax.f32 %v3151_v47, 0.0  ;;  %v3136_v60 = vmin.f32 %v3120_v10, %v2915_v54 }
 0x30e   :  { %vm6610_vm2 = vmand %vm3269_vm12, %vm3393_vm14  ;;  %3455 = vst [vmem:[#allocation2 + $0x58] sm:$0xff] %v3439_v9  ;;  %v2919_v57 = vpop.f32.mrb[196].mxu1  ;;  %vm3338_vm12 = vcmp.eq.s32.totalorder %v3316_v44, %v6100_v40 }
 0x30f   :  { %3519 = vst [vmem:[#allocation4 + $0x58] sm:$0xff] %v3503_v19  ;;  %vm3424_vm6 = vmand %vm6573_vm11, %vm3336_vm13  ;;  %v3183_v34 = vmin.f32 %v3167_v59, 1e+10  ;;  %v3152_v7 = vmin.f32 %v3136_v60, %v6159_v6  ;;  %v3121_v16 = vmin.f32 %v7000_v28, %v2919_v57  ;;  %v2921_v25 = vpop.f32.mrb[197].mxu1  ;;  %vm3395_vm13 = vcmp.ne.s32.totalorder %v3356_v4, %v6085_v14 }
 0x310   :  { %vm3488_vm7 = vmand %vm6573_vm11, %vm6601_vm1  ;;  %vm3271_vm11 = vcmp.eq.s32.totalorder %v7005_v43, %v6083_v2 }
 0x311   :  { %vm6634_vm8 = vmxor %vm3337_vm5, %vm4082_vm9  ;;  %v3440_v5 = vsel %vm3424_vm6, %v3183_v34, 1e+10  ;;  %v3504_v18 = vsel %vm3488_vm7, %v3183_v34, 1e+10  ;;  %v3168_v6 = vmax.f32 %v3152_v7, 0.0  ;;  %v3137_v52 = vmin.f32 %v3121_v16, %v2921_v25 }
 0x312   :  { %vm6643_vm10 = vmand %vm3270_vm4, %vm3394_vm3  ;;  %3456 = vst [vmem:[#allocation2 + $0x60] sm:$0xff] %v3440_v5  ;;  %v2925_v58 = vpop.f32.mrb[198].mxu1 }
 0x313   :  { %3520 = vst [vmem:[#allocation4 + $0x60] sm:$0xff] %v3504_v18  ;;  %vm3425_vm14 = vmand %vm6610_vm2, %vm3337_vm5  ;;  %v3184_v63 = vmin.f32 %v3168_v6, 1e+10  ;;  %v3153_v62 = vmin.f32 %v3137_v52, %v6207_v51  ;;  %v3122_v38 = vmin.f32 %v7008_v3, %v2925_v58  ;;  %v2927_v55 = vpop.f32.mrb[199].mxu1 }
 0x314   :  { %vm3489_vm15 = vmand %vm6610_vm2, %vm6634_vm8  ;;  %vm3339_vm2 = vcmp.eq.s32.totalorder %v3319_v29, %v6100_v40 }
 0x315   :  { %vm6666_vm0 = vmxor %vm3338_vm12, %vm4082_vm9  ;;  %v3441_v53 = vsel %vm3425_vm14, %v3184_v63, 1e+10  ;;  %v3505_v33 = vsel %vm3489_vm15, %v3184_v63, 1e+10  ;;  %v3169_v51 = vmax.f32 %v3153_v62, 0.0  ;;  %v3138_v36 = vmin.f32 %v3122_v38, %v2927_v55 }
 0x316   :  { %vm6673_vm1 = vmand %vm3271_vm11, %vm3395_vm13  ;;  %3457 = vst [vmem:[#allocation2 + $0x68] sm:$0xff] %v3441_v53 }
 0x317   :  { %3521 = vst [vmem:[#allocation4 + $0x68] sm:$0xff] %v3505_v33  ;;  %vm3426_vm3 = vmand %vm6643_vm10, %vm3338_vm12  ;;  %v3185_v48 = vmin.f32 %v3169_v51, 1e+10  ;;  %v3154_v35 = vmin.f32 %v3138_v36, %v6200_v26 }
 0x318   :  { %vm3490_vm4 = vmand %vm6643_vm10, %vm6666_vm0 }
 0x319   :  { %vm3475_vm5 = vmxor %vm3339_vm2, %vm4082_vm9  ;;  %v3442_v2 = vsel %vm3426_vm3, %v3185_v48, 1e+10  ;;  %v3506_v1 = vsel %vm3490_vm4, %v3185_v48, 1e+10  ;;  %v3170_v23 = vmax.f32 %v3154_v35, 0.0 }
 0x31a   :  { %3458 = vst [vmem:[#allocation2 + $0x70] sm:$0xff] %v3442_v2  ;;  %3522 = vst [vmem:[#allocation4 + $0x70] sm:$0xff] %v3506_v1 }
 0x31b   :  { %vm3427_vm6 = vmand %vm6673_vm1, %vm3339_vm2  ;;  %v3186_v26 = vmin.f32 %v3170_v23, 1e+10 }
 0x31c   :  { %vm3491_vm7 = vmand %vm6673_vm1, %vm3475_vm5 }
 0x31d   :  { %v3443_v0 = vsel %vm3427_vm6, %v3186_v26, 1e+10  ;;  %v3507_v17 = vsel %vm3491_vm7, %v3186_v26, 1e+10 }
 0x31e   :  { %3459 = vst [vmem:[#allocation2 + $0x78] sm:$0xff] %v3443_v0  ;;  %3523 = vst [vmem:[#allocation4 + $0x78] sm:$0xff] %v3507_v17 }
 0x31f   :  { %4042 = shalt.err (!%p4039_p4)
}
 0x320   :  { %s4043_s28 = scalar_lea.hbm %s6731_s4, 2048 }
 0x321   :  { %p4044_p5 = scmp.ne.s32.totalorder %s6731_s4, %s4043_s28  ;;  %p4047_p6 = scmp.lt.u32.totalorder %s4043_s28, %s6731_s4 }
 0x323   :  { %p4049_p7 = pnand %p4047_p6, %p4044_p5 }
 0x325   :  { %4052 = shalt.err (!%p4049_p7)
}
 0x326   :  { %s4085_s8 = smov 128   ;;  %s4086_s9 = smov 8  }
 0x327   :  { %3535 = dma.vmem_to_hbm [thread:$0]  %s3530_s22, 2048, %s6731_s4, [#allocation3], %s4085_s8, %s4085_s8, %s4086_s9  }
 0x328   :  { %s4053_s12 = scalar_lea.vmem %s6696_s24, 2048  ;;  %p4058_p9 = scmp.lt.s32.totalorder %s6696_s24, %s6696_s24 }
 0x329   :  { %p4054_p8 = scmp.ne.s32.totalorder %s6696_s24, %s4053_s12  ;;  %p4059_p10 = scmp.lt.s32.totalorder %s4053_s12, %s4053_s12 }
 0x32b   :  { %p4060_p11 = por %p4059_p10, %p4058_p9 }
 0x32d   :  { %p4061_p12 = pnand %p4060_p11, %p4054_p8 }
 0x32f   :  { %4064 = shalt.err (!%p4061_p12)
}
 0x330   :  { %s4065_s14 = scalar_lea.hbm %s6732_s5, 2048 }
 0x331   :  { %p4066_p13 = scmp.ne.s32.totalorder %s6732_s5, %s4065_s14  ;;  %p4069_p0 = scmp.lt.u32.totalorder %s4065_s14, %s6732_s5 }
 0x333   :  { %p4071_p1 = pnand %p4069_p0, %p4066_p13 }
 0x335   :  { %4074 = shalt.err (!%p4071_p1)
}
 0x336   :  { %3547 = dma.vmem_to_hbm [thread:$0]  %s6696_s24, 2048, %s6732_s5, [#allocation5], %s4085_s8, %s4085_s8, %s4086_s9  }
 0x337   :  { %4075 = dma.done.wait [#allocation3], 2048  }
 0x338   :  { %4076 = vsyncadd [#allocation3], 4294965248 }
 0x339   :  { %4077 = dma.done.wait [#allocation5], 2048  }
 0x33a   :  { %4078 = vsyncadd [#allocation5], 4294965248 }
 0x33b   :  { %3554 = vsyncpa [#allocation3], 1 }
 0x33c   :  { %3555 = vsyncpa [#allocation5], 1 }

</bundles_post_ra>
